<compile_context>
chip_gen: v6e
topology: v6e:2x2x1
jax: 0.10.0
libtpu: 0.0.40
codegen_flags: <defaults>
</compile_context>

<pallas_src>
import math

import numpy as np

import jax
import jax.numpy as jnp
from jax.experimental import pallas as pl
from jax.experimental.pallas import tpu as pltpu

EPS_IN = 1e-5  # nn.InstanceNorm2d default eps


# ----------------------------- fused Pallas kernel ------------------------- #

def _conv_in_prelu_block(f2d, a_ref, k_ref, p_ref, pt_ref, aff_ref):
    """One [conv 4x4/s2/p1 -> InstanceNorm2d(affine) -> PReLU] block.

    f2d: (H, W*Cin) f32 feature map (channels lane-minor).
    Returns (Ho, Wo*Cout) f32 -- the next block's input layout.
    """
    ho = a_ref.shape[1]
    woc = k_ref.shape[2]
    c_out = p_ref.shape[1]
    wo = woc // c_out
    inv_n = 1.0 / float(ho * wo)

    # conv as 4 row-tap matmuls: bf16 MXU operands, f32 accumulation.
    f_b = f2d.astype(jnp.bfloat16)
    acc = jnp.zeros((ho, woc), jnp.float32)
    for i in range(4):
        g = jnp.dot(a_ref[i], f_b, preferred_element_type=jnp.float32)   # (Ho, W*Cin)
        acc = acc + jnp.dot(g.astype(jnp.bfloat16), k_ref[i],
                            preferred_element_type=jnp.float32)          # (Ho, Wo*Cout)

    # InstanceNorm2d: single-pass per-channel stats (sum + sum of squares), f32.
    p = p_ref[...]                                                       # (Wo*Cout, Cout)
    pt = pt_ref[...]                                                     # (Cout, Wo*Cout)
    s1 = jnp.dot(jnp.sum(acc, axis=0, keepdims=True), p,
                 preferred_element_type=jnp.float32)                     # (1, Cout)
    s2 = jnp.dot(jnp.sum(acc * acc, axis=0, keepdims=True), p,
                 preferred_element_type=jnp.float32)                     # (1, Cout)
    mean = s1 * inv_n
    var = s2 * inv_n - mean * mean                                       # biased var
    rstd = jax.lax.rsqrt(var + EPS_IN)

    gamma = aff_ref[0:1, :]                                              # (1, Cout)
    beta = aff_ref[1:2, :]
    alpha = aff_ref[2:3, :]                                              # PReLU slopes
    scale_c = gamma * rstd
    shift_c = beta - mean * scale_c

    # Broadcast per-channel values back to the (., Wo*Cout) lane layout via P^T.
    scale = jnp.dot(scale_c, pt, preferred_element_type=jnp.float32)     # (1, Wo*Cout)
    shift = jnp.dot(shift_c, pt, preferred_element_type=jnp.float32)
    alpha_f = jnp.dot(alpha, pt, preferred_element_type=jnp.float32)

    y = acc * scale + shift
    return jnp.where(y >= 0.0, y, alpha_f * y)


def _fused_kernel(*refs):
    x_ref = refs[0]
    o_ref = refs[-1]
    n_blocks = 4
    blk_refs = [refs[1 + 5 * i: 1 + 5 * (i + 1)] for i in range(n_blocks)]
    head_start = 1 + 5 * n_blocks
    w1_ref, b1a1_ref, w2_ref, b2s_ref = refs[head_start:head_start + 4]

    f = x_ref[...]                                   # (H, W*Cin) f32, one sample
    for (a_ref, k_ref, p_ref, pt_ref, aff_ref) in blk_refs:
        f = _conv_in_prelu_block(f, a_ref, k_ref, p_ref, pt_ref, aff_ref)

    # AdaptiveMaxPool2d(1): max over rows (sublanes) then over Wo lane-groups.
    c_out = w1_ref.shape[0]                          # dim*8
    n_groups = f.shape[1] // c_out                   # Wo of last block
    colmax = jnp.max(f, axis=0, keepdims=True)       # (1, Wo*C)
    pooled = colmax[:, 0:c_out]
    for g in range(1, n_groups):
        pooled = jnp.maximum(pooled, colmax[:, g * c_out:(g + 1) * c_out])

    # Linear -> PReLU -> Linear -> LearnableSigmoid_1d(1)   (all f32)
    h = jnp.dot(pooled, w1_ref[...], preferred_element_type=jnp.float32)
    h = h + b1a1_ref[0:1, :]
    # TODO(synk): Dropout(0.3) is identity in eval mode; not applied here.
    a1 = b1a1_ref[1:2, :]
    h = jnp.where(h >= 0.0, h, a1 * h)
    z = jnp.dot(h, w2_ref[...], preferred_element_type=jnp.float32)
    z = z + b2s_ref[0:1, :]
    t = b2s_ref[1:2, :] * z                          # learnable slope, beta=1
    o_ref[...] = 1.0 / (1.0 + jnp.exp(-t))


# ------------------------------ forward wrapper ----------------------------- #

def metric_discriminator_forward(x, y, params):
    """x, y: (B, H, W) float32.  Returns (B, 1) in [0, 1]."""
    B, H, W = x.shape
    # torch.stack((x, y), dim=1) in NCHW == channel-minor stack in our layout.
    x2d = jnp.stack((x, y), axis=-1).reshape(B, H, 2 * W).astype(jnp.float32)

    def _const_spec(arr):
        if arr.ndim == 2:
            return pl.BlockSpec(arr.shape, lambda b: (0, 0))
        return pl.BlockSpec(arr.shape, lambda b: (0, 0, 0))

    inputs = [x2d]
    in_specs = [pl.BlockSpec((None, H, 2 * W), lambda b: (b, 0, 0))]
    for blk in params["blocks"]:
        for name in ("A", "K", "P", "PT", "aff"):
            inputs.append(blk[name])
            in_specs.append(_const_spec(blk[name]))
    for name in ("w1", "b1a1", "w2", "b2s"):
        inputs.append(params["head"][name])
        in_specs.append(_const_spec(params["head"][name]))

    out = pl.pallas_call(
        _fused_kernel,
        out_shape=jax.ShapeDtypeStruct((B, 1, 1), jnp.float32),
        grid=(B,),
        in_specs=in_specs,
        out_specs=pl.BlockSpec((None, 1, 1), lambda b: (b, 0, 0)),
        compiler_params=pltpu.CompilerParams(dimension_semantics=("parallel",)),
    )(*inputs)
    return out.reshape(B, 1)


# --------------------------- parameter construction ------------------------- #

def spectral_sigma(w2d, iters=30):
    """Largest singular value via power iteration (spectral_norm semantics)."""
    u = jnp.ones((w2d.shape[0],), jnp.float32)
    u = u / jnp.linalg.norm(u)
    v = None
    for _ in range(iters):
        v = w2d.T @ u
        v = v / (jnp.linalg.norm(v) + 1e-12)
        u = w2d @ v
        u = u / (jnp.linalg.norm(u) + 1e-12)
    return jnp.dot(u, w2d @ v)


def _row_select_mats(h_in, h_out):
    """A[i]: (Ho, H) 0/1; selects input row 2*ho + i - 1 (pad=1, stride=2)."""
    A = np.zeros((4, h_out, h_in), np.float32)
    for i in range(4):
        for o in range(h_out):
            r = 2 * o + i - 1
            if 0 <= r < h_in:
                A[i, o, r] = 1.0
    return A


def _col_weight_mats(w_conv, w_in, w_out):
    """K[i]: (W*Cin, Wo*Cout) banded conv-weight matrix for kernel row i."""
    c_out, c_in = w_conv.shape[0], w_conv.shape[1]
    K = np.zeros((4, w_in * c_in, w_out * c_out), np.float32)
    for i in range(4):
        for o in range(w_out):
            for j in range(4):
                w = 2 * o + j - 1
                if 0 <= w < w_in:
                    K[i, w * c_in:(w + 1) * c_in, o * c_out:(o + 1) * c_out] = \
                        w_conv[:, :, i, j].T
    return K


def _chan_reduce_mat(w_out, c_out):
    """P: (Wo*Cout, Cout) 0/1 group-sum / broadcast matrix."""
    P = np.zeros((w_out * c_out, c_out), np.float32)
    eye = np.eye(c_out, dtype=np.float32)
    for o in range(w_out):
        P[o * c_out:(o + 1) * c_out, :] = eye
    return P


def init_params(key, dim=16, in_channel=2, H=32, W=32):
    assert H % 16 == 0 and W % 16 == 0, "4 stride-2 convs need H, W % 16 == 0"
    keys = jax.random.split(key, 8)
    chans = [in_channel, dim, dim * 2, dim * 4, dim * 8]
    blocks, raw_convs = [], []
    h, w = H, W
    for li in range(4):
        cin, cout = chans[li], chans[li + 1]
        bound = 1.0 / math.sqrt(cin * 16)
        wc = jax.random.uniform(keys[li], (cout, cin, 4, 4), jnp.float32,
                                -bound, bound)
        wc = wc / spectral_sigma(wc.reshape(cout, -1))            # spectral norm
        raw_convs.append(wc)
        wc_np = np.asarray(jax.device_get(wc))
        ho, wo = h // 2, w // 2
        A = _row_select_mats(h, ho)
        K = _col_weight_mats(wc_np, w, wo)
        P = _chan_reduce_mat(wo, cout)
        aff = np.stack([np.ones(cout, np.float32),                # gamma
                        np.zeros(cout, np.float32),               # beta
                        np.full(cout, 0.25, np.float32)])         # PReLU alpha
        blocks.append(dict(
            A=jnp.asarray(A, jnp.bfloat16),       # 0/1 -> exact in bf16
            K=jnp.asarray(K, jnp.bfloat16),       # bf16 MXU operand
            P=jnp.asarray(P, jnp.float32),
            PT=jnp.asarray(np.ascontiguousarray(P.T), jnp.float32),
            aff=jnp.asarray(aff, jnp.float32),
        ))
        h, w = ho, wo

    d8, d4 = dim * 8, dim * 4
    b1s = 1.0 / math.sqrt(d8)
    w1 = jax.random.uniform(keys[4], (d4, d8), jnp.float32, -b1s, b1s)
    b1 = jax.random.uniform(keys[5], (d4,), jnp.float32, -b1s, b1s)
    w1 = w1 / spectral_sigma(w1)
    b2bound = 1.0 / math.sqrt(d4)
    w2 = jax.random.uniform(keys[6], (1, d4), jnp.float32, -b2bound, b2bound)
    b2 = jax.random.uniform(keys[7], (1,), jnp.float32, -b2bound, b2bound)
    w2 = w2 / spectral_sigma(w2)

    head = dict(
        w1=jnp.transpose(w1),                                      # (d8, d4)
        b1a1=jnp.stack([b1, jnp.full((d4,), 0.25, jnp.float32)]),  # (2, d4): bias, PReLU
        w2=jnp.transpose(w2),                                      # (d4, 1)
        b2s=jnp.concatenate([b2.reshape(1, 1),
                             jnp.ones((1, 1), jnp.float32)]),      # (2, 1): bias, slope
    )
    raw = dict(convs=raw_convs, w1=w1, b1=b1, w2=w2, b2=b2)
    return dict(blocks=blocks, head=head, raw=raw)


# ------------------------------ plain-JAX reference -------------------------- #

def reference_forward(x, y, params):
    """f32 reference of the PyTorch module (for correctness check)."""
    xy = jnp.stack((x, y), axis=1)                        # (B, 2, H, W)
    h = jnp.transpose(xy, (0, 2, 3, 1))                   # NHWC
    for wc, blk in zip(params["raw"]["convs"], params["blocks"]):
        w_hwio = jnp.transpose(wc, (2, 3, 1, 0))
        h = jax.lax.conv_general_dilated(
            h, w_hwio, window_strides=(2, 2), padding=((1, 1), (1, 1)),
            dimension_numbers=("NHWC", "HWIO", "NHWC"))
        aff = blk["aff"]
        mean = jnp.mean(h, axis=(1, 2), keepdims=True)
        var = jnp.mean(jnp.square(h - mean), axis=(1, 2), keepdims=True)
        h = (h - mean) * jax.lax.rsqrt(var + EPS_IN)
        h = h * aff[0] + aff[1]
        h = jnp.where(h >= 0.0, h, aff[2] * h)
    pooled = jnp.max(h, axis=(1, 2))                      # AdaptiveMaxPool2d(1)
    raw = params["raw"]
    z = pooled @ raw["w1"].T + raw["b1"]
    z = jnp.where(z >= 0.0, z, 0.25 * z)
    z = z @ raw["w2"].T + raw["b2"]
    return 1.0 / (1.0 + jnp.exp(-z))                      # slope=1, beta=1


if __name__ == "__main__":
    key = jax.random.PRNGKey(0)
    kx, ky, kp = jax.random.split(key, 3)
    B, H, W = 2, 32, 32                                   # small spectrogram-like input
    x = jax.random.normal(kx, (B, H, W), jnp.float32)
    y = jax.random.normal(ky, (B, H, W), jnp.float32)
    params = init_params(kp, dim=16, in_channel=2, H=H, W=W)

    out = jax.jit(metric_discriminator_forward)(x, y, params)
    out = jax.block_until_ready(out)
    assert out.shape == (B, 1), out.shape
    assert bool(jnp.all(jnp.isfinite(out)))
    assert bool(jnp.all((out >= 0.0) & (out <= 1.0)))

    ref = reference_forward(x, y, params)
    assert bool(jnp.allclose(out, ref, atol=5e-2)), (out, ref)
    print("KERNEL_OK")
</pallas_src>

<mosaic_0001>
module attributes {stable_mosaic.version = 11 : i64} {
  func.func @_fused_kernel(%arg0: i32, %arg1: memref<1x32x64xf32, #tpu.memory_space<vmem>>, %arg2: memref<4x16x32xbf16, #tpu.memory_space<vmem>>, %arg3: memref<4x64x256xbf16, #tpu.memory_space<vmem>>, %arg4: memref<256x16xf32, #tpu.memory_space<vmem>>, %arg5: memref<16x256xf32, #tpu.memory_space<vmem>>, %arg6: memref<3x16xf32, #tpu.memory_space<vmem>>, %arg7: memref<4x8x16xbf16, #tpu.memory_space<vmem>>, %arg8: memref<4x256x256xbf16, #tpu.memory_space<vmem>>, %arg9: memref<256x32xf32, #tpu.memory_space<vmem>>, %arg10: memref<32x256xf32, #tpu.memory_space<vmem>>, %arg11: memref<3x32xf32, #tpu.memory_space<vmem>>, %arg12: memref<4x4x8xbf16, #tpu.memory_space<vmem>>, %arg13: memref<4x256x256xbf16, #tpu.memory_space<vmem>>, %arg14: memref<256x64xf32, #tpu.memory_space<vmem>>, %arg15: memref<64x256xf32, #tpu.memory_space<vmem>>, %arg16: memref<3x64xf32, #tpu.memory_space<vmem>>, %arg17: memref<4x2x4xbf16, #tpu.memory_space<vmem>>, %arg18: memref<4x256x256xbf16, #tpu.memory_space<vmem>>, %arg19: memref<256x128xf32, #tpu.memory_space<vmem>>, %arg20: memref<128x256xf32, #tpu.memory_space<vmem>>, %arg21: memref<3x128xf32, #tpu.memory_space<vmem>>, %arg22: memref<128x64xf32, #tpu.memory_space<vmem>>, %arg23: memref<2x64xf32, #tpu.memory_space<vmem>>, %arg24: memref<64x1xf32, #tpu.memory_space<vmem>>, %arg25: memref<2x1xf32, #tpu.memory_space<vmem>>, %arg26: memref<1x1x1xf32, #tpu.memory_space<vmem>>) attributes {dimension_semantics = [#tpu.dimension_semantics<parallel>], iteration_bounds = array<i64: 2>, scalar_prefetch = 0 : i64, scratch_operands = 0 : i64, tpu.core_type = #tpu.core_type<tc>, window_params = [{transform_indices = @transform_0, window_bounds = array<i64: 1, 32, 64>}, {pipeline_mode = #tpu.pipeline_mode<synchronous>, transform_indices = @transform_1, window_bounds = array<i64: 4, 16, 32>}, {pipeline_mode = #tpu.pipeline_mode<synchronous>, transform_indices = @transform_2, window_bounds = array<i64: 4, 64, 256>}, {pipeline_mode = #tpu.pipeline_mode<synchronous>, transform_indices = @transform_3, window_bounds = array<i64: 256, 16>}, {pipeline_mode = #tpu.pipeline_mode<synchronous>, transform_indices = @transform_4, window_bounds = array<i64: 16, 256>}, {pipeline_mode = #tpu.pipeline_mode<synchronous>, transform_indices = @transform_5, window_bounds = array<i64: 3, 16>}, {pipeline_mode = #tpu.pipeline_mode<synchronous>, transform_indices = @transform_6, window_bounds = array<i64: 4, 8, 16>}, {pipeline_mode = #tpu.pipeline_mode<synchronous>, transform_indices = @transform_7, window_bounds = array<i64: 4, 256, 256>}, {pipeline_mode = #tpu.pipeline_mode<synchronous>, transform_indices = @transform_8, window_bounds = array<i64: 256, 32>}, {pipeline_mode = #tpu.pipeline_mode<synchronous>, transform_indices = @transform_9, window_bounds = array<i64: 32, 256>}, {pipeline_mode = #tpu.pipeline_mode<synchronous>, transform_indices = @transform_10, window_bounds = array<i64: 3, 32>}, {pipeline_mode = #tpu.pipeline_mode<synchronous>, transform_indices = @transform_11, window_bounds = array<i64: 4, 4, 8>}, {pipeline_mode = #tpu.pipeline_mode<synchronous>, transform_indices = @transform_12, window_bounds = array<i64: 4, 256, 256>}, {pipeline_mode = #tpu.pipeline_mode<synchronous>, transform_indices = @transform_13, window_bounds = array<i64: 256, 64>}, {pipeline_mode = #tpu.pipeline_mode<synchronous>, transform_indices = @transform_14, window_bounds = array<i64: 64, 256>}, {pipeline_mode = #tpu.pipeline_mode<synchronous>, transform_indices = @transform_15, window_bounds = array<i64: 3, 64>}, {pipeline_mode = #tpu.pipeline_mode<synchronous>, transform_indices = @transform_16, window_bounds = array<i64: 4, 2, 4>}, {pipeline_mode = #tpu.pipeline_mode<synchronous>, transform_indices = @transform_17, window_bounds = array<i64: 4, 256, 256>}, {pipeline_mode = #tpu.pipeline_mode<synchronous>, transform_indices = @transform_18, window_bounds = array<i64: 256, 128>}, {pipeline_mode = #tpu.pipeline_mode<synchronous>, transform_indices = @transform_19, window_bounds = array<i64: 128, 256>}, {pipeline_mode = #tpu.pipeline_mode<synchronous>, transform_indices = @transform_20, window_bounds = array<i64: 3, 128>}, {pipeline_mode = #tpu.pipeline_mode<synchronous>, transform_indices = @transform_21, window_bounds = array<i64: 128, 64>}, {pipeline_mode = #tpu.pipeline_mode<synchronous>, transform_indices = @transform_22, window_bounds = array<i64: 2, 64>}, {pipeline_mode = #tpu.pipeline_mode<synchronous>, transform_indices = @transform_23, window_bounds = array<i64: 64, 1>}, {pipeline_mode = #tpu.pipeline_mode<synchronous>, transform_indices = @transform_24, window_bounds = array<i64: 2, 1>}, {transform_indices = @transform_25, window_bounds = array<i64: 1, 1, 1>}]} {
    %c0 = arith.constant 0 : index
    %c0_0 = arith.constant 0 : index
    %c0_1 = arith.constant 0 : index
    %0 = vector.load %arg1[%c0, %c0_0, %c0_1] : memref<1x32x64xf32, #tpu.memory_space<vmem>>, vector<1x32x64xf32>
    %1 = vector.shape_cast %0 : vector<1x32x64xf32> to vector<32x64xf32>
    %2 = arith.truncf %1 : vector<32x64xf32> to vector<32x64xbf16>
    %cst = arith.constant 0.000000e+00 : f32
    %3 = vector.broadcast %cst : f32 to vector<16x256xf32>
    %c0_2 = arith.constant 0 : index
    %c0_3 = arith.constant 0 : index
    %c0_4 = arith.constant 0 : index
    %4 = vector.load %arg2[%c0_2, %c0_3, %c0_4] : memref<4x16x32xbf16, #tpu.memory_space<vmem>>, vector<1x16x32xbf16>
    %5 = vector.shape_cast %4 : vector<1x16x32xbf16> to vector<16x32xbf16>
    %cst_5 = arith.constant dense<0.000000e+00> : vector<16x64xf32>
    %6 = tpu.matmul %5, %2, %cst_5 {dimension_numbers = #tpu.dot_dimension_numbers<[1], [0], [0], [1], [0, 0, 1, 1], [], []>} : vector<16x32xbf16>, vector<32x64xbf16>, vector<16x64xf32> -> vector<16x64xf32>
    %7 = arith.truncf %6 : vector<16x64xf32> to vector<16x64xbf16>
    %c0_6 = arith.constant 0 : index
    %c0_7 = arith.constant 0 : index
    %c0_8 = arith.constant 0 : index
    %8 = vector.load %arg3[%c0_6, %c0_7, %c0_8] : memref<4x64x256xbf16, #tpu.memory_space<vmem>>, vector<1x64x256xbf16>
    %9 = vector.shape_cast %8 : vector<1x64x256xbf16> to vector<64x256xbf16>
    %cst_9 = arith.constant dense<0.000000e+00> : vector<16x256xf32>
    %10 = tpu.matmul %7, %9, %cst_9 {dimension_numbers = #tpu.dot_dimension_numbers<[1], [0], [0], [1], [0, 0, 1, 1], [], []>} : vector<16x64xbf16>, vector<64x256xbf16>, vector<16x256xf32> -> vector<16x256xf32>
    %11 = arith.addf %3, %10 : vector<16x256xf32>
    %c1 = arith.constant 1 : index
    %c0_10 = arith.constant 0 : index
    %c0_11 = arith.constant 0 : index
    %12 = vector.load %arg2[%c1, %c0_10, %c0_11] : memref<4x16x32xbf16, #tpu.memory_space<vmem>>, vector<1x16x32xbf16>
    %13 = vector.shape_cast %12 : vector<1x16x32xbf16> to vector<16x32xbf16>
    %cst_12 = arith.constant dense<0.000000e+00> : vector<16x64xf32>
    %14 = tpu.matmul %13, %2, %cst_12 {dimension_numbers = #tpu.dot_dimension_numbers<[1], [0], [0], [1], [0, 0, 1, 1], [], []>} : vector<16x32xbf16>, vector<32x64xbf16>, vector<16x64xf32> -> vector<16x64xf32>
    %15 = arith.truncf %14 : vector<16x64xf32> to vector<16x64xbf16>
    %c1_13 = arith.constant 1 : index
    %c0_14 = arith.constant 0 : index
    %c0_15 = arith.constant 0 : index
    %16 = vector.load %arg3[%c1_13, %c0_14, %c0_15] : memref<4x64x256xbf16, #tpu.memory_space<vmem>>, vector<1x64x256xbf16>
    %17 = vector.shape_cast %16 : vector<1x64x256xbf16> to vector<64x256xbf16>
    %cst_16 = arith.constant dense<0.000000e+00> : vector<16x256xf32>
    %18 = tpu.matmul %15, %17, %cst_16 {dimension_numbers = #tpu.dot_dimension_numbers<[1], [0], [0], [1], [0, 0, 1, 1], [], []>} : vector<16x64xbf16>, vector<64x256xbf16>, vector<16x256xf32> -> vector<16x256xf32>
    %19 = arith.addf %11, %18 : vector<16x256xf32>
    %c2 = arith.constant 2 : index
    %c0_17 = arith.constant 0 : index
    %c0_18 = arith.constant 0 : index
    %20 = vector.load %arg2[%c2, %c0_17, %c0_18] : memref<4x16x32xbf16, #tpu.memory_space<vmem>>, vector<1x16x32xbf16>
    %21 = vector.shape_cast %20 : vector<1x16x32xbf16> to vector<16x32xbf16>
    %cst_19 = arith.constant dense<0.000000e+00> : vector<16x64xf32>
    %22 = tpu.matmul %21, %2, %cst_19 {dimension_numbers = #tpu.dot_dimension_numbers<[1], [0], [0], [1], [0, 0, 1, 1], [], []>} : vector<16x32xbf16>, vector<32x64xbf16>, vector<16x64xf32> -> vector<16x64xf32>
    %23 = arith.truncf %22 : vector<16x64xf32> to vector<16x64xbf16>
    %c2_20 = arith.constant 2 : index
    %c0_21 = arith.constant 0 : index
    %c0_22 = arith.constant 0 : index
    %24 = vector.load %arg3[%c2_20, %c0_21, %c0_22] : memref<4x64x256xbf16, #tpu.memory_space<vmem>>, vector<1x64x256xbf16>
    %25 = vector.shape_cast %24 : vector<1x64x256xbf16> to vector<64x256xbf16>
    %cst_23 = arith.constant dense<0.000000e+00> : vector<16x256xf32>
    %26 = tpu.matmul %23, %25, %cst_23 {dimension_numbers = #tpu.dot_dimension_numbers<[1], [0], [0], [1], [0, 0, 1, 1], [], []>} : vector<16x64xbf16>, vector<64x256xbf16>, vector<16x256xf32> -> vector<16x256xf32>
    %27 = arith.addf %19, %26 : vector<16x256xf32>
    %c3 = arith.constant 3 : index
    %c0_24 = arith.constant 0 : index
    %c0_25 = arith.constant 0 : index
    %28 = vector.load %arg2[%c3, %c0_24, %c0_25] : memref<4x16x32xbf16, #tpu.memory_space<vmem>>, vector<1x16x32xbf16>
    %29 = vector.shape_cast %28 : vector<1x16x32xbf16> to vector<16x32xbf16>
    %cst_26 = arith.constant dense<0.000000e+00> : vector<16x64xf32>
    %30 = tpu.matmul %29, %2, %cst_26 {dimension_numbers = #tpu.dot_dimension_numbers<[1], [0], [0], [1], [0, 0, 1, 1], [], []>} : vector<16x32xbf16>, vector<32x64xbf16>, vector<16x64xf32> -> vector<16x64xf32>
    %31 = arith.truncf %30 : vector<16x64xf32> to vector<16x64xbf16>
    %c3_27 = arith.constant 3 : index
    %c0_28 = arith.constant 0 : index
    %c0_29 = arith.constant 0 : index
    %32 = vector.load %arg3[%c3_27, %c0_28, %c0_29] : memref<4x64x256xbf16, #tpu.memory_space<vmem>>, vector<1x64x256xbf16>
    %33 = vector.shape_cast %32 : vector<1x64x256xbf16> to vector<64x256xbf16>
    %cst_30 = arith.constant dense<0.000000e+00> : vector<16x256xf32>
    %34 = tpu.matmul %31, %33, %cst_30 {dimension_numbers = #tpu.dot_dimension_numbers<[1], [0], [0], [1], [0, 0, 1, 1], [], []>} : vector<16x64xbf16>, vector<64x256xbf16>, vector<16x256xf32> -> vector<16x256xf32>
    %35 = arith.addf %27, %34 : vector<16x256xf32>
    %c0_31 = arith.constant 0 : index
    %c0_32 = arith.constant 0 : index
    %36 = vector.load %arg4[%c0_31, %c0_32] : memref<256x16xf32, #tpu.memory_space<vmem>>, vector<256x16xf32>
    %c0_33 = arith.constant 0 : index
    %c0_34 = arith.constant 0 : index
    %37 = vector.load %arg5[%c0_33, %c0_34] : memref<16x256xf32, #tpu.memory_space<vmem>>, vector<16x256xf32>
    %cst_35 = arith.constant dense<0.000000e+00> : vector<256xf32>
    %38 = vector.multi_reduction <add>, %35, %cst_35 [0] : vector<16x256xf32> to vector<256xf32>
    %39 = vector.shape_cast %38 : vector<256xf32> to vector<1x256xf32>
    %cst_36 = arith.constant dense<0.000000e+00> : vector<1x16xf32>
    %40 = tpu.matmul %39, %36, %cst_36 {dimension_numbers = #tpu.dot_dimension_numbers<[1], [0], [0], [1], [0, 0, 1, 1], [], []>} : vector<1x256xf32>, vector<256x16xf32>, vector<1x16xf32> -> vector<1x16xf32>
    %41 = arith.mulf %35, %35 : vector<16x256xf32>
    %cst_37 = arith.constant dense<0.000000e+00> : vector<256xf32>
    %42 = vector.multi_reduction <add>, %41, %cst_37 [0] : vector<16x256xf32> to vector<256xf32>
    %43 = vector.shape_cast %42 : vector<256xf32> to vector<1x256xf32>
    %cst_38 = arith.constant dense<0.000000e+00> : vector<1x16xf32>
    %44 = tpu.matmul %43, %36, %cst_38 {dimension_numbers = #tpu.dot_dimension_numbers<[1], [0], [0], [1], [0, 0, 1, 1], [], []>} : vector<1x256xf32>, vector<256x16xf32>, vector<1x16xf32> -> vector<1x16xf32>
    %cst_39 = arith.constant 3.906250e-03 : f32
    %45 = vector.broadcast %cst_39 : f32 to vector<1x16xf32>
    %46 = arith.mulf %40, %45 : vector<1x16xf32>
    %cst_40 = arith.constant 3.906250e-03 : f32
    %47 = vector.broadcast %cst_40 : f32 to vector<1x16xf32>
    %48 = arith.mulf %44, %47 : vector<1x16xf32>
    %49 = arith.mulf %46, %46 : vector<1x16xf32>
    %50 = arith.subf %48, %49 : vector<1x16xf32>
    %cst_41 = arith.constant 9.99999974E-6 : f32
    %51 = vector.broadcast %cst_41 : f32 to vector<1x16xf32>
    %52 = arith.addf %50, %51 : vector<1x16xf32>
    %53 = math.rsqrt %52 : vector<1x16xf32>
    %c0_42 = arith.constant 0 : index
    %c0_43 = arith.constant 0 : index
    %54 = vector.load %arg6[%c0_42, %c0_43] : memref<3x16xf32, #tpu.memory_space<vmem>>, vector<1x16xf32>
    %c1_44 = arith.constant 1 : index
    %c0_45 = arith.constant 0 : index
    %55 = vector.load %arg6[%c1_44, %c0_45] : memref<3x16xf32, #tpu.memory_space<vmem>>, vector<1x16xf32>
    %c2_46 = arith.constant 2 : index
    %c0_47 = arith.constant 0 : index
    %56 = vector.load %arg6[%c2_46, %c0_47] : memref<3x16xf32, #tpu.memory_space<vmem>>, vector<1x16xf32>
    %57 = arith.mulf %54, %53 : vector<1x16xf32>
    %58 = arith.mulf %46, %57 : vector<1x16xf32>
    %59 = arith.subf %55, %58 : vector<1x16xf32>
    %cst_48 = arith.constant dense<0.000000e+00> : vector<1x256xf32>
    %60 = tpu.matmul %57, %37, %cst_48 {dimension_numbers = #tpu.dot_dimension_numbers<[1], [0], [0], [1], [0, 0, 1, 1], [], []>} : vector<1x16xf32>, vector<16x256xf32>, vector<1x256xf32> -> vector<1x256xf32>
    %cst_49 = arith.constant dense<0.000000e+00> : vector<1x256xf32>
    %61 = tpu.matmul %59, %37, %cst_49 {dimension_numbers = #tpu.dot_dimension_numbers<[1], [0], [0], [1], [0, 0, 1, 1], [], []>} : vector<1x16xf32>, vector<16x256xf32>, vector<1x256xf32> -> vector<1x256xf32>
    %cst_50 = arith.constant dense<0.000000e+00> : vector<1x256xf32>
    %62 = tpu.matmul %56, %37, %cst_50 {dimension_numbers = #tpu.dot_dimension_numbers<[1], [0], [0], [1], [0, 0, 1, 1], [], []>} : vector<1x16xf32>, vector<16x256xf32>, vector<1x256xf32> -> vector<1x256xf32>
    %63 = vector.broadcast %60 : vector<1x256xf32> to vector<16x256xf32>
    %64 = arith.mulf %35, %63 : vector<16x256xf32>
    %65 = vector.broadcast %61 : vector<1x256xf32> to vector<16x256xf32>
    %66 = arith.addf %64, %65 : vector<16x256xf32>
    %cst_51 = arith.constant 0.000000e+00 : f32
    %67 = vector.broadcast %cst_51 : f32 to vector<16x256xf32>
    %68 = arith.cmpf oge, %66, %67 : vector<16x256xf32>
    %69 = vector.broadcast %62 : vector<1x256xf32> to vector<16x256xf32>
    %70 = arith.mulf %69, %66 : vector<16x256xf32>
    %71 = arith.select %68, %66, %70 : vector<16x256xi1>, vector<16x256xf32>
    %72 = arith.truncf %71 : vector<16x256xf32> to vector<16x256xbf16>
    %cst_52 = arith.constant 0.000000e+00 : f32
    %73 = vector.broadcast %cst_52 : f32 to vector<8x256xf32>
    %c0_53 = arith.constant 0 : index
    %c0_54 = arith.constant 0 : index
    %c0_55 = arith.constant 0 : index
    %74 = vector.load %arg7[%c0_53, %c0_54, %c0_55] : memref<4x8x16xbf16, #tpu.memory_space<vmem>>, vector<1x8x16xbf16>
    %75 = vector.shape_cast %74 : vector<1x8x16xbf16> to vector<8x16xbf16>
    %cst_56 = arith.constant dense<0.000000e+00> : vector<8x256xf32>
    %76 = tpu.matmul %75, %72, %cst_56 {dimension_numbers = #tpu.dot_dimension_numbers<[1], [0], [0], [1], [0, 0, 1, 1], [], []>} : vector<8x16xbf16>, vector<16x256xbf16>, vector<8x256xf32> -> vector<8x256xf32>
    %77 = arith.truncf %76 : vector<8x256xf32> to vector<8x256xbf16>
    %c0_57 = arith.constant 0 : index
    %c0_58 = arith.constant 0 : index
    %c0_59 = arith.constant 0 : index
    %78 = vector.load %arg8[%c0_57, %c0_58, %c0_59] : memref<4x256x256xbf16, #tpu.memory_space<vmem>>, vector<1x256x256xbf16>
    %79 = vector.shape_cast %78 : vector<1x256x256xbf16> to vector<256x256xbf16>
    %cst_60 = arith.constant dense<0.000000e+00> : vector<8x256xf32>
    %80 = tpu.matmul %77, %79, %cst_60 {dimension_numbers = #tpu.dot_dimension_numbers<[1], [0], [0], [1], [0, 0, 1, 1], [], []>} : vector<8x256xbf16>, vector<256x256xbf16>, vector<8x256xf32> -> vector<8x256xf32>
    %81 = arith.addf %73, %80 : vector<8x256xf32>
    %c1_61 = arith.constant 1 : index
    %c0_62 = arith.constant 0 : index
    %c0_63 = arith.constant 0 : index
    %82 = vector.load %arg7[%c1_61, %c0_62, %c0_63] : memref<4x8x16xbf16, #tpu.memory_space<vmem>>, vector<1x8x16xbf16>
    %83 = vector.shape_cast %82 : vector<1x8x16xbf16> to vector<8x16xbf16>
    %cst_64 = arith.constant dense<0.000000e+00> : vector<8x256xf32>
    %84 = tpu.matmul %83, %72, %cst_64 {dimension_numbers = #tpu.dot_dimension_numbers<[1], [0], [0], [1], [0, 0, 1, 1], [], []>} : vector<8x16xbf16>, vector<16x256xbf16>, vector<8x256xf32> -> vector<8x256xf32>
    %85 = arith.truncf %84 : vector<8x256xf32> to vector<8x256xbf16>
    %c1_65 = arith.constant 1 : index
    %c0_66 = arith.constant 0 : index
    %c0_67 = arith.constant 0 : index
    %86 = vector.load %arg8[%c1_65, %c0_66, %c0_67] : memref<4x256x256xbf16, #tpu.memory_space<vmem>>, vector<1x256x256xbf16>
    %87 = vector.shape_cast %86 : vector<1x256x256xbf16> to vector<256x256xbf16>
    %cst_68 = arith.constant dense<0.000000e+00> : vector<8x256xf32>
    %88 = tpu.matmul %85, %87, %cst_68 {dimension_numbers = #tpu.dot_dimension_numbers<[1], [0], [0], [1], [0, 0, 1, 1], [], []>} : vector<8x256xbf16>, vector<256x256xbf16>, vector<8x256xf32> -> vector<8x256xf32>
    %89 = arith.addf %81, %88 : vector<8x256xf32>
    %c2_69 = arith.constant 2 : index
    %c0_70 = arith.constant 0 : index
    %c0_71 = arith.constant 0 : index
    %90 = vector.load %arg7[%c2_69, %c0_70, %c0_71] : memref<4x8x16xbf16, #tpu.memory_space<vmem>>, vector<1x8x16xbf16>
    %91 = vector.shape_cast %90 : vector<1x8x16xbf16> to vector<8x16xbf16>
    %cst_72 = arith.constant dense<0.000000e+00> : vector<8x256xf32>
    %92 = tpu.matmul %91, %72, %cst_72 {dimension_numbers = #tpu.dot_dimension_numbers<[1], [0], [0], [1], [0, 0, 1, 1], [], []>} : vector<8x16xbf16>, vector<16x256xbf16>, vector<8x256xf32> -> vector<8x256xf32>
    %93 = arith.truncf %92 : vector<8x256xf32> to vector<8x256xbf16>
    %c2_73 = arith.constant 2 : index
    %c0_74 = arith.constant 0 : index
    %c0_75 = arith.constant 0 : index
    %94 = vector.load %arg8[%c2_73, %c0_74, %c0_75] : memref<4x256x256xbf16, #tpu.memory_space<vmem>>, vector<1x256x256xbf16>
    %95 = vector.shape_cast %94 : vector<1x256x256xbf16> to vector<256x256xbf16>
    %cst_76 = arith.constant dense<0.000000e+00> : vector<8x256xf32>
    %96 = tpu.matmul %93, %95, %cst_76 {dimension_numbers = #tpu.dot_dimension_numbers<[1], [0], [0], [1], [0, 0, 1, 1], [], []>} : vector<8x256xbf16>, vector<256x256xbf16>, vector<8x256xf32> -> vector<8x256xf32>
    %97 = arith.addf %89, %96 : vector<8x256xf32>
    %c3_77 = arith.constant 3 : index
    %c0_78 = arith.constant 0 : index
    %c0_79 = arith.constant 0 : index
    %98 = vector.load %arg7[%c3_77, %c0_78, %c0_79] : memref<4x8x16xbf16, #tpu.memory_space<vmem>>, vector<1x8x16xbf16>
    %99 = vector.shape_cast %98 : vector<1x8x16xbf16> to vector<8x16xbf16>
    %cst_80 = arith.constant dense<0.000000e+00> : vector<8x256xf32>
    %100 = tpu.matmul %99, %72, %cst_80 {dimension_numbers = #tpu.dot_dimension_numbers<[1], [0], [0], [1], [0, 0, 1, 1], [], []>} : vector<8x16xbf16>, vector<16x256xbf16>, vector<8x256xf32> -> vector<8x256xf32>
    %101 = arith.truncf %100 : vector<8x256xf32> to vector<8x256xbf16>
    %c3_81 = arith.constant 3 : index
    %c0_82 = arith.constant 0 : index
    %c0_83 = arith.constant 0 : index
    %102 = vector.load %arg8[%c3_81, %c0_82, %c0_83] : memref<4x256x256xbf16, #tpu.memory_space<vmem>>, vector<1x256x256xbf16>
    %103 = vector.shape_cast %102 : vector<1x256x256xbf16> to vector<256x256xbf16>
    %cst_84 = arith.constant dense<0.000000e+00> : vector<8x256xf32>
    %104 = tpu.matmul %101, %103, %cst_84 {dimension_numbers = #tpu.dot_dimension_numbers<[1], [0], [0], [1], [0, 0, 1, 1], [], []>} : vector<8x256xbf16>, vector<256x256xbf16>, vector<8x256xf32> -> vector<8x256xf32>
    %105 = arith.addf %97, %104 : vector<8x256xf32>
    %c0_85 = arith.constant 0 : index
    %c0_86 = arith.constant 0 : index
    %106 = vector.load %arg9[%c0_85, %c0_86] : memref<256x32xf32, #tpu.memory_space<vmem>>, vector<256x32xf32>
    %c0_87 = arith.constant 0 : index
    %c0_88 = arith.constant 0 : index
    %107 = vector.load %arg10[%c0_87, %c0_88] : memref<32x256xf32, #tpu.memory_space<vmem>>, vector<32x256xf32>
    %cst_89 = arith.constant dense<0.000000e+00> : vector<256xf32>
    %108 = vector.multi_reduction <add>, %105, %cst_89 [0] : vector<8x256xf32> to vector<256xf32>
    %109 = vector.shape_cast %108 : vector<256xf32> to vector<1x256xf32>
    %cst_90 = arith.constant dense<0.000000e+00> : vector<1x32xf32>
    %110 = tpu.matmul %109, %106, %cst_90 {dimension_numbers = #tpu.dot_dimension_numbers<[1], [0], [0], [1], [0, 0, 1, 1], [], []>} : vector<1x256xf32>, vector<256x32xf32>, vector<1x32xf32> -> vector<1x32xf32>
    %111 = arith.mulf %105, %105 : vector<8x256xf32>
    %cst_91 = arith.constant dense<0.000000e+00> : vector<256xf32>
    %112 = vector.multi_reduction <add>, %111, %cst_91 [0] : vector<8x256xf32> to vector<256xf32>
    %113 = vector.shape_cast %112 : vector<256xf32> to vector<1x256xf32>
    %cst_92 = arith.constant dense<0.000000e+00> : vector<1x32xf32>
    %114 = tpu.matmul %113, %106, %cst_92 {dimension_numbers = #tpu.dot_dimension_numbers<[1], [0], [0], [1], [0, 0, 1, 1], [], []>} : vector<1x256xf32>, vector<256x32xf32>, vector<1x32xf32> -> vector<1x32xf32>
    %cst_93 = arith.constant 1.562500e-02 : f32
    %115 = vector.broadcast %cst_93 : f32 to vector<1x32xf32>
    %116 = arith.mulf %110, %115 : vector<1x32xf32>
    %cst_94 = arith.constant 1.562500e-02 : f32
    %117 = vector.broadcast %cst_94 : f32 to vector<1x32xf32>
    %118 = arith.mulf %114, %117 : vector<1x32xf32>
    %119 = arith.mulf %116, %116 : vector<1x32xf32>
    %120 = arith.subf %118, %119 : vector<1x32xf32>
    %cst_95 = arith.constant 9.99999974E-6 : f32
    %121 = vector.broadcast %cst_95 : f32 to vector<1x32xf32>
    %122 = arith.addf %120, %121 : vector<1x32xf32>
    %123 = math.rsqrt %122 : vector<1x32xf32>
    %c0_96 = arith.constant 0 : index
    %c0_97 = arith.constant 0 : index
    %124 = vector.load %arg11[%c0_96, %c0_97] : memref<3x32xf32, #tpu.memory_space<vmem>>, vector<1x32xf32>
    %c1_98 = arith.constant 1 : index
    %c0_99 = arith.constant 0 : index
    %125 = vector.load %arg11[%c1_98, %c0_99] : memref<3x32xf32, #tpu.memory_space<vmem>>, vector<1x32xf32>
    %c2_100 = arith.constant 2 : index
    %c0_101 = arith.constant 0 : index
    %126 = vector.load %arg11[%c2_100, %c0_101] : memref<3x32xf32, #tpu.memory_space<vmem>>, vector<1x32xf32>
    %127 = arith.mulf %124, %123 : vector<1x32xf32>
    %128 = arith.mulf %116, %127 : vector<1x32xf32>
    %129 = arith.subf %125, %128 : vector<1x32xf32>
    %cst_102 = arith.constant dense<0.000000e+00> : vector<1x256xf32>
    %130 = tpu.matmul %127, %107, %cst_102 {dimension_numbers = #tpu.dot_dimension_numbers<[1], [0], [0], [1], [0, 0, 1, 1], [], []>} : vector<1x32xf32>, vector<32x256xf32>, vector<1x256xf32> -> vector<1x256xf32>
    %cst_103 = arith.constant dense<0.000000e+00> : vector<1x256xf32>
    %131 = tpu.matmul %129, %107, %cst_103 {dimension_numbers = #tpu.dot_dimension_numbers<[1], [0], [0], [1], [0, 0, 1, 1], [], []>} : vector<1x32xf32>, vector<32x256xf32>, vector<1x256xf32> -> vector<1x256xf32>
    %cst_104 = arith.constant dense<0.000000e+00> : vector<1x256xf32>
    %132 = tpu.matmul %126, %107, %cst_104 {dimension_numbers = #tpu.dot_dimension_numbers<[1], [0], [0], [1], [0, 0, 1, 1], [], []>} : vector<1x32xf32>, vector<32x256xf32>, vector<1x256xf32> -> vector<1x256xf32>
    %133 = vector.broadcast %130 : vector<1x256xf32> to vector<8x256xf32>
    %134 = arith.mulf %105, %133 : vector<8x256xf32>
    %135 = vector.broadcast %131 : vector<1x256xf32> to vector<8x256xf32>
    %136 = arith.addf %134, %135 : vector<8x256xf32>
    %cst_105 = arith.constant 0.000000e+00 : f32
    %137 = vector.broadcast %cst_105 : f32 to vector<8x256xf32>
    %138 = arith.cmpf oge, %136, %137 : vector<8x256xf32>
    %139 = vector.broadcast %132 : vector<1x256xf32> to vector<8x256xf32>
    %140 = arith.mulf %139, %136 : vector<8x256xf32>
    %141 = arith.select %138, %136, %140 : vector<8x256xi1>, vector<8x256xf32>
    %142 = arith.truncf %141 : vector<8x256xf32> to vector<8x256xbf16>
    %cst_106 = arith.constant 0.000000e+00 : f32
    %143 = vector.broadcast %cst_106 : f32 to vector<4x256xf32>
    %c0_107 = arith.constant 0 : index
    %c0_108 = arith.constant 0 : index
    %c0_109 = arith.constant 0 : index
    %144 = vector.load %arg12[%c0_107, %c0_108, %c0_109] : memref<4x4x8xbf16, #tpu.memory_space<vmem>>, vector<1x4x8xbf16>
    %145 = vector.shape_cast %144 : vector<1x4x8xbf16> to vector<4x8xbf16>
    %cst_110 = arith.constant dense<0.000000e+00> : vector<4x256xf32>
    %146 = tpu.matmul %145, %142, %cst_110 {dimension_numbers = #tpu.dot_dimension_numbers<[1], [0], [0], [1], [0, 0, 1, 1], [], []>} : vector<4x8xbf16>, vector<8x256xbf16>, vector<4x256xf32> -> vector<4x256xf32>
    %147 = arith.truncf %146 : vector<4x256xf32> to vector<4x256xbf16>
    %c0_111 = arith.constant 0 : index
    %c0_112 = arith.constant 0 : index
    %c0_113 = arith.constant 0 : index
    %148 = vector.load %arg13[%c0_111, %c0_112, %c0_113] : memref<4x256x256xbf16, #tpu.memory_space<vmem>>, vector<1x256x256xbf16>
    %149 = vector.shape_cast %148 : vector<1x256x256xbf16> to vector<256x256xbf16>
    %cst_114 = arith.constant dense<0.000000e+00> : vector<4x256xf32>
    %150 = tpu.matmul %147, %149, %cst_114 {dimension_numbers = #tpu.dot_dimension_numbers<[1], [0], [0], [1], [0, 0, 1, 1], [], []>} : vector<4x256xbf16>, vector<256x256xbf16>, vector<4x256xf32> -> vector<4x256xf32>
    %151 = arith.addf %143, %150 : vector<4x256xf32>
    %c1_115 = arith.constant 1 : index
    %c0_116 = arith.constant 0 : index
    %c0_117 = arith.constant 0 : index
    %152 = vector.load %arg12[%c1_115, %c0_116, %c0_117] : memref<4x4x8xbf16, #tpu.memory_space<vmem>>, vector<1x4x8xbf16>
    %153 = vector.shape_cast %152 : vector<1x4x8xbf16> to vector<4x8xbf16>
    %cst_118 = arith.constant dense<0.000000e+00> : vector<4x256xf32>
    %154 = tpu.matmul %153, %142, %cst_118 {dimension_numbers = #tpu.dot_dimension_numbers<[1], [0], [0], [1], [0, 0, 1, 1], [], []>} : vector<4x8xbf16>, vector<8x256xbf16>, vector<4x256xf32> -> vector<4x256xf32>
    %155 = arith.truncf %154 : vector<4x256xf32> to vector<4x256xbf16>
    %c1_119 = arith.constant 1 : index
    %c0_120 = arith.constant 0 : index
    %c0_121 = arith.constant 0 : index
    %156 = vector.load %arg13[%c1_119, %c0_120, %c0_121] : memref<4x256x256xbf16, #tpu.memory_space<vmem>>, vector<1x256x256xbf16>
    %157 = vector.shape_cast %156 : vector<1x256x256xbf16> to vector<256x256xbf16>
    %cst_122 = arith.constant dense<0.000000e+00> : vector<4x256xf32>
    %158 = tpu.matmul %155, %157, %cst_122 {dimension_numbers = #tpu.dot_dimension_numbers<[1], [0], [0], [1], [0, 0, 1, 1], [], []>} : vector<4x256xbf16>, vector<256x256xbf16>, vector<4x256xf32> -> vector<4x256xf32>
    %159 = arith.addf %151, %158 : vector<4x256xf32>
    %c2_123 = arith.constant 2 : index
    %c0_124 = arith.constant 0 : index
    %c0_125 = arith.constant 0 : index
    %160 = vector.load %arg12[%c2_123, %c0_124, %c0_125] : memref<4x4x8xbf16, #tpu.memory_space<vmem>>, vector<1x4x8xbf16>
    %161 = vector.shape_cast %160 : vector<1x4x8xbf16> to vector<4x8xbf16>
    %cst_126 = arith.constant dense<0.000000e+00> : vector<4x256xf32>
    %162 = tpu.matmul %161, %142, %cst_126 {dimension_numbers = #tpu.dot_dimension_numbers<[1], [0], [0], [1], [0, 0, 1, 1], [], []>} : vector<4x8xbf16>, vector<8x256xbf16>, vector<4x256xf32> -> vector<4x256xf32>
    %163 = arith.truncf %162 : vector<4x256xf32> to vector<4x256xbf16>
    %c2_127 = arith.constant 2 : index
    %c0_128 = arith.constant 0 : index
    %c0_129 = arith.constant 0 : index
    %164 = vector.load %arg13[%c2_127, %c0_128, %c0_129] : memref<4x256x256xbf16, #tpu.memory_space<vmem>>, vector<1x256x256xbf16>
    %165 = vector.shape_cast %164 : vector<1x256x256xbf16> to vector<256x256xbf16>
    %cst_130 = arith.constant dense<0.000000e+00> : vector<4x256xf32>
    %166 = tpu.matmul %163, %165, %cst_130 {dimension_numbers = #tpu.dot_dimension_numbers<[1], [0], [0], [1], [0, 0, 1, 1], [], []>} : vector<4x256xbf16>, vector<256x256xbf16>, vector<4x256xf32> -> vector<4x256xf32>
    %167 = arith.addf %159, %166 : vector<4x256xf32>
    %c3_131 = arith.constant 3 : index
    %c0_132 = arith.constant 0 : index
    %c0_133 = arith.constant 0 : index
    %168 = vector.load %arg12[%c3_131, %c0_132, %c0_133] : memref<4x4x8xbf16, #tpu.memory_space<vmem>>, vector<1x4x8xbf16>
    %169 = vector.shape_cast %168 : vector<1x4x8xbf16> to vector<4x8xbf16>
    %cst_134 = arith.constant dense<0.000000e+00> : vector<4x256xf32>
    %170 = tpu.matmul %169, %142, %cst_134 {dimension_numbers = #tpu.dot_dimension_numbers<[1], [0], [0], [1], [0, 0, 1, 1], [], []>} : vector<4x8xbf16>, vector<8x256xbf16>, vector<4x256xf32> -> vector<4x256xf32>
    %171 = arith.truncf %170 : vector<4x256xf32> to vector<4x256xbf16>
    %c3_135 = arith.constant 3 : index
    %c0_136 = arith.constant 0 : index
    %c0_137 = arith.constant 0 : index
    %172 = vector.load %arg13[%c3_135, %c0_136, %c0_137] : memref<4x256x256xbf16, #tpu.memory_space<vmem>>, vector<1x256x256xbf16>
    %173 = vector.shape_cast %172 : vector<1x256x256xbf16> to vector<256x256xbf16>
    %cst_138 = arith.constant dense<0.000000e+00> : vector<4x256xf32>
    %174 = tpu.matmul %171, %173, %cst_138 {dimension_numbers = #tpu.dot_dimension_numbers<[1], [0], [0], [1], [0, 0, 1, 1], [], []>} : vector<4x256xbf16>, vector<256x256xbf16>, vector<4x256xf32> -> vector<4x256xf32>
    %175 = arith.addf %167, %174 : vector<4x256xf32>
    %c0_139 = arith.constant 0 : index
    %c0_140 = arith.constant 0 : index
    %176 = vector.load %arg14[%c0_139, %c0_140] : memref<256x64xf32, #tpu.memory_space<vmem>>, vector<256x64xf32>
    %c0_141 = arith.constant 0 : index
    %c0_142 = arith.constant 0 : index
    %177 = vector.load %arg15[%c0_141, %c0_142] : memref<64x256xf32, #tpu.memory_space<vmem>>, vector<64x256xf32>
    %cst_143 = arith.constant dense<0.000000e+00> : vector<256xf32>
    %178 = vector.multi_reduction <add>, %175, %cst_143 [0] : vector<4x256xf32> to vector<256xf32>
    %179 = vector.shape_cast %178 : vector<256xf32> to vector<1x256xf32>
    %cst_144 = arith.constant dense<0.000000e+00> : vector<1x64xf32>
    %180 = tpu.matmul %179, %176, %cst_144 {dimension_numbers = #tpu.dot_dimension_numbers<[1], [0], [0], [1], [0, 0, 1, 1], [], []>} : vector<1x256xf32>, vector<256x64xf32>, vector<1x64xf32> -> vector<1x64xf32>
    %181 = arith.mulf %175, %175 : vector<4x256xf32>
    %cst_145 = arith.constant dense<0.000000e+00> : vector<256xf32>
    %182 = vector.multi_reduction <add>, %181, %cst_145 [0] : vector<4x256xf32> to vector<256xf32>
    %183 = vector.shape_cast %182 : vector<256xf32> to vector<1x256xf32>
    %cst_146 = arith.constant dense<0.000000e+00> : vector<1x64xf32>
    %184 = tpu.matmul %183, %176, %cst_146 {dimension_numbers = #tpu.dot_dimension_numbers<[1], [0], [0], [1], [0, 0, 1, 1], [], []>} : vector<1x256xf32>, vector<256x64xf32>, vector<1x64xf32> -> vector<1x64xf32>
    %cst_147 = arith.constant 6.250000e-02 : f32
    %185 = vector.broadcast %cst_147 : f32 to vector<1x64xf32>
    %186 = arith.mulf %180, %185 : vector<1x64xf32>
    %cst_148 = arith.constant 6.250000e-02 : f32
    %187 = vector.broadcast %cst_148 : f32 to vector<1x64xf32>
    %188 = arith.mulf %184, %187 : vector<1x64xf32>
    %189 = arith.mulf %186, %186 : vector<1x64xf32>
    %190 = arith.subf %188, %189 : vector<1x64xf32>
    %cst_149 = arith.constant 9.99999974E-6 : f32
    %191 = vector.broadcast %cst_149 : f32 to vector<1x64xf32>
    %192 = arith.addf %190, %191 : vector<1x64xf32>
    %193 = math.rsqrt %192 : vector<1x64xf32>
    %c0_150 = arith.constant 0 : index
    %c0_151 = arith.constant 0 : index
    %194 = vector.load %arg16[%c0_150, %c0_151] : memref<3x64xf32, #tpu.memory_space<vmem>>, vector<1x64xf32>
    %c1_152 = arith.constant 1 : index
    %c0_153 = arith.constant 0 : index
    %195 = vector.load %arg16[%c1_152, %c0_153] : memref<3x64xf32, #tpu.memory_space<vmem>>, vector<1x64xf32>
    %c2_154 = arith.constant 2 : index
    %c0_155 = arith.constant 0 : index
    %196 = vector.load %arg16[%c2_154, %c0_155] : memref<3x64xf32, #tpu.memory_space<vmem>>, vector<1x64xf32>
    %197 = arith.mulf %194, %193 : vector<1x64xf32>
    %198 = arith.mulf %186, %197 : vector<1x64xf32>
    %199 = arith.subf %195, %198 : vector<1x64xf32>
    %cst_156 = arith.constant dense<0.000000e+00> : vector<1x256xf32>
    %200 = tpu.matmul %197, %177, %cst_156 {dimension_numbers = #tpu.dot_dimension_numbers<[1], [0], [0], [1], [0, 0, 1, 1], [], []>} : vector<1x64xf32>, vector<64x256xf32>, vector<1x256xf32> -> vector<1x256xf32>
    %cst_157 = arith.constant dense<0.000000e+00> : vector<1x256xf32>
    %201 = tpu.matmul %199, %177, %cst_157 {dimension_numbers = #tpu.dot_dimension_numbers<[1], [0], [0], [1], [0, 0, 1, 1], [], []>} : vector<1x64xf32>, vector<64x256xf32>, vector<1x256xf32> -> vector<1x256xf32>
    %cst_158 = arith.constant dense<0.000000e+00> : vector<1x256xf32>
    %202 = tpu.matmul %196, %177, %cst_158 {dimension_numbers = #tpu.dot_dimension_numbers<[1], [0], [0], [1], [0, 0, 1, 1], [], []>} : vector<1x64xf32>, vector<64x256xf32>, vector<1x256xf32> -> vector<1x256xf32>
    %203 = vector.broadcast %200 : vector<1x256xf32> to vector<4x256xf32>
    %204 = arith.mulf %175, %203 : vector<4x256xf32>
    %205 = vector.broadcast %201 : vector<1x256xf32> to vector<4x256xf32>
    %206 = arith.addf %204, %205 : vector<4x256xf32>
    %cst_159 = arith.constant 0.000000e+00 : f32
    %207 = vector.broadcast %cst_159 : f32 to vector<4x256xf32>
    %208 = arith.cmpf oge, %206, %207 : vector<4x256xf32>
    %209 = vector.broadcast %202 : vector<1x256xf32> to vector<4x256xf32>
    %210 = arith.mulf %209, %206 : vector<4x256xf32>
    %211 = arith.select %208, %206, %210 : vector<4x256xi1>, vector<4x256xf32>
    %212 = arith.truncf %211 : vector<4x256xf32> to vector<4x256xbf16>
    %cst_160 = arith.constant 0.000000e+00 : f32
    %213 = vector.broadcast %cst_160 : f32 to vector<2x256xf32>
    %c0_161 = arith.constant 0 : index
    %c0_162 = arith.constant 0 : index
    %c0_163 = arith.constant 0 : index
    %214 = vector.load %arg17[%c0_161, %c0_162, %c0_163] : memref<4x2x4xbf16, #tpu.memory_space<vmem>>, vector<1x2x4xbf16>
    %215 = vector.shape_cast %214 : vector<1x2x4xbf16> to vector<2x4xbf16>
    %cst_164 = arith.constant dense<0.000000e+00> : vector<2x256xf32>
    %216 = tpu.matmul %215, %212, %cst_164 {dimension_numbers = #tpu.dot_dimension_numbers<[1], [0], [0], [1], [0, 0, 1, 1], [], []>} : vector<2x4xbf16>, vector<4x256xbf16>, vector<2x256xf32> -> vector<2x256xf32>
    %217 = arith.truncf %216 : vector<2x256xf32> to vector<2x256xbf16>
    %c0_165 = arith.constant 0 : index
    %c0_166 = arith.constant 0 : index
    %c0_167 = arith.constant 0 : index
    %218 = vector.load %arg18[%c0_165, %c0_166, %c0_167] : memref<4x256x256xbf16, #tpu.memory_space<vmem>>, vector<1x256x256xbf16>
    %219 = vector.shape_cast %218 : vector<1x256x256xbf16> to vector<256x256xbf16>
    %cst_168 = arith.constant dense<0.000000e+00> : vector<2x256xf32>
    %220 = tpu.matmul %217, %219, %cst_168 {dimension_numbers = #tpu.dot_dimension_numbers<[1], [0], [0], [1], [0, 0, 1, 1], [], []>} : vector<2x256xbf16>, vector<256x256xbf16>, vector<2x256xf32> -> vector<2x256xf32>
    %221 = arith.addf %213, %220 : vector<2x256xf32>
    %c1_169 = arith.constant 1 : index
    %c0_170 = arith.constant 0 : index
    %c0_171 = arith.constant 0 : index
    %222 = vector.load %arg17[%c1_169, %c0_170, %c0_171] : memref<4x2x4xbf16, #tpu.memory_space<vmem>>, vector<1x2x4xbf16>
    %223 = vector.shape_cast %222 : vector<1x2x4xbf16> to vector<2x4xbf16>
    %cst_172 = arith.constant dense<0.000000e+00> : vector<2x256xf32>
    %224 = tpu.matmul %223, %212, %cst_172 {dimension_numbers = #tpu.dot_dimension_numbers<[1], [0], [0], [1], [0, 0, 1, 1], [], []>} : vector<2x4xbf16>, vector<4x256xbf16>, vector<2x256xf32> -> vector<2x256xf32>
    %225 = arith.truncf %224 : vector<2x256xf32> to vector<2x256xbf16>
    %c1_173 = arith.constant 1 : index
    %c0_174 = arith.constant 0 : index
    %c0_175 = arith.constant 0 : index
    %226 = vector.load %arg18[%c1_173, %c0_174, %c0_175] : memref<4x256x256xbf16, #tpu.memory_space<vmem>>, vector<1x256x256xbf16>
    %227 = vector.shape_cast %226 : vector<1x256x256xbf16> to vector<256x256xbf16>
    %cst_176 = arith.constant dense<0.000000e+00> : vector<2x256xf32>
    %228 = tpu.matmul %225, %227, %cst_176 {dimension_numbers = #tpu.dot_dimension_numbers<[1], [0], [0], [1], [0, 0, 1, 1], [], []>} : vector<2x256xbf16>, vector<256x256xbf16>, vector<2x256xf32> -> vector<2x256xf32>
    %229 = arith.addf %221, %228 : vector<2x256xf32>
    %c2_177 = arith.constant 2 : index
    %c0_178 = arith.constant 0 : index
    %c0_179 = arith.constant 0 : index
    %230 = vector.load %arg17[%c2_177, %c0_178, %c0_179] : memref<4x2x4xbf16, #tpu.memory_space<vmem>>, vector<1x2x4xbf16>
    %231 = vector.shape_cast %230 : vector<1x2x4xbf16> to vector<2x4xbf16>
    %cst_180 = arith.constant dense<0.000000e+00> : vector<2x256xf32>
    %232 = tpu.matmul %231, %212, %cst_180 {dimension_numbers = #tpu.dot_dimension_numbers<[1], [0], [0], [1], [0, 0, 1, 1], [], []>} : vector<2x4xbf16>, vector<4x256xbf16>, vector<2x256xf32> -> vector<2x256xf32>
    %233 = arith.truncf %232 : vector<2x256xf32> to vector<2x256xbf16>
    %c2_181 = arith.constant 2 : index
    %c0_182 = arith.constant 0 : index
    %c0_183 = arith.constant 0 : index
    %234 = vector.load %arg18[%c2_181, %c0_182, %c0_183] : memref<4x256x256xbf16, #tpu.memory_space<vmem>>, vector<1x256x256xbf16>
    %235 = vector.shape_cast %234 : vector<1x256x256xbf16> to vector<256x256xbf16>
    %cst_184 = arith.constant dense<0.000000e+00> : vector<2x256xf32>
    %236 = tpu.matmul %233, %235, %cst_184 {dimension_numbers = #tpu.dot_dimension_numbers<[1], [0], [0], [1], [0, 0, 1, 1], [], []>} : vector<2x256xbf16>, vector<256x256xbf16>, vector<2x256xf32> -> vector<2x256xf32>
    %237 = arith.addf %229, %236 : vector<2x256xf32>
    %c3_185 = arith.constant 3 : index
    %c0_186 = arith.constant 0 : index
    %c0_187 = arith.constant 0 : index
    %238 = vector.load %arg17[%c3_185, %c0_186, %c0_187] : memref<4x2x4xbf16, #tpu.memory_space<vmem>>, vector<1x2x4xbf16>
    %239 = vector.shape_cast %238 : vector<1x2x4xbf16> to vector<2x4xbf16>
    %cst_188 = arith.constant dense<0.000000e+00> : vector<2x256xf32>
    %240 = tpu.matmul %239, %212, %cst_188 {dimension_numbers = #tpu.dot_dimension_numbers<[1], [0], [0], [1], [0, 0, 1, 1], [], []>} : vector<2x4xbf16>, vector<4x256xbf16>, vector<2x256xf32> -> vector<2x256xf32>
    %241 = arith.truncf %240 : vector<2x256xf32> to vector<2x256xbf16>
    %c3_189 = arith.constant 3 : index
    %c0_190 = arith.constant 0 : index
    %c0_191 = arith.constant 0 : index
    %242 = vector.load %arg18[%c3_189, %c0_190, %c0_191] : memref<4x256x256xbf16, #tpu.memory_space<vmem>>, vector<1x256x256xbf16>
    %243 = vector.shape_cast %242 : vector<1x256x256xbf16> to vector<256x256xbf16>
    %cst_192 = arith.constant dense<0.000000e+00> : vector<2x256xf32>
    %244 = tpu.matmul %241, %243, %cst_192 {dimension_numbers = #tpu.dot_dimension_numbers<[1], [0], [0], [1], [0, 0, 1, 1], [], []>} : vector<2x256xbf16>, vector<256x256xbf16>, vector<2x256xf32> -> vector<2x256xf32>
    %245 = arith.addf %237, %244 : vector<2x256xf32>
    %c0_193 = arith.constant 0 : index
    %c0_194 = arith.constant 0 : index
    %246 = vector.load %arg19[%c0_193, %c0_194] : memref<256x128xf32, #tpu.memory_space<vmem>>, vector<256x128xf32>
    %c0_195 = arith.constant 0 : index
    %c0_196 = arith.constant 0 : index
    %247 = vector.load %arg20[%c0_195, %c0_196] : memref<128x256xf32, #tpu.memory_space<vmem>>, vector<128x256xf32>
    %cst_197 = arith.constant dense<0.000000e+00> : vector<256xf32>
    %248 = vector.multi_reduction <add>, %245, %cst_197 [0] : vector<2x256xf32> to vector<256xf32>
    %249 = vector.shape_cast %248 : vector<256xf32> to vector<1x256xf32>
    %cst_198 = arith.constant dense<0.000000e+00> : vector<1x128xf32>
    %250 = tpu.matmul %249, %246, %cst_198 {dimension_numbers = #tpu.dot_dimension_numbers<[1], [0], [0], [1], [0, 0, 1, 1], [], []>} : vector<1x256xf32>, vector<256x128xf32>, vector<1x128xf32> -> vector<1x128xf32>
    %251 = arith.mulf %245, %245 : vector<2x256xf32>
    %cst_199 = arith.constant dense<0.000000e+00> : vector<256xf32>
    %252 = vector.multi_reduction <add>, %251, %cst_199 [0] : vector<2x256xf32> to vector<256xf32>
    %253 = vector.shape_cast %252 : vector<256xf32> to vector<1x256xf32>
    %cst_200 = arith.constant dense<0.000000e+00> : vector<1x128xf32>
    %254 = tpu.matmul %253, %246, %cst_200 {dimension_numbers = #tpu.dot_dimension_numbers<[1], [0], [0], [1], [0, 0, 1, 1], [], []>} : vector<1x256xf32>, vector<256x128xf32>, vector<1x128xf32> -> vector<1x128xf32>
    %cst_201 = arith.constant 2.500000e-01 : f32
    %255 = vector.broadcast %cst_201 : f32 to vector<1x128xf32>
    %256 = arith.mulf %250, %255 : vector<1x128xf32>
    %cst_202 = arith.constant 2.500000e-01 : f32
    %257 = vector.broadcast %cst_202 : f32 to vector<1x128xf32>
    %258 = arith.mulf %254, %257 : vector<1x128xf32>
    %259 = arith.mulf %256, %256 : vector<1x128xf32>
    %260 = arith.subf %258, %259 : vector<1x128xf32>
    %cst_203 = arith.constant 9.99999974E-6 : f32
    %261 = vector.broadcast %cst_203 : f32 to vector<1x128xf32>
    %262 = arith.addf %260, %261 : vector<1x128xf32>
    %263 = math.rsqrt %262 : vector<1x128xf32>
    %c0_204 = arith.constant 0 : index
    %c0_205 = arith.constant 0 : index
    %264 = vector.load %arg21[%c0_204, %c0_205] : memref<3x128xf32, #tpu.memory_space<vmem>>, vector<1x128xf32>
    %c1_206 = arith.constant 1 : index
    %c0_207 = arith.constant 0 : index
    %265 = vector.load %arg21[%c1_206, %c0_207] : memref<3x128xf32, #tpu.memory_space<vmem>>, vector<1x128xf32>
    %c2_208 = arith.constant 2 : index
    %c0_209 = arith.constant 0 : index
    %266 = vector.load %arg21[%c2_208, %c0_209] : memref<3x128xf32, #tpu.memory_space<vmem>>, vector<1x128xf32>
    %267 = arith.mulf %264, %263 : vector<1x128xf32>
    %268 = arith.mulf %256, %267 : vector<1x128xf32>
    %269 = arith.subf %265, %268 : vector<1x128xf32>
    %cst_210 = arith.constant dense<0.000000e+00> : vector<1x256xf32>
    %270 = tpu.matmul %267, %247, %cst_210 {dimension_numbers = #tpu.dot_dimension_numbers<[1], [0], [0], [1], [0, 0, 1, 1], [], []>} : vector<1x128xf32>, vector<128x256xf32>, vector<1x256xf32> -> vector<1x256xf32>
    %cst_211 = arith.constant dense<0.000000e+00> : vector<1x256xf32>
    %271 = tpu.matmul %269, %247, %cst_211 {dimension_numbers = #tpu.dot_dimension_numbers<[1], [0], [0], [1], [0, 0, 1, 1], [], []>} : vector<1x128xf32>, vector<128x256xf32>, vector<1x256xf32> -> vector<1x256xf32>
    %cst_212 = arith.constant dense<0.000000e+00> : vector<1x256xf32>
    %272 = tpu.matmul %266, %247, %cst_212 {dimension_numbers = #tpu.dot_dimension_numbers<[1], [0], [0], [1], [0, 0, 1, 1], [], []>} : vector<1x128xf32>, vector<128x256xf32>, vector<1x256xf32> -> vector<1x256xf32>
    %273 = vector.broadcast %270 : vector<1x256xf32> to vector<2x256xf32>
    %274 = arith.mulf %245, %273 : vector<2x256xf32>
    %275 = vector.broadcast %271 : vector<1x256xf32> to vector<2x256xf32>
    %276 = arith.addf %274, %275 : vector<2x256xf32>
    %cst_213 = arith.constant 0.000000e+00 : f32
    %277 = vector.broadcast %cst_213 : f32 to vector<2x256xf32>
    %278 = arith.cmpf oge, %276, %277 : vector<2x256xf32>
    %279 = vector.broadcast %272 : vector<1x256xf32> to vector<2x256xf32>
    %280 = arith.mulf %279, %276 : vector<2x256xf32>
    %281 = arith.select %278, %276, %280 : vector<2x256xi1>, vector<2x256xf32>
    %cst_214 = arith.constant dense<0xFF800000> : vector<256xf32>
    %282 = vector.multi_reduction <maximumf>, %281, %cst_214 [0] : vector<2x256xf32> to vector<256xf32>
    %283 = vector.shape_cast %282 : vector<256xf32> to vector<1x256xf32>
    %284 = vector.extract_strided_slice %283 {offsets = [0, 0], sizes = [1, 128], strides = [1, 1]} : vector<1x256xf32> to vector<1x128xf32>
    %285 = vector.extract_strided_slice %283 {offsets = [0, 128], sizes = [1, 128], strides = [1, 1]} : vector<1x256xf32> to vector<1x128xf32>
    %286 = arith.maximumf %284, %285 : vector<1x128xf32>
    %c0_215 = arith.constant 0 : index
    %c0_216 = arith.constant 0 : index
    %287 = vector.load %arg22[%c0_215, %c0_216] : memref<128x64xf32, #tpu.memory_space<vmem>>, vector<128x64xf32>
    %cst_217 = arith.constant dense<0.000000e+00> : vector<1x64xf32>
    %288 = tpu.matmul %286, %287, %cst_217 {dimension_numbers = #tpu.dot_dimension_numbers<[1], [0], [0], [1], [0, 0, 1, 1], [], []>} : vector<1x128xf32>, vector<128x64xf32>, vector<1x64xf32> -> vector<1x64xf32>
    %c0_218 = arith.constant 0 : index
    %c0_219 = arith.constant 0 : index
    %289 = vector.load %arg23[%c0_218, %c0_219] : memref<2x64xf32, #tpu.memory_space<vmem>>, vector<1x64xf32>
    %290 = arith.addf %288, %289 : vector<1x64xf32>
    %c1_220 = arith.constant 1 : index
    %c0_221 = arith.constant 0 : index
    %291 = vector.load %arg23[%c1_220, %c0_221] : memref<2x64xf32, #tpu.memory_space<vmem>>, vector<1x64xf32>
    %cst_222 = arith.constant 0.000000e+00 : f32
    %292 = vector.broadcast %cst_222 : f32 to vector<1x64xf32>
    %293 = arith.cmpf oge, %290, %292 : vector<1x64xf32>
    %294 = arith.mulf %291, %290 : vector<1x64xf32>
    %295 = arith.select %293, %290, %294 : vector<1x64xi1>, vector<1x64xf32>
    %c0_223 = arith.constant 0 : index
    %c0_224 = arith.constant 0 : index
    %296 = vector.load %arg24[%c0_223, %c0_224] : memref<64x1xf32, #tpu.memory_space<vmem>>, vector<64x1xf32>
    %cst_225 = arith.constant dense<0.000000e+00> : vector<1x1xf32>
    %297 = tpu.matmul %295, %296, %cst_225 {dimension_numbers = #tpu.dot_dimension_numbers<[1], [0], [0], [1], [0, 0, 1, 1], [], []>} : vector<1x64xf32>, vector<64x1xf32>, vector<1x1xf32> -> vector<1x1xf32>
    %c0_226 = arith.constant 0 : index
    %c0_227 = arith.constant 0 : index
    %298 = vector.load %arg25[%c0_226, %c0_227] : memref<2x1xf32, #tpu.memory_space<vmem>>, vector<1x1xf32>
    %299 = arith.addf %297, %298 : vector<1x1xf32>
    %c1_228 = arith.constant 1 : index
    %c0_229 = arith.constant 0 : index
    %300 = vector.load %arg25[%c1_228, %c0_229] : memref<2x1xf32, #tpu.memory_space<vmem>>, vector<1x1xf32>
    %301 = arith.mulf %300, %299 : vector<1x1xf32>
    %cst_230 = arith.constant 0.000000e+00 : f32
    %302 = vector.broadcast %cst_230 : f32 to vector<1x1xf32>
    %303 = arith.subf %302, %301 : vector<1x1xf32>
    %304 = math.exp %303 : vector<1x1xf32>
    %cst_231 = arith.constant 1.000000e+00 : f32
    %305 = vector.broadcast %cst_231 : f32 to vector<1x1xf32>
    %306 = arith.addf %305, %304 : vector<1x1xf32>
    %cst_232 = arith.constant 1.000000e+00 : f32
    %307 = vector.broadcast %cst_232 : f32 to vector<1x1xf32>
    %308 = arith.divf %307, %306 : vector<1x1xf32>
    %c0_233 = arith.constant 0 : index
    %c0_234 = arith.constant 0 : index
    %c0_235 = arith.constant 0 : index
    %309 = vector.load %arg26[%c0_233, %c0_234, %c0_235] : memref<1x1x1xf32, #tpu.memory_space<vmem>>, vector<1x1x1xf32>
    %310 = vector.shape_cast %309 : vector<1x1x1xf32> to vector<1x1xf32>
    %311 = vector.shape_cast %308 : vector<1x1xf32> to vector<1x1x1xf32>
    tpu.vector_store %arg26[%c0_233, %c0_234, %c0_235], %311 {strides = array<i32>} : memref<1x1x1xf32, #tpu.memory_space<vmem>>, vector<1x1x1xf32>,
    return
  }
  func.func @transform_0(%arg0: i32) -> (i32, i32, i32) {
    %c0_i32 = arith.constant 0 : i32
    %c0_i32_0 = arith.constant 0 : i32
    %c0_i32_1 = arith.constant 0 : i32
    return %arg0, %c0_i32, %c0_i32_0 : i32, i32, i32
  }
  func.func @transform_1(%arg0: i32) -> (i32, i32, i32) {
    %c0_i32 = arith.constant 0 : i32
    %c0_i32_0 = arith.constant 0 : i32
    %c0_i32_1 = arith.constant 0 : i32
    %c0_i32_2 = arith.constant 0 : i32
    return %c0_i32, %c0_i32_0, %c0_i32_1 : i32, i32, i32
  }
  func.func @transform_2(%arg0: i32) -> (i32, i32, i32) {
    %c0_i32 = arith.constant 0 : i32
    %c0_i32_0 = arith.constant 0 : i32
    %c0_i32_1 = arith.constant 0 : i32
    %c0_i32_2 = arith.constant 0 : i32
    return %c0_i32, %c0_i32_0, %c0_i32_1 : i32, i32, i32
  }
  func.func @transform_3(%arg0: i32) -> (i32, i32) {
    %c0_i32 = arith.constant 0 : i32
    %c0_i32_0 = arith.constant 0 : i32
    %c0_i32_1 = arith.constant 0 : i32
    return %c0_i32, %c0_i32_0 : i32, i32
  }
  func.func @transform_4(%arg0: i32) -> (i32, i32) {
    %c0_i32 = arith.constant 0 : i32
    %c0_i32_0 = arith.constant 0 : i32
    %c0_i32_1 = arith.constant 0 : i32
    return %c0_i32, %c0_i32_0 : i32, i32
  }
  func.func @transform_5(%arg0: i32) -> (i32, i32) {
    %c0_i32 = arith.constant 0 : i32
    %c0_i32_0 = arith.constant 0 : i32
    %c0_i32_1 = arith.constant 0 : i32
    return %c0_i32, %c0_i32_0 : i32, i32
  }
  func.func @transform_6(%arg0: i32) -> (i32, i32, i32) {
    %c0_i32 = arith.constant 0 : i32
    %c0_i32_0 = arith.constant 0 : i32
    %c0_i32_1 = arith.constant 0 : i32
    %c0_i32_2 = arith.constant 0 : i32
    return %c0_i32, %c0_i32_0, %c0_i32_1 : i32, i32, i32
  }
  func.func @transform_7(%arg0: i32) -> (i32, i32, i32) {
    %c0_i32 = arith.constant 0 : i32
    %c0_i32_0 = arith.constant 0 : i32
    %c0_i32_1 = arith.constant 0 : i32
    %c0_i32_2 = arith.constant 0 : i32
    return %c0_i32, %c0_i32_0, %c0_i32_1 : i32, i32, i32
  }
  func.func @transform_8(%arg0: i32) -> (i32, i32) {
    %c0_i32 = arith.constant 0 : i32
    %c0_i32_0 = arith.constant 0 : i32
    %c0_i32_1 = arith.constant 0 : i32
    return %c0_i32, %c0_i32_0 : i32, i32
  }
  func.func @transform_9(%arg0: i32) -> (i32, i32) {
    %c0_i32 = arith.constant 0 : i32
    %c0_i32_0 = arith.constant 0 : i32
    %c0_i32_1 = arith.constant 0 : i32
    return %c0_i32, %c0_i32_0 : i32, i32
  }
  func.func @transform_10(%arg0: i32) -> (i32, i32) {
    %c0_i32 = arith.constant 0 : i32
    %c0_i32_0 = arith.constant 0 : i32
    %c0_i32_1 = arith.constant 0 : i32
    return %c0_i32, %c0_i32_0 : i32, i32
  }
  func.func @transform_11(%arg0: i32) -> (i32, i32, i32) {
    %c0_i32 = arith.constant 0 : i32
    %c0_i32_0 = arith.constant 0 : i32
    %c0_i32_1 = arith.constant 0 : i32
    %c0_i32_2 = arith.constant 0 : i32
    return %c0_i32, %c0_i32_0, %c0_i32_1 : i32, i32, i32
  }
  func.func @transform_12(%arg0: i32) -> (i32, i32, i32) {
    %c0_i32 = arith.constant 0 : i32
    %c0_i32_0 = arith.constant 0 : i32
    %c0_i32_1 = arith.constant 0 : i32
    %c0_i32_2 = arith.constant 0 : i32
    return %c0_i32, %c0_i32_0, %c0_i32_1 : i32, i32, i32
  }
  func.func @transform_13(%arg0: i32) -> (i32, i32) {
    %c0_i32 = arith.constant 0 : i32
    %c0_i32_0 = arith.constant 0 : i32
    %c0_i32_1 = arith.constant 0 : i32
    return %c0_i32, %c0_i32_0 : i32, i32
  }
  func.func @transform_14(%arg0: i32) -> (i32, i32) {
    %c0_i32 = arith.constant 0 : i32
    %c0_i32_0 = arith.constant 0 : i32
    %c0_i32_1 = arith.constant 0 : i32
    return %c0_i32, %c0_i32_0 : i32, i32
  }
  func.func @transform_15(%arg0: i32) -> (i32, i32) {
    %c0_i32 = arith.constant 0 : i32
    %c0_i32_0 = arith.constant 0 : i32
    %c0_i32_1 = arith.constant 0 : i32
    return %c0_i32, %c0_i32_0 : i32, i32
  }
  func.func @transform_16(%arg0: i32) -> (i32, i32, i32) {
    %c0_i32 = arith.constant 0 : i32
    %c0_i32_0 = arith.constant 0 : i32
    %c0_i32_1 = arith.constant 0 : i32
    %c0_i32_2 = arith.constant 0 : i32
    return %c0_i32, %c0_i32_0, %c0_i32_1 : i32, i32, i32
  }
  func.func @transform_17(%arg0: i32) -> (i32, i32, i32) {
    %c0_i32 = arith.constant 0 : i32
    %c0_i32_0 = arith.constant 0 : i32
    %c0_i32_1 = arith.constant 0 : i32
    %c0_i32_2 = arith.constant 0 : i32
    return %c0_i32, %c0_i32_0, %c0_i32_1 : i32, i32, i32
  }
  func.func @transform_18(%arg0: i32) -> (i32, i32) {
    %c0_i32 = arith.constant 0 : i32
    %c0_i32_0 = arith.constant 0 : i32
    %c0_i32_1 = arith.constant 0 : i32
    return %c0_i32, %c0_i32_0 : i32, i32
  }
  func.func @transform_19(%arg0: i32) -> (i32, i32) {
    %c0_i32 = arith.constant 0 : i32
    %c0_i32_0 = arith.constant 0 : i32
    %c0_i32_1 = arith.constant 0 : i32
    return %c0_i32, %c0_i32_0 : i32, i32
  }
  func.func @transform_20(%arg0: i32) -> (i32, i32) {
    %c0_i32 = arith.constant 0 : i32
    %c0_i32_0 = arith.constant 0 : i32
    %c0_i32_1 = arith.constant 0 : i32
    return %c0_i32, %c0_i32_0 : i32, i32
  }
  func.func @transform_21(%arg0: i32) -> (i32, i32) {
    %c0_i32 = arith.constant 0 : i32
    %c0_i32_0 = arith.constant 0 : i32
    %c0_i32_1 = arith.constant 0 : i32
    return %c0_i32, %c0_i32_0 : i32, i32
  }
  func.func @transform_22(%arg0: i32) -> (i32, i32) {
    %c0_i32 = arith.constant 0 : i32
    %c0_i32_0 = arith.constant 0 : i32
    %c0_i32_1 = arith.constant 0 : i32
    return %c0_i32, %c0_i32_0 : i32, i32
  }
  func.func @transform_23(%arg0: i32) -> (i32, i32) {
    %c0_i32 = arith.constant 0 : i32
    %c0_i32_0 = arith.constant 0 : i32
    %c0_i32_1 = arith.constant 0 : i32
    return %c0_i32, %c0_i32_0 : i32, i32
  }
  func.func @transform_24(%arg0: i32) -> (i32, i32) {
    %c0_i32 = arith.constant 0 : i32
    %c0_i32_0 = arith.constant 0 : i32
    %c0_i32_1 = arith.constant 0 : i32
    return %c0_i32, %c0_i32_0 : i32, i32
  }
  func.func @transform_25(%arg0: i32) -> (i32, i32, i32) {
    %c0_i32 = arith.constant 0 : i32
    %c0_i32_0 = arith.constant 0 : i32
    %c0_i32_1 = arith.constant 0 : i32
    return %arg0, %c0_i32, %c0_i32_0 : i32, i32, i32
  }
}

</mosaic_0001>

<bundles_post_ra>
// kernel: metric_discriminator_forward.1
= control target key start
LH: loop header
LB: loop body
LE: loop exit
PB: predicated region body
PF: predicated region fallthrough
CT: control target
= control target key end

     0   :  { %s11192_s0 = inlined_call_operand.vmem [shape: f32[2,32,64], index: 0, kind: input, shape index: {}]   ;;  %s11193_s1 = inlined_call_operand.hbm [shape: bf16[4,16,32], index: 1, kind: input, shape index: {}]   ;;  %s11194_s2 = inlined_call_operand.vmem [shape: bf16[4,64,256], index: 2, kind: input, shape index: {}]   ;;  %s11195_s3 = inlined_call_operand.vmem [shape: f32[256,16], index: 3, kind: input, shape index: {}]   ;;  %s11196_s4 = inlined_call_operand.hbm [shape: f32[16,256], index: 4, kind: input, shape index: {}]   ;;  %s11197_s5 = inlined_call_operand.vmem [shape: f32[3,16], index: 5, kind: input, shape index: {}]   ;;  %s11198_s6 = inlined_call_operand.hbm [shape: bf16[4,8,16], index: 6, kind: input, shape index: {}]   ;;  %s11199_s7 = inlined_call_operand.vmem [shape: bf16[4,256,256], index: 7, kind: input, shape index: {}]   ;;  %s11200_s8 = inlined_call_operand.vmem [shape: f32[256,32], index: 8, kind: input, shape index: {}]   ;;  %s11201_s9 = inlined_call_operand.hbm [shape: f32[32,256], index: 9, kind: input, shape index: {}]   ;;  %s11202_s10 = inlined_call_operand.hbm [shape: f32[3,32], index: 10, kind: input, shape index: {}]   ;;  %s11203_s11 = inlined_call_operand.hbm [shape: bf16[4,4,8], index: 11, kind: input, shape index: {}]   ;;  %s11204_s12 = inlined_call_operand.hbm [shape: bf16[4,256,256], index: 12, kind: input, shape index: {}]   ;;  %s11205_s13 = inlined_call_operand.vmem [shape: f32[256,64], index: 13, kind: input, shape index: {}]   ;;  %s11206_s14 = inlined_call_operand.hbm [shape: f32[64,256], index: 14, kind: input, shape index: {}]   ;;  %s11207_s15 = inlined_call_operand.hbm [shape: f32[3,64], index: 15, kind: input, shape index: {}]   ;;  %s11208_s16 = inlined_call_operand.hbm [shape: bf16[4,2,4], index: 16, kind: input, shape index: {}]   ;;  %s11209_s17 = inlined_call_operand.hbm [shape: bf16[4,256,256], index: 17, kind: input, shape index: {}]   ;;  %s11210_s18 = inlined_call_operand.vmem [shape: f32[256,128], index: 18, kind: input, shape index: {}]   ;;  %s11211_s19 = inlined_call_operand.vmem [shape: f32[128,256], index: 19, kind: input, shape index: {}]   ;;  %s11212_s20 = inlined_call_operand.vmem [shape: f32[3,128], index: 20, kind: input, shape index: {}]   ;;  %s11213_s21 = inlined_call_operand.vmem [shape: f32[128,64], index: 21, kind: input, shape index: {}]   ;;  %s11214_s22 = inlined_call_operand.vmem [shape: f32[2,64], index: 22, kind: input, shape index: {}]   ;;  %s11215_s23 = inlined_call_operand.vmem [shape: f32[64,1], index: 23, kind: input, shape index: {}]   ;;  %s11216_s24 = inlined_call_operand.vmem [shape: f32[2,1], index: 24, kind: input, shape index: {}]   ;;  %s11217_s25 = inlined_call_operand.vmem [shape: f32[2,1,1], index: 25, kind: output, shape index: {}]  }
   0x1   :  { %11228 = sst [smem:[#allocation25_spill]] %s11192_s0 }
   0x2   :  { %11229 = sst [smem:[#allocation26_spill]] %s11193_s1 }
   0x3   :  { %11230 = sst [smem:[#allocation27_spill]] %s11194_s2 }
   0x4   :  { %11231 = sst [smem:[#allocation28_spill]] %s11195_s3 }
   0x5   :  { %11232 = sst [smem:[#allocation29_spill]] %s11196_s4 }
   0x6   :  { %11233 = sst [smem:[#allocation30_spill]] %s11197_s5 }
   0x7   :  { %11234 = sst [smem:[#allocation31_spill]] %s11198_s6 }
   0x8   :  { %11235 = sst [smem:[#allocation32_spill]] %s11199_s7 }
   0x9   :  { %11236 = sst [smem:[#allocation33_spill]] %s11200_s8 }
   0xa   :  { %11237 = sst [smem:[#allocation34_spill]] %s11201_s9 }
   0xb   :  { %11238 = sst [smem:[#allocation35_spill]] %s11203_s11 }
   0xc   :  { %11239 = sst [smem:[#allocation36_spill]] %s11206_s14 }
   0xd   :  { %30 = vsyncpa [#allocation3], 0 }
   0xe   :  { %31 = vsyncpa [#allocation5], 0 }
   0xf   :  { %32 = vsyncpa [#allocation8], 0 }
  0x10   :  { %33 = vsyncpa [#allocation11], 0 }
  0x11   :  { %34 = vsyncpa [#allocation14], 0 }
  0x12   :  { %35 = vsyncpa [#allocation17], 0  ;;  %s9484_s29 = smov 0  }
  0x13 LB: > { %s9331_s2 = smov [#allocation4]   ;;  %s9490_s30 = sadd.s32 4294967295, %s9329_s29   ;;  %s9329_s29 = sphi %s9484_s29, %s41_s29  }
  0x14   : > { %s633_s6 = sshll.u32 %s9331_s2, 4  ;;  %p7230_p0 = scmp.ge.s32.totalorder %s9329_s29, 1  ;;  %s634_s6 = int_to_ptr.vmem [resolvable:$true] %s633_s6 }
  0x15   : > { %p602_p1 = scmp.lt.s32.totalorder %s9329_s29, 3  ;;  %p11226_p2 = scmp.eq.s32.totalorder %s9490_s30, 0 }
  0x16   : > { %s9332_s3 = smov [#allocation7]   ;;  %s9333_s8 = smov [#allocation10]  }
  0x17   : > { %p9495_p3 = pnand %p7230_p0, %p602_p1  ;;  %s668_s26 = sshll.u32 %s9332_s3, 4  ;;  %s9501_s26 = int_to_ptr.vmem [resolvable:$true] %s668_s26 }
  0x18   : > { %s692_s27 = sshll.u32 %s9333_s8, 4  ;;  %s9024_s28 = scalar_lea.vmem %s634_s6, 512  ;;  %s9509_s27 = int_to_ptr.vmem [resolvable:$true] %s692_s27 }
  0x19   : > { %s11240_s7 = scalar_select %p9495_p3, 1, 0 }
  0x1a   : > { %p8286_p4 = pneg %p9495_p3  ;;  %p9025_p7 = scmp.ne.s32.totalorder %s634_s6, %s9024_s28 }
  0x1b   : > { %p9032_p10 = scmp.lt.s32.totalorder %s634_s6, %s634_s6  ;;  %p9033_p11 = scmp.lt.s32.totalorder %s9024_s28, %s9024_s28 }
  0x1c   : > { %p9505_p5 = pnand %p11226_p2, %p8286_p4 }
  0x1d   : > { %p9034_p12 = por %p9033_p11, %p9032_p10 }
  0x1e   : > { %p9513_p6 = pneg %p9505_p5 }
  0x20   : > { %p9027_p8 = pnand %p9025_p7, %p9513_p6 }
  0x22   : > { %p9028_p9 = pneg %p9027_p8 }
  0x24   : > { %p9035_p13 = pnand %p9034_p12, %p9028_p9 }
  0x26   : > { %9038 = shalt.err (!%p9035_p13)
}
  0x27   : > { %s11223_s9 = smov 256   ;;  %s11224_s5 = smov 16  }
  0x28   : > { %s11243_s3 = sld [smem:[#allocation29_spill]]  ;;  %s9050_s8 = scalar_lea.vmem %s9501_s26, 1024 }
  0x29   : > { %p9051_p0 = scmp.ne.s32.totalorder %s9501_s26, %s9050_s8  ;;  %p9058_p7 = scmp.lt.s32.totalorder %s9501_s26, %s9501_s26 }
  0x2a   : > { %p9059_p8 = scmp.lt.s32.totalorder %s9050_s8, %s9050_s8 }
  0x2b   : > { %p9053_p1 = pnand %p9051_p0, %p9513_p6 }
  0x2c   : > { %p9060_p9 = por %p9059_p8, %p9058_p7 }
  0x2d   : > { %p9054_p4 = pneg %p9053_p1 }
  0x2e   : > { %8292 = dma.hbm_to_vmem [thread:$0]  (!%p9505_p5), %s11243_s3, 512, %s634_s6, [#allocation5], %s11223_s9, %s11223_s9, %s11224_s5  }
  0x2f   : > { %p9061_p10 = pnand %p9060_p9, %p9054_p4 }
  0x31   : > { %9064 = shalt.err (!%p9061_p10)
}
  0x32   : > { %s11244_s6 = sld [smem:[#allocation34_spill]]  ;;  %s9076_s2 = scalar_lea.vmem %s9509_s27, 128 }
  0x33   : > { %p9077_p11 = scmp.ne.s32.totalorder %s9509_s27, %s9076_s2  ;;  %p9084_p0 = scmp.lt.s32.totalorder %s9509_s27, %s9509_s27 }
  0x34   : > { %p9085_p1 = scmp.lt.s32.totalorder %s9076_s2, %s9076_s2 }
  0x35   : > { %p9079_p12 = pnand %p9077_p11, %p9513_p6 }
  0x36   : > { %p9086_p4 = por %p9085_p1, %p9084_p0 }
  0x37   : > { %p9080_p13 = pneg %p9079_p12 }
  0x38   : > { %8298 = dma.hbm_to_vmem [thread:$0]  (!%p9505_p5), %s11244_s6, 1024, %s9501_s26, [#allocation8], %s11223_s9, %s11223_s9, %s11224_s5  }
  0x39   : > { %p9087_p7 = pnand %p9086_p4, %p9080_p13 }
  0x3b   : > { %9090 = shalt.err (!%p9087_p7)
}
  0x3c   : > { %s9336_s3 = smov 32   ;;  %s9337_s8 = smov 2  }
  0x3d   : > { %s11245_s11 = sld [smem:[#allocation35_spill]]  ;;  %s9338_s26 = smov [#allocation13]  }
  0x3e   : > { %s721_s6 = sshll.u32 %s9338_s26, 4  ;;  %s9339_s9 = smov [#allocation16]   ;;  %s722_s6 = int_to_ptr.vmem [resolvable:$true] %s721_s6 }
  0x3f   : > { %s745_s5 = sshll.u32 %s9339_s9, 4  ;;  %s9102_s2 = scalar_lea.vmem %s722_s6, 2048  ;;  %s746_s5 = int_to_ptr.vmem [resolvable:$true] %s745_s5 }
  0x40   : > { %p9103_p8 = scmp.ne.s32.totalorder %s722_s6, %s9102_s2  ;;  %p9110_p11 = scmp.lt.s32.totalorder %s722_s6, %s722_s6 }
  0x41   : > { %p9111_p12 = scmp.lt.s32.totalorder %s9102_s2, %s9102_s2 }
  0x42   : > { %p9105_p9 = pnand %p9103_p8, %p9513_p6 }
  0x43   : > { %8304 = dma.hbm_to_vmem [thread:$0]  (!%p9505_p5), %s11245_s11, 128, %s9509_s27, [#allocation11], %s9336_s3, %s9336_s3, %s9337_s8  }
  0x44   : > { %p9106_p10 = pneg %p9105_p9  ;;  %p9112_p13 = por %p9111_p12, %p9110_p11 }
  0x46   : > { %p9113_p0 = pnand %p9112_p13, %p9106_p10 }
  0x48   : > { %9116 = shalt.err (!%p9113_p0)
}
  0x49   : > { %s11246_s28 = smov 16   ;;  %s11247_s27 = smov 256  }
  0x4a   : > { %s11248_s14 = sld [smem:[#allocation36_spill]]  ;;  %s9128_s9 = scalar_lea.vmem %s746_s5, 64 }
  0x4b   : > { %p9129_p1 = scmp.ne.s32.totalorder %s746_s5, %s9128_s9  ;;  %p9136_p8 = scmp.lt.s32.totalorder %s746_s5, %s746_s5 }
  0x4c   : > { %p9137_p9 = scmp.lt.s32.totalorder %s9128_s9, %s9128_s9 }
  0x4d   : > { %p9131_p4 = pnand %p9129_p1, %p9513_p6 }
  0x4e   : > { %p9138_p11 = por %p9137_p9, %p9136_p8 }
  0x4f   : > { %p9132_p7 = pneg %p9131_p4 }
  0x50   : > { %8310 = dma.hbm_to_vmem [thread:$0]  (!%p9505_p5), %s11248_s14, 2048, %s722_s6, [#allocation14], %s11247_s27, %s11247_s27, %s11246_s28  }
  0x51   : > { %p9139_p10 = pnand %p9138_p11, %p9132_p7 }
  0x53   : > { %9142 = shalt.err (!%p9139_p10)
}
  0x54   : > { %s9340_s0 = smov 1   ;;  %s9341_s6 = smov [#allocation2]  }
  0x55   : > { %8316 = dma.hbm_to_vmem [thread:$0]  (!%p9505_p5), %s11208_s16, 64, %s746_s5, [#allocation17], %s11246_s28, %s11246_s28, %s9340_s0  }
  0x56   : > { %s614_s27 = sshll.u32 %s9341_s6, 4  ;;  %s615_s27 = int_to_ptr.vmem [resolvable:$true] %s614_s27 }
  0x57   : > { %s9154_s3 = scalar_lea.vmem %s615_s27, 512  ;;  %p9162_p1 = scmp.lt.s32.totalorder %s615_s27, %s615_s27 }
  0x58   : > { %p9155_p12 = scmp.ne.s32.totalorder %s615_s27, %s9154_s3  ;;  %p9163_p4 = scmp.lt.s32.totalorder %s9154_s3, %s9154_s3 }
  0x5a   : > { %p9157_p13 = pnand %p9155_p12, %p9513_p6  ;;  %p9164_p7 = por %p9163_p4, %p9162_p1 }
  0x5c   : > { %p9158_p0 = pneg %p9157_p13 }
  0x5e   : > { %p9165_p8 = pnand %p9164_p7, %p9158_p0 }
  0x60   : > { %9168 = shalt.err (!%p9165_p8)
}
  0x61   : > { %s9342_s8 = smov 64   ;;  %s9343_s9 = smov 4  }
  0x62   : > { %s11249_s28 = sld [smem:[#allocation26_spill]]  ;;  %s9344_s0 = smov [#allocation6]  }
  0x63   : > { %s649_s2 = sshll.u32 %s9344_s0, 4  ;;  %s9345_s6 = smov [#allocation9]   ;;  %s650_s2 = int_to_ptr.vmem [resolvable:$true] %s649_s2 }
  0x64   : > { %s682_s11 = sshll.u32 %s9345_s6, 4  ;;  %s9180_s14 = scalar_lea.vmem %s650_s2, 256  ;;  %s683_s11 = int_to_ptr.vmem [resolvable:$true] %s682_s11 }
  0x65   : > { %p9181_p9 = scmp.ne.s32.totalorder %s650_s2, %s9180_s14  ;;  %p9188_p12 = scmp.lt.s32.totalorder %s650_s2, %s650_s2 }
  0x66   : > { %p9189_p13 = scmp.lt.s32.totalorder %s9180_s14, %s9180_s14 }
  0x67   : > { %p9183_p11 = pnand %p9181_p9, %p9513_p6 }
  0x68   : > { %8289 = dma.hbm_to_vmem [thread:$0]  (!%p9505_p5), %s11249_s28, 512, %s615_s27, [#allocation3], %s9342_s8, %s9342_s8, %s9343_s9  }
  0x69   : > { %p9184_p10 = pneg %p9183_p11  ;;  %p9190_p0 = por %p9189_p13, %p9188_p12 }
  0x6b   : > { %p9191_p1 = pnand %p9190_p0, %p9184_p10 }
  0x6d   : > { %9194 = shalt.err (!%p9191_p1)
}
  0x6e   : > { %s11250_s26 = sld [smem:[#allocation31_spill]]  ;;  %s9206_s5 = scalar_lea.vmem %s683_s11, 64 }
  0x6f   : > { %p9207_p4 = scmp.ne.s32.totalorder %s683_s11, %s9206_s5  ;;  %p9214_p2 = scmp.lt.s32.totalorder %s683_s11, %s683_s11 }
  0x70   : > { %p9215_p9 = scmp.lt.s32.totalorder %s9206_s5, %s9206_s5 }
  0x71   : > { %p9209_p7 = pnand %p9207_p4, %p9513_p6 }
  0x72   : > { %p9216_p11 = por %p9215_p9, %p9214_p2 }
  0x73   : > { %p9210_p8 = pneg %p9209_p7 }
  0x74   : > { %8295 = dma.hbm_to_vmem [thread:$0]  (!%p9505_p5), %s11250_s26, 256, %s650_s2, [#allocation5], %s9342_s8, %s9342_s8, %s9343_s9  }
  0x75   : > { %p9217_p3 = pnand %p9216_p11, %p9210_p8 }
  0x77   : > { %9220 = shalt.err (!%p9217_p3)
}
  0x78   : > { %8301 = dma.hbm_to_vmem [thread:$0]  (!%p9505_p5), %s11202_s10, 64, %s683_s11, [#allocation8]  }
  0x79   : > { %s9346_s0 = smov [#allocation12]  }
  0x7a   : > { %s705_s6 = sshll.u32 %s9346_s0, 4  ;;  %s706_s6 = int_to_ptr.vmem [resolvable:$true] %s705_s6 }
  0x7b   : > { %s9232_s8 = scalar_lea.vmem %s706_s6, 16384  ;;  %p9240_p0 = scmp.lt.s32.totalorder %s706_s6, %s706_s6 }
  0x7c   : > { %p9233_p10 = scmp.ne.s32.totalorder %s706_s6, %s9232_s8  ;;  %p9241_p1 = scmp.lt.s32.totalorder %s9232_s8, %s9232_s8 }
  0x7e   : > { %p9235_p12 = pnand %p9233_p10, %p9513_p6  ;;  %p9242_p2 = por %p9241_p1, %p9240_p0 }
  0x80   : > { %p9236_p13 = pneg %p9235_p12 }
  0x82   : > { %p9243_p4 = pnand %p9242_p2, %p9236_p13 }
  0x84   : > { %9246 = shalt.err (!%p9243_p4)
}
  0x85   : > { %s9347_s9 = smov 128   ;;  %s9348_s2 = smov 8  }
  0x86   : > { %8307 = dma.hbm_to_vmem [thread:$0]  (!%p9505_p5), %s11204_s12, 16384, %s706_s6, [#allocation11], %s9347_s9, %s9347_s9, %s9348_s2  }
  0x87   : > { %s9349_s27 = smov [#allocation15]   ;;  %s9350_s5 = smov [#allocation18]  }
  0x88   : > { %s735_s26 = sshll.u32 %s9349_s27, 4  ;;  %s758_s14 = sshll.u32 %s9350_s5, 4  ;;  %s736_s26 = int_to_ptr.vmem [resolvable:$true] %s735_s26  ;;  %s759_s14 = int_to_ptr.vmem [resolvable:$true] %s758_s14 }
  0x89   : > { %s9258_s28 = scalar_lea.vmem %s736_s26, 64  ;;  %p9266_p9 = scmp.lt.s32.totalorder %s736_s26, %s736_s26 }
  0x8a   : > { %p9259_p3 = scmp.ne.s32.totalorder %s736_s26, %s9258_s28  ;;  %p9267_p11 = scmp.lt.s32.totalorder %s9258_s28, %s9258_s28 }
  0x8c   : > { %p9261_p7 = pnand %p9259_p3, %p9513_p6  ;;  %p9268_p10 = por %p9267_p11, %p9266_p9 }
  0x8e   : > { %p9262_p8 = pneg %p9261_p7 }
  0x90   : > { %p9269_p12 = pnand %p9268_p10, %p9262_p8 }
  0x92   : > { %9272 = shalt.err (!%p9269_p12)
}
  0x93   : > { %8313 = dma.hbm_to_vmem [thread:$0]  (!%p9505_p5), %s11207_s15, 64, %s736_s26, [#allocation14]  }
  0x94   : > { %s9284_s6 = scalar_lea.vmem %s759_s14, 16384  ;;  %p9292_p2 = scmp.lt.s32.totalorder %s759_s14, %s759_s14 }
  0x95   : > { %p9285_p13 = scmp.ne.s32.totalorder %s759_s14, %s9284_s6  ;;  %p9293_p4 = scmp.lt.s32.totalorder %s9284_s6, %s9284_s6 }
  0x97   : > { %p9287_p0 = pnand %p9285_p13, %p9513_p6  ;;  %p9294_p3 = por %p9293_p4, %p9292_p2 }
  0x99   : > { %p9288_p1 = pneg %p9287_p0 }
  0x9b   : > { %p9295_p7 = pnand %p9294_p3, %p9288_p1 }
  0x9d   : > { %9298 = shalt.err (!%p9295_p7)
}
  0x9e   : > { %8319 = dma.hbm_to_vmem [thread:$0]  (!%p9505_p5), %s11209_s17, 16384, %s759_s14, [#allocation17], %s9347_s9, %s9347_s9, %s9348_s2  }
  0x9f   : > { %p11251_p8 = scmp.ne.s32.totalorder %s11240_s7, 0 }
  0xa0   : > { %p11252_p6 = scmp.eq.s32.totalorder (!%p11251_p8), %s9490_s30, 0 }
  0xa1   : > { %803 = sbr.rel (%p11251_p8) target bundleno = 4911 (0x132f), region = 120 }
  0xa6   : > { %9304 = dma.done.wait (%p11252_p6), [#allocation3], 512   ;;  %p11253_p9 = pmov %p11252_p6 }
  0xa7   : > { %p11254_p11 = pmov %p11252_p6 }
  0xa8   : > { %9306 = vsyncadd (%p11253_p9), [#allocation3], 4294966784 }
  0xa9   : > { %9308 = dma.done.wait (%p11254_p11), [#allocation5], 768   ;;  %p11255_p10 = pmov %p11252_p6 }
  0xaa   : > { %p11256_p12 = pmov %p11252_p6 }
  0xab   : > { %9310 = vsyncadd (%p11255_p10), [#allocation5], 4294966528 }
  0xac   : > { %9312 = dma.done.wait (%p11256_p12), [#allocation8], 1088   ;;  %p11257_p5 = pmov %p11252_p6 }
  0xae   : > { %9314 = vsyncadd (%p11257_p5), [#allocation8], 4294966208  ;;  %p11258_p13 = pmov %p11257_p5 }
  0xaf   : > { %p11259_p0 = pmov %p11257_p5 }
  0xb0   : > { %9316 = dma.done.wait (%p11258_p13), [#allocation11], 16512  }
  0xb1   : > { %9318 = vsyncadd (%p11259_p0), [#allocation11], 4294950784  ;;  %p11260_p1 = pmov %p11259_p0 }
  0xb2   : > { %p11261_p2 = pmov %p11259_p0 }
  0xb3   : > { %9320 = dma.done.wait (%p11260_p1), [#allocation14], 2112  }
  0xb4   : > { %9322 = vsyncadd (%p11261_p2), [#allocation14], 4294965184  ;;  %p11262_p4 = pmov %p11259_p0 }
  0xb5   : > { %p11263_p3 = pmov %p11259_p0 }
  0xb6   : > { %9324 = dma.done.wait (%p11262_p4), [#allocation17], 16448  }
  0xb7   : > { %9326 = vsyncadd (%p11263_p3), [#allocation17], 4294950848  ;;  %p909_p7 = scmp.lt.s32.totalorder %s9490_s30, 1  ;;  %v9351_v0 = vmov 0.0   ;;  %vm9352_vm0 = vmmov 0   ;;  %s11264_s9 = sld [smem:[#allocation25_spill]] }
  0xb8   : > { %8156 = vmatprep.subr.bf16.mxu0 %v9351_v0  ;;  %8164 = vmatprep.subr.bf16.mxu1 %v9351_v0  ;;  %v8373_v7 = vld [vmem:[#allocation2] sm:$0xff]   ;;  %s11265_s5 = sld [smem:[#allocation27_spill]]  ;;  %v8374_v9 = vld [vmem:[#allocation2 + $0x8] sm:$0xff]   ;;  %vm931_vm1 = vcmask 261120   ;;  %v9353_v25 = vmov 0   ;;  %vm1087_vm2 = vcmask 523264  }
  0xb9   : > { %s11271_s30 = smov (!%p909_p7, %s9490_s30), 1  ;;  %8160 = vmatprep.mubr.msk.bf16.mxu0 %vm9352_vm0, %v9351_v0  ;;  %8168 = vmatprep.mubr.msk.bf16.mxu1 %vm9352_vm0, %v9351_v0  ;;  %v8399_v38 = vld [vmem:[#allocation2 + $0x10] sm:$0xff]   ;;  %v8400_v39 = vld [vmem:[#allocation2 + $0x18] sm:$0xff]   ;;  %s11266_s1 = sld [smem:[#allocation28_spill]]  ;;  %vm1744_vm3 = vcmask 130048   ;;  %vm3624_vm10 = vcmask 1043456  }
  0xba   : > { %s7837_s7 = sshll.u32 %s11271_s30, 5  ;;  %s11268_s28 = sld [smem:[#allocation32_spill]]  ;;  %vm3620_vm11 = vcmask 64512   ;;  %vm5250_vm14 = vcmask 1041408   ;;  %vm5246_vm15 = vcmask 31744  }
  0xbb   : > { %s11269_s11 = sld [smem:[#allocation33_spill]]  ;;  %s916_s8 = scalar_lea.vmem %s11217_s25, %s11271_s30 }
  0xbd   : > { %s913_s2 = scalar_lea.vmem %s11264_s9, %s7837_s7  ;;  %s11267_s7 = sld [smem:[#allocation30_spill]] }
  0xbe   : > { %v920_v1 = vld [vmem:[%s913_s2 + $0x10] sm:$0xff]  ;;  %v921_v2 = vld [vmem:[%s913_s2 + $0x18] sm:$0xff]  ;;  %v918_v3 = vld [vmem:[%s913_s2] sm:$0xff] }
  0xbf   : > { %v9661_v4 = vpack.c.bf16 %v921_v2, %v920_v1  ;;  %v919_v5 = vld [vmem:[%s913_s2 + $0x8] sm:$0xff]  ;;  %v8377_v8 = vld [vmem:[%s11265_s5 + $0x74] ss:$8 sps:$4 sm:$0xff]   ;;  %v8375_v11 = vld [vmem:[%s11265_s5 + $0x70] ss:$8 sps:$4 sm:$0xff]  }
  0xc0   : > { %v9665_v6 = vpack.c.bf16 %v919_v5, %v918_v3  ;;  %v8380_v10 = vld [vmem:[%s11265_s5 + $0x34] ss:$8 sps:$4 sm:$0xff]   ;;  %v8378_v12 = vld [vmem:[%s11265_s5 + $0x30] ss:$8 sps:$4 sm:$0xff]   ;;  %v8383_v13 = vld [vmem:[%s11265_s5 + $0x64] ss:$8 sps:$4 sm:$0xff]  }
  0xc1   : > { %8157 = vmatpush3.bf16.msra.mxu0 %v9661_v4  ;;  %8165 = vmatpush3.bf16.msra.mxu1 %v9661_v4  ;;  %v8386_v14 = vld [vmem:[%s11265_s5 + $0x24] ss:$8 sps:$4 sm:$0xff]   ;;  %v8381_v15 = vld [vmem:[%s11265_s5 + $0x60] ss:$8 sps:$4 sm:$0xff]   ;;  %v8389_v17 = vld [vmem:[%s11265_s5 + $0x54] ss:$8 sps:$4 sm:$0xff]  }
  0xc2   : > { %8158 = vmatprep.subr.bf16.mxu0 %v9351_v0  ;;  %8166 = vmatprep.subr.bf16.mxu1 %v9351_v0  ;;  %v8384_v16 = vld [vmem:[%s11265_s5 + $0x20] ss:$8 sps:$4 sm:$0xff]   ;;  %v8392_v18 = vld [vmem:[%s11265_s5 + $0x14] ss:$8 sps:$4 sm:$0xff]   ;;  %v8387_v19 = vld [vmem:[%s11265_s5 + $0x50] ss:$8 sps:$4 sm:$0xff]  }
  0xc3   : > { %v8390_v20 = vld [vmem:[%s11265_s5 + $0x10] ss:$8 sps:$4 sm:$0xff]   ;;  %v8395_v21 = vld [vmem:[%s11265_s5 + $0x44] ss:$8 sps:$4 sm:$0xff]   ;;  %v8393_v23 = vld [vmem:[%s11265_s5 + $0x40] ss:$8 sps:$4 sm:$0xff]  }
  0xc4   : > { %v8398_v22 = vld [vmem:[%s11265_s5 + $0x4] ss:$8 sps:$4 sm:$0xff]   ;;  %v8396_v24 = vld [vmem:[%s11265_s5] ss:$8 sps:$4 sm:$0xff]   ;;  %v8403_v26 = vld [vmem:[%s11265_s5 + $0xb4] ss:$8 sps:$4 sm:$0xff]  }
  0xc5   : > { %8159 = vmatpush3.bf16.msra.mxu0 %v9665_v6  ;;  %8167 = vmatpush3.bf16.msra.mxu1 %v9665_v6  ;;  %v8401_v35 = vld [vmem:[%s11265_s5 + $0xb0] ss:$8 sps:$4 sm:$0xff]   ;;  %v8406_v40 = vld [vmem:[%s11265_s5 + $0xa4] ss:$8 sps:$4 sm:$0xff]   ;;  %v8404_v41 = vld [vmem:[%s11265_s5 + $0xa0] ss:$8 sps:$4 sm:$0xff]  }
  0xc6   : > { %1099 = vmatprep.subr.bf16.mxu0 %v8377_v8  ;;  %1185 = vmatprep.subr.bf16.mxu1 %v8380_v10  ;;  %v8409_v42 = vld [vmem:[%s11265_s5 + $0x94] ss:$8 sps:$4 sm:$0xff]   ;;  %v8407_v44 = vld [vmem:[%s11265_s5 + $0x90] ss:$8 sps:$4 sm:$0xff]   ;;  %v8415_v46 = vld [vmem:[%s11265_s5 + $0x84] ss:$8 sps:$4 sm:$0xff]  }
  0xc7   : > { %v8412_v43 = vld [vmem:[%s11265_s5 + $0xf4] ss:$8 sps:$4 sm:$0xff]   ;;  %v8410_v45 = vld [vmem:[%s11265_s5 + $0xf0] ss:$8 sps:$4 sm:$0xff]   ;;  %v8418_v47 = vld [vmem:[%s11265_s5 + $0xe4] ss:$8 sps:$4 sm:$0xff]  }
  0xc8   : > { %8161 = vmatmul.mubr.msk.bf16.vlgmr.msra.gmra.mxu0 %vm931_vm1, %v8373_v7  ;;  %8169 = vmatmul.mubr.msk.bf16.vlgmr.msra.gmra.mxu1 %vm931_vm1, %v8374_v9  ;;  %v8413_v48 = vld [vmem:[%s11265_s5 + $0x80] ss:$8 sps:$4 sm:$0xff]   ;;  %v8421_v50 = vld [vmem:[%s11265_s5 + $0xd4] ss:$8 sps:$4 sm:$0xff]   ;;  %v8419_v51 = vld [vmem:[%s11265_s5 + $0xd0] ss:$8 sps:$4 sm:$0xff]  }
  0xc9   : > { %1100 = vmatpush1.bf16.msra.mxu0 %v8375_v11  ;;  %1186 = vmatpush1.bf16.msra.mxu1 %v8378_v12  ;;  %v8416_v49 = vld [vmem:[%s11265_s5 + $0xe0] ss:$8 sps:$4 sm:$0xff]   ;;  %v8424_v52 = vld [vmem:[%s11265_s5 + $0xc4] ss:$8 sps:$4 sm:$0xff]   ;;  %v1555_v5 = vld [vmem:[%s11266_s1 + $0xf8] sm:$0xff] }
  0xca   : > { %1101 = vmatprep.subr.bf16.mxu0 %v8383_v13  ;;  %1187 = vmatprep.subr.bf16.mxu1 %v8386_v14  ;;  %v8422_v53 = vld [vmem:[%s11265_s5 + $0xc0] ss:$8 sps:$4 sm:$0xff]   ;;  %v1554_v7 = vld [vmem:[%s11266_s1 + $0xf0] sm:$0xff]  ;;  %v1551_v13 = vld [vmem:[%s11266_s1 + $0xd8] sm:$0xff] }
  0xcb   : > { %1123 = vmatprep.mubr.bf16.mxu0 %v9353_v25  ;;  %1209 = vmatprep.mubr.bf16.mxu1 %v9353_v25  ;;  %v1538_v8 = vld [vmem:[%s11266_s1 + $0x70] sm:$0xff]  ;;  %v1553_v9 = vld [vmem:[%s11266_s1 + $0xe8] sm:$0xff]  ;;  %v1552_v11 = vld [vmem:[%s11266_s1 + $0xe0] sm:$0xff] }
  0xcc   : > { %v1537_v10 = vld [vmem:[%s11266_s1 + $0x68] sm:$0xff]  ;;  %v1536_v12 = vld [vmem:[%s11266_s1 + $0x60] sm:$0xff]  ;;  %v1535_v14 = vld [vmem:[%s11266_s1 + $0x58] sm:$0xff] }
  0xcd   : > { %1102 = vmatpush1.bf16.msra.mxu0 %v8381_v15  ;;  %1188 = vmatpush1.bf16.msra.mxu1 %v8384_v16  ;;  %v1550_v15 = vld [vmem:[%s11266_s1 + $0xd0] sm:$0xff] }
  0xce   : > { %1103 = vmatprep.subr.bf16.mxu0 %v8389_v17  ;;  %1189 = vmatprep.subr.bf16.mxu1 %v8392_v18  ;;  %v1534_v16 = vld [vmem:[%s11266_s1 + $0x50] sm:$0xff]  ;;  %v1549_v17 = vld [vmem:[%s11266_s1 + $0xc8] sm:$0xff] }
  0xcf   : > { %v1533_v18 = vld [vmem:[%s11266_s1 + $0x48] sm:$0xff] }
  0xd1   : > { %1104 = vmatpush1.bf16.msra.mxu0 %v8387_v19  ;;  %1190 = vmatpush1.bf16.msra.mxu1 %v8390_v20  ;;  %v1548_v19 = vld [vmem:[%s11266_s1 + $0xc0] sm:$0xff] }
  0xd2   : > { %1105 = vmatprep.subr.bf16.mxu0 %v8395_v21  ;;  %1191 = vmatprep.subr.bf16.mxu1 %v8398_v22  ;;  %v1532_v20 = vld [vmem:[%s11266_s1 + $0x40] sm:$0xff]  ;;  %v1547_v21 = vld [vmem:[%s11266_s1 + $0xb8] sm:$0xff] }
  0xd3   : > { %v1531_v22 = vld [vmem:[%s11266_s1 + $0x38] sm:$0xff] }
  0xd5   : > { %1106 = vmatpush1.bf16.msra.mxu0 %v8393_v23  ;;  %1192 = vmatpush1.bf16.msra.mxu1 %v8396_v24  ;;  %v1546_v23 = vld [vmem:[%s11266_s1 + $0xb0] sm:$0xff] }
  0xd6   : > { %8172 = vmatprep.subr.bf16.mxu0 %v9351_v0  ;;  %1333 = vmatprep.subr.bf16.mxu1 %v8403_v26  ;;  %v1530_v24 = vld [vmem:[%s11266_s1 + $0x30] sm:$0xff]  ;;  %v1545_v26 = vld [vmem:[%s11266_s1 + $0xa8] sm:$0xff] }
 0x188   : > { %v969_v27 = vpop.f32.mrf.mxu0  ;;  %v1030_v28 = vpop.f32.mrf.mxu1 }
 0x18a   : > { %v8162_v29 = vpop.f32.mrf.mxu0  ;;  %v8170_v30 = vpop.f32.mrf.mxu1 }
 0x18b   : > { %v1528_v29 = vld [vmem:[%s11266_s1 + $0x20] sm:$0xff]  ;;  %v1543_v30 = vld [vmem:[%s11266_s1 + $0x98] sm:$0xff] }
 0x18c   : > { %v972_v31 = vpop.f32.mrf.mxu0  ;;  %v1033_v32 = vpop.f32.mrf.mxu1 }
 0x18d   : > { %v976_v33 = vpack.c.bf16 %v972_v31, %v969_v27  ;;  %v1037_v34 = vpack.c.bf16 %v1033_v32, %v1030_v28  ;;  %v1529_v27 = vld [vmem:[%s11266_s1 + $0x28] sm:$0xff]  ;;  %v1544_v28 = vld [vmem:[%s11266_s1 + $0xa0] sm:$0xff]  ;;  %v1527_v31 = vld [vmem:[%s11266_s1 + $0x18] sm:$0xff] }
 0x18e   : > { %v8171_v36 = vpop.f32.mrf.mxu1  ;;  %v8163_v37 = vpop.f32.mrf.mxu0  ;;  %v1542_v32 = vld [vmem:[%s11266_s1 + $0x90] sm:$0xff] }
 0x18f   : > { %7277 = vmatmul.mubr.msk.bf16.vlgmr.msra.gmra.mxu0 %vm1087_vm2, %v1037_v34  ;;  %7286 = vmatmul.mubr.msk.bf16.vlgmr.msra.gmra.mxu1 %vm1087_vm2, %v976_v33  ;;  %v1526_v33 = vld [vmem:[%s11266_s1 + $0x10] sm:$0xff]  ;;  %v1541_v34 = vld [vmem:[%s11266_s1 + $0x88] sm:$0xff]  ;;  %v1540_v36 = vld [vmem:[%s11266_s1 + $0x80] sm:$0xff] }
 0x190   : > { %8173 = vmatpush3.bf16.msra.mxu0 %v9661_v4  ;;  %8176 = vmatprep.mubr.msk.bf16.mxu0 %vm9352_vm0, %v9351_v0  ;;  %v1524_v37 = vld [vmem:[%s11266_s1] sm:$0xff] }
 0x191   : > { %8174 = vmatprep.subr.bf16.mxu0 %v9351_v0  ;;  %1334 = vmatpush1.bf16.msra.mxu1 %v8401_v35  ;;  %v1525_v35 = vld [vmem:[%s11266_s1 + $0x8] sm:$0xff] }
 0x192   : > { %1357 = vmatprep.mubr.bf16.mxu1 %v9353_v25  ;;  %1335 = vmatprep.subr.bf16.mxu1 %v8406_v40 }
 0x194   : > { %8175 = vmatpush3.bf16.msra.mxu0 %v9665_v6 }
 0x195   : > { %8180 = vmatprep.subr.bf16.mxu0 %v9351_v0  ;;  %1336 = vmatpush1.bf16.msra.mxu1 %v8404_v41 }
 0x196   : > { %1337 = vmatprep.subr.bf16.mxu1 %v8409_v42 }
 0x197   : > { %8177 = vmatmul.mubr.msk.bf16.vlgmr.msra.gmra.mxu0 %vm931_vm1, %v8399_v38 }
 0x198   : > { %8181 = vmatpush3.bf16.msra.mxu0 %v9661_v4  ;;  %8184 = vmatprep.mubr.msk.bf16.mxu0 %vm9352_vm0, %v9351_v0 }
 0x199   : > { %8182 = vmatprep.subr.bf16.mxu0 %v9351_v0  ;;  %1338 = vmatpush1.bf16.msra.mxu1 %v8407_v44 }
 0x19a   : > { %1339 = vmatprep.subr.bf16.mxu1 %v8415_v46 }
 0x19c   : > { %8183 = vmatpush3.bf16.msra.mxu0 %v9665_v6  ;;  %v1539_v6 = vld [vmem:[%s11266_s1 + $0x78] sm:$0xff] }
 0x19d   : > { %1485 = vmatprep.subr.bf16.mxu0 %v8412_v43  ;;  %1340 = vmatpush1.bf16.msra.mxu1 %v8413_v48 }
 0x19e   : > { %7850 = vmatprep.subr.mxu1 %v1555_v5 }
 0x19f   : > { %8185 = vmatmul.mubr.msk.bf16.vlgmr.msra.gmra.mxu0 %vm931_vm1, %v8400_v39 }
 0x1a0   : > { %1509 = vmatprep.mubr.bf16.mxu0 %v9353_v25  ;;  %1486 = vmatpush1.bf16.msra.mxu0 %v8410_v45 }
 0x1a1   : > { %1487 = vmatprep.subr.bf16.mxu0 %v8418_v47 }
 0x1a4   : > { %1488 = vmatpush1.bf16.msra.mxu0 %v8416_v49 }
 0x1a5   : > { %1489 = vmatprep.subr.bf16.mxu0 %v8421_v50 }
 0x1a8   : > { %1490 = vmatpush1.bf16.msra.mxu0 %v8419_v51 }
 0x1a9   : > { %1491 = vmatprep.subr.bf16.mxu0 %v8424_v52 }
 0x1ac   : > { %1492 = vmatpush1.bf16.msra.mxu0 %v8422_v53 }
 0x1ad   : > { %7885 = vmatprep.subr.mxu0 %v1555_v5 }
 0x24f   : > { %v9789_v54 = vpop.f32.mrf.mxu0  ;;  %v1211_v38 = vpop.f32.mrf.mxu1 }
 0x250   : > { %v1212_v45 = vadd.f32 %v1211_v38, %v9789_v54 }
 0x251   : > { %v9791_v55 = vpop.f32.mrf.mxu0  ;;  %v1213_v39 = vpop.f32.mrf.mxu1 }
 0x252   : > { %v1214_v46 = vadd.f32 %v1213_v39, %v9791_v55 }
 0x253   : > { %v9793_v56 = vpop.f32.mrf.mxu0  ;;  %v1215_v40 = vpop.f32.mrf.mxu1 }
 0x254   : > { %v1216_v48 = vadd.f32 %v1215_v40, %v9793_v56 }
 0x255   : > { %v9795_v57 = vpop.f32.mrf.mxu0  ;;  %v1217_v41 = vpop.f32.mrf.mxu1 }
 0x256   : > { %v1218_v53 = vadd.f32 %v1217_v41, %v9795_v57 }
 0x257   : > { %v1265_v58 = vpop.f32.mrf.mxu0 }
 0x259   : > { %v8178_v59 = vpop.f32.mrf.mxu0 }
 0x25b   : > { %v1268_v60 = vpop.f32.mrf.mxu0 }
 0x25c   : > { %v1272_v61 = vpack.c.bf16 %v1268_v60, %v1265_v58 }
 0x25d   : > { %v8179_v62 = vpop.f32.mrf.mxu0 }
 0x25e   : > { %7305 = vmatmul.mubr.msk.bf16.vlgmr.msra.gmra.mxu1 %vm1087_vm2, %v1272_v61 }
 0x25f   : > { %v1417_v63 = vpop.f32.mrf.mxu0  ;;  %7851 = vmatpush3.msra.mxu1 %v1539_v6 }
 0x260   : > { %7852 = vmatprep.subr.mxu1 %v1554_v7 }
 0x261   : > { %v8186_v1 = vpop.f32.mrf.mxu0  ;;  %7853 = vmatpush3.msra.mxu1 %v1538_v8 }
 0x262   : > { %7854 = vmatprep.subr.mxu1 %v1553_v9 }
 0x263   : > { %v1420_v2 = vpop.f32.mrf.mxu0  ;;  %7855 = vmatpush3.msra.mxu1 %v1537_v10 }
 0x264   : > { %v1424_v3 = vpack.c.bf16 %v1420_v2, %v1417_v63  ;;  %7856 = vmatprep.subr.mxu1 %v1552_v11 }
 0x265   : > { %v8187_v4 = vpop.f32.mrf.mxu0  ;;  %7857 = vmatpush3.msra.mxu1 %v1536_v12 }
 0x266   : > { %7324 = vmatmul.mubr.msk.bf16.vlgmr.msra.gmra.mxu0 %vm1087_vm2, %v1424_v3  ;;  %7858 = vmatprep.subr.mxu1 %v1551_v13 }
 0x267   : > { %7886 = vmatpush3.msra.mxu0 %v1539_v6  ;;  %7859 = vmatpush3.msra.mxu1 %v1535_v14 }
 0x268   : > { %7887 = vmatprep.subr.mxu0 %v1554_v7  ;;  %7860 = vmatprep.subr.mxu1 %v1550_v15 }
 0x269   : > { %7888 = vmatpush3.msra.mxu0 %v1538_v8  ;;  %7861 = vmatpush3.msra.mxu1 %v1534_v16 }
 0x26a   : > { %7889 = vmatprep.subr.mxu0 %v1553_v9  ;;  %7862 = vmatprep.subr.mxu1 %v1549_v17 }
 0x26b   : > { %7890 = vmatpush3.msra.mxu0 %v1537_v10  ;;  %7863 = vmatpush3.msra.mxu1 %v1533_v18 }
 0x26c   : > { %7891 = vmatprep.subr.mxu0 %v1552_v11  ;;  %7864 = vmatprep.subr.mxu1 %v1548_v19 }
 0x26d   : > { %7892 = vmatpush3.msra.mxu0 %v1536_v12  ;;  %7865 = vmatpush3.msra.mxu1 %v1532_v20 }
 0x26e   : > { %7893 = vmatprep.subr.mxu0 %v1551_v13  ;;  %7866 = vmatprep.subr.mxu1 %v1547_v21 }
 0x26f   : > { %7894 = vmatpush3.msra.mxu0 %v1535_v14  ;;  %7867 = vmatpush3.msra.mxu1 %v1531_v22 }
 0x270   : > { %7895 = vmatprep.subr.mxu0 %v1550_v15  ;;  %7868 = vmatprep.subr.mxu1 %v1546_v23 }
 0x271   : > { %7896 = vmatpush3.msra.mxu0 %v1534_v16  ;;  %7869 = vmatpush3.msra.mxu1 %v1530_v24 }
 0x272   : > { %7897 = vmatprep.subr.mxu0 %v1549_v17  ;;  %7870 = vmatprep.subr.mxu1 %v1545_v26 }
 0x273   : > { %7898 = vmatpush3.msra.mxu0 %v1533_v18  ;;  %7871 = vmatpush3.msra.mxu1 %v1529_v27 }
 0x274   : > { %7899 = vmatprep.subr.mxu0 %v1548_v19  ;;  %7872 = vmatprep.subr.mxu1 %v1544_v28 }
 0x275   : > { %7900 = vmatpush3.msra.mxu0 %v1532_v20  ;;  %7873 = vmatpush3.msra.mxu1 %v1528_v29 }
 0x276   : > { %7901 = vmatprep.subr.mxu0 %v1547_v21  ;;  %7874 = vmatprep.subr.mxu1 %v1543_v30 }
 0x277   : > { %7902 = vmatpush3.msra.mxu0 %v1531_v22  ;;  %7875 = vmatpush3.msra.mxu1 %v1527_v31 }
 0x278   : > { %7903 = vmatprep.subr.mxu0 %v1546_v23  ;;  %7876 = vmatprep.subr.mxu1 %v1542_v32 }
 0x279   : > { %7904 = vmatpush3.msra.mxu0 %v1530_v24  ;;  %7877 = vmatpush3.msra.mxu1 %v1526_v33 }
 0x27a   : > { %7905 = vmatprep.subr.mxu0 %v1545_v26  ;;  %7878 = vmatprep.subr.mxu1 %v1541_v34 }
 0x27b   : > { %7906 = vmatpush3.msra.mxu0 %v1529_v27  ;;  %7879 = vmatpush3.msra.mxu1 %v1525_v35 }
 0x27c   : > { %7907 = vmatprep.subr.mxu0 %v1544_v28  ;;  %7880 = vmatprep.subr.mxu1 %v1540_v36 }
 0x27d   : > { %7908 = vmatpush3.msra.mxu0 %v1528_v29  ;;  %7881 = vmatpush3.msra.mxu1 %v1524_v37 }
 0x27e   : > { %7909 = vmatprep.subr.mxu0 %v1543_v30 }
 0x27f   : > { %7910 = vmatpush3.msra.mxu0 %v1527_v31 }
 0x280   : > { %7911 = vmatprep.subr.mxu0 %v1542_v32  ;;  %v1559_v32 = vld [vmem:[#allocation4 + $0x18] sm:$0xff] }
 0x281   : > { %7912 = vmatpush3.msra.mxu0 %v1526_v33  ;;  %v1558_v33 = vld [vmem:[#allocation4 + $0x10] sm:$0xff]  ;;  %1776 = vmatprep.subr.mxu1 %v1559_v32 }
 0x282   : > { %7913 = vmatprep.subr.mxu0 %v1541_v34  ;;  %v1557_v34 = vld [vmem:[#allocation4 + $0x8] sm:$0xff] }
 0x283   : > { %7914 = vmatpush3.msra.mxu0 %v1525_v35  ;;  %v1556_v35 = vld [vmem:[#allocation4] sm:$0xff] }
 0x284   : > { %7915 = vmatprep.subr.mxu0 %v1540_v36 }
 0x285   : > { %7916 = vmatpush3.msra.mxu0 %v1524_v37 }
 0x31e   : > { %v1359_v42 = vpop.f32.mrf.mxu1 }
 0x31f   : > { %v1368_v49 = vadd.f32 %v1359_v42, %v1212_v45 }
 0x320   : > { %v1361_v43 = vpop.f32.mrf.mxu1 }
 0x321   : > { %v1369_v50 = vadd.f32 %v1361_v43, %v1214_v46 }
 0x322   : > { %v1363_v44 = vpop.f32.mrf.mxu1 }
 0x323   : > { %v1370_v58 = vadd.f32 %v1363_v44, %v1216_v48 }
 0x324   : > { %v1365_v51 = vpop.f32.mrf.mxu1 }
 0x325   : > { %v1371_v62 = vadd.f32 %v1365_v51, %v1218_v53  ;;  %v1740_v53 = vld [vmem:[%s11267_s7 + $0x2] sm:$0x1] }
 0x326   : > { %v1511_v47 = vpop.f32.mrf.mxu0 }
 0x327   : > { %v9899_v59 = vadd.f32 %v1511_v47, %v1368_v49  ;;  %v1738_v47 = vld [vmem:[%s11267_s7] sm:$0x1] }
 0x328   : > { %v1513_v52 = vpop.f32.mrf.mxu0 }
 0x329   : > { %v9901_v60 = vadd.f32 %v1513_v52, %v1369_v50  ;;  %v1644_v55 = vmul.f32 %v9899_v59, %v9899_v59  ;;  %v1739_v50 = vld [vmem:[%s11267_s7 + $0x1] sm:$0x1] }
 0x32a   : > { %v1515_v61 = vpop.f32.mrf.mxu0 }
 0x32b   : > { %v9903_v63 = vadd.f32 %v1515_v61, %v1370_v58  ;;  %v1645_v2 = vmul.f32 %v9901_v60, %v9901_v60  ;;  %v1967_v58 = vlaneseq }
 0x32c   : > { %v1517_v54 = vpop.f32.mrf.mxu0 }
 0x32d   : > { %v1560_v56 = vadd.f32 %v9903_v63, %v9899_v59  ;;  %v1646_v1 = vmul.f32 %v9903_v63, %v9903_v63  ;;  %v9911_v57 = vadd.f32 %v1517_v54, %v1371_v62  ;;  %v1968_v61 = vshrl.u32 %v1967_v58, 7  ;;  %v8491_v58 = vld [vmem:[%s11268_s28 + $0x10] ss:$8 sps:$4 sm:$0xff]  }
 0x32f   : > { %v1561_v3 = vrot.slane %v1560_v56, 4  ;;  %v1648_v4 = vadd.f32 %v1646_v1, %v1644_v55  ;;  %v1567_v5 = vadd.f32 %v9911_v57, %v9901_v60  ;;  %v1647_v6 = vmul.f32 %v9911_v57, %v9911_v57 }
 0x330   : > { %v9936_v62 = vsub.s32 0, %v1968_v61  ;;  %v8448_v61 = vld [vmem:[%s11268_s28 + $0x104] ss:$8 sps:$4 sm:$0xff]  }
 0x331   : > { %v1562_v7 = vadd.f32 %v1561_v3, %v1560_v56  ;;  %v1649_v8 = vrot.slane %v1648_v4, 4  ;;  %v1568_v9 = vrot.slane %v1567_v5, 4  ;;  %v1655_v10 = vadd.f32 %v1647_v6, %v1645_v2 }
 0x333   : > { %v1563_v11 = vrot.slane %v1562_v7, 2  ;;  %v1650_v12 = vadd.f32 %v1649_v8, %v1648_v4  ;;  %v1569_v13 = vadd.f32 %v1568_v9, %v1567_v5  ;;  %v1656_v14 = vrot.slane %v1655_v10, 4 }
 0x335   : > { %v1564_v15 = vadd.f32 %v1563_v11, %v1562_v7  ;;  %v1651_v16 = vrot.slane %v1650_v12, 2  ;;  %v1570_v17 = vrot.slane %v1569_v13, 2  ;;  %v1657_v18 = vadd.f32 %v1656_v14, %v1655_v10 }
 0x337   : > { %v1571_v19 = vadd.f32 %v1570_v17, %v1569_v13  ;;  %v1658_v20 = vrot.slane %v1657_v18, 2  ;;  %v1652_v21 = vadd.f32 %v1651_v16, %v1650_v12  ;;  %v1565_v22 = vrot.slane %v1564_v15, 1 }
 0x339   : > { %v1572_v23 = vrot.slane %v1571_v19, 1  ;;  %v1659_v24 = vadd.f32 %v1658_v20, %v1657_v18  ;;  %v1653_v26 = vrot.slane %v1652_v21, 1  ;;  %v1566_v29 = vadd.f32 %v1565_v22, %v1564_v15 }
 0x33b   : > { %v1573_v27 = vadd.f32 %v1572_v23, %v1571_v19  ;;  %v1660_v28 = vrot.slane %v1659_v24, 1  ;;  %v1654_v31 = vadd.f32 %v1653_v26, %v1652_v21  ;;  %v8427_v23 = vld [vmem:[%s11268_s28 + $0x174] ss:$8 sps:$4 sm:$0xff]  }
 0x33d   : > { %1638 = vmatprep.mubr.f32.mxu1 %v1573_v27  ;;  %v1661_v30 = vadd.f32 %v1660_v28, %v1659_v24  ;;  %v8475_v24 = vld [vmem:[%s11268_s28 + $0x74] ss:$8 sps:$4 sm:$0xff]   ;;  %v2013_v27 = vld [vmem:[#allocation6] sm:$0xf]  ;;  %v2093_v28 = vld [vmem:[#allocation6 + $0x4] sm:$0xf] }
 0x33e   : > { %1639 = vmatmul.mubr.f32.vlgmr.msra.gmra.mxu1 %v1566_v29  ;;  %v8425_v29 = vld [vmem:[%s11268_s28 + $0x170] ss:$8 sps:$4 sm:$0xff]  }
 0x33f   : > { %1726 = vmatprep.mubr.f32.mxu0 %v1661_v30  ;;  %1812 = vmatprep.mubr.f32.mxu1 %v9351_v0  ;;  %v8473_v30 = vld [vmem:[%s11268_s28 + $0x70] ss:$8 sps:$4 sm:$0xff]  }
 0x340   : > { %1727 = vmatmul.mubr.f32.vlgmr.msra.gmra.mxu0 %v1654_v31  ;;  %1777 = vmatpush1.msra.mxu1 %v1558_v33  ;;  %v8430_v31 = vld [vmem:[%s11268_s28 + $0x164] ss:$8 sps:$4 sm:$0xff]  }
 0x341   : > { %2129 = vmatprep.mubr.bf16.mxu0 %v9353_v25  ;;  %1778 = vmatprep.subr.mxu1 %v1557_v34 }
 0x342   : > { %1779 = vmatpush1.msra.mxu1 %v1556_v35 }
 0x343   : > { %1850 = vmatprep.subr.mxu1 %v1559_v32 }
 0x3fe   : > { %v7882_v36 = vpop.f32.mrf.mxu1 }
 0x400   : > { %v7883_v37 = vpop.f32.mrf.mxu1  ;;  %v7917_v38 = vpop.f32.mrf.mxu0 }
 0x401   : > { %v7884_v39 = vadd.f32 %v7883_v37, %v7882_v36  ;;  %v8481_v36 = vld [vmem:[%s11268_s28 + $0x54] ss:$8 sps:$4 sm:$0xff]   ;;  %v8431_v37 = vld [vmem:[%s11268_s28 + $0x150] ss:$8 sps:$4 sm:$0xff]  }
 0x402   : > { %v7918_v40 = vpop.f32.mrf.mxu0 }
 0x403   : > { %v1732_v41 = vmul.f32 0.00390625, %v7884_v39  ;;  %v7919_v42 = vadd.f32 %v7918_v40, %v7917_v38  ;;  %v8479_v38 = vld [vmem:[%s11268_s28 + $0x50] ss:$8 sps:$4 sm:$0xff]   ;;  %v8436_v39 = vld [vmem:[%s11268_s28 + $0x144] ss:$8 sps:$4 sm:$0xff]  }
 0x404   : > { %v8484_v40 = vld [vmem:[%s11268_s28 + $0x44] ss:$8 sps:$4 sm:$0xff]  }
 0x405   : > { %v1734_v43 = vmul.f32 %v1732_v41, %v1732_v41  ;;  %v1733_v44 = vmul.f32 0.00390625, %v7919_v42  ;;  %v8482_v42 = vld [vmem:[%s11268_s28 + $0x40] ss:$8 sps:$4 sm:$0xff]  }
 0x407   : > { %v1735_v45 = vsub.f32 %v1733_v44, %v1734_v43  ;;  %v8439_v43 = vld [vmem:[%s11268_s28 + $0x134] ss:$8 sps:$4 sm:$0xff]  }
 0x408   : > { %v8487_v44 = vld [vmem:[%s11268_s28 + $0x34] ss:$8 sps:$4 sm:$0xff]  }
 0x409   : > { %v1736_v46 = vadd.f32 1e-05, %v1735_v45  ;;  %v8437_v45 = vld [vmem:[%s11268_s28 + $0x130] ss:$8 sps:$4 sm:$0xff]  }
 0x40b   : > { %9001 = vrsqrt.f32 %v1736_v46  ;;  %v8485_v46 = vld [vmem:[%s11268_s28 + $0x30] ss:$8 sps:$4 sm:$0xff]  }
 0x418   : > { %v9002_v48 = vpop.eup %9001 }
 0x419   : > { %v1741_v49 = vmul.f32 %v9002_v48, %v1738_v47  ;;  %v8442_v47 = vld [vmem:[%s11268_s28 + $0x124] ss:$8 sps:$4 sm:$0xff]  }
 0x41a   : > { %v8490_v48 = vld [vmem:[%s11268_s28 + $0x24] ss:$8 sps:$4 sm:$0xff]  }
 0x41b   : > { %7325 = vmatmul.mubr.msk.f32.vlgmr.msra.gmra.mxu1 %vm1744_vm3, %v1741_v49  ;;  %v1742_v51 = vmul.f32 %v1741_v49, %v1732_v41  ;;  %v8434_v41 = vld [vmem:[%s11268_s28 + $0x140] ss:$8 sps:$4 sm:$0xff]  }
 0x41c   : > { %1851 = vmatpush1.msra.mxu1 %v1558_v33  ;;  %1886 = vmatprep.mubr.f32.mxu1 %v9351_v0  ;;  %v8440_v49 = vld [vmem:[%s11268_s28 + $0x120] ss:$8 sps:$4 sm:$0xff]  }
 0x41d   : > { %1852 = vmatprep.subr.mxu1 %v1557_v34  ;;  %v1743_v52 = vsub.f32 %v1739_v50, %v1742_v51  ;;  %v8488_v50 = vld [vmem:[%s11268_s28 + $0x20] ss:$8 sps:$4 sm:$0xff]   ;;  %v8445_v51 = vld [vmem:[%s11268_s28 + $0x114] ss:$8 sps:$4 sm:$0xff]  }
 0x41e   : > { %1853 = vmatpush1.msra.mxu1 %v1556_v35 }
 0x41f   : > { %7326 = vmatmul.mubr.msk.f32.vlgmr.msra.gmra.mxu1 %vm1744_vm3, %v1743_v52  ;;  %1924 = vmatprep.subr.mxu1 %v1559_v32  ;;  %v8478_v32 = vld [vmem:[%s11268_s28 + $0x64] ss:$8 sps:$4 sm:$0xff]   ;;  %v8493_v52 = vld [vmem:[%s11268_s28 + $0x14] ss:$8 sps:$4 sm:$0xff]  }
 0x420   : > { %1925 = vmatpush1.msra.mxu1 %v1558_v33  ;;  %1960 = vmatprep.mubr.f32.mxu1 %v9351_v0  ;;  %v8428_v33 = vld [vmem:[%s11268_s28 + $0x160] ss:$8 sps:$4 sm:$0xff]  }
 0x421   : > { %1926 = vmatprep.subr.mxu1 %v1557_v34  ;;  %v8476_v34 = vld [vmem:[%s11268_s28 + $0x60] ss:$8 sps:$4 sm:$0xff]  }
 0x422   : > { %1927 = vmatpush1.msra.mxu1 %v1556_v35  ;;  %v8433_v35 = vld [vmem:[%s11268_s28 + $0x154] ss:$8 sps:$4 sm:$0xff]  }
 0x423   : > { %7327 = vmatmul.mubr.msk.f32.vlgmr.msra.gmra.mxu1 %vm1744_vm3, %v1740_v53  ;;  %v8443_v53 = vld [vmem:[%s11268_s28 + $0x110] ss:$8 sps:$4 sm:$0xff]  }
 0x424   : > { %2049 = vmatprep.mubr.bf16.mxu1 %v9353_v25 }
 0x4db   : > { %v1814_v54 = vpop.f32.mrf.mxu1 }
 0x4dc   : > { %v1970_v56 = vrot.slane %v1814_v54, %v9936_v62  ;;  %v8496_v54 = vld [vmem:[%s11268_s28 + $0x4] ss:$8 sps:$4 sm:$0xff]  }
 0x4dd   : > { %v1816_v55 = vpop.f32.mrf.mxu1 }
 0x4de   : > { %v1974_v1 = vrot.slane %v1816_v55, %v9936_v62  ;;  %v1975_v5 = vmul.f32 %v1970_v56, %v9899_v59  ;;  %v1977_v6 = vmul.f32 %v1970_v56, %v9903_v63  ;;  %v8446_v55 = vld [vmem:[%s11268_s28 + $0x100] ss:$8 sps:$4 sm:$0xff]  }
 0x4df   : > { %v1888_v2 = vpop.f32.mrf.mxu1  ;;  %v8494_v56 = vld [vmem:[%s11268_s28] ss:$8 sps:$4 sm:$0xff]  }
 0x4e0   : > { %v1982_v3 = vrot.slane %v1888_v2, %v9936_v62  ;;  %v1976_v8 = vmul.f32 %v1974_v1, %v9901_v60  ;;  %v1978_v9 = vmul.f32 %v1974_v1, %v9911_v57  ;;  %v8451_v1 = vld [vmem:[%s11268_s28 + $0x1f4] ss:$8 sps:$4 sm:$0xff]  }
 0x4e1   : > { %v1890_v4 = vpop.f32.mrf.mxu1  ;;  %v8499_v2 = vld [vmem:[%s11268_s28 + $0xf4] ss:$8 sps:$4 sm:$0xff]  }
 0x4e2   : > { %v1986_v7 = vrot.slane %v1890_v4, %v9936_v62  ;;  %v1987_v11 = vadd.f32 %v1982_v3, %v1975_v5  ;;  %v1989_v12 = vadd.f32 %v1982_v3, %v1977_v6  ;;  %v8449_v3 = vld [vmem:[%s11268_s28 + $0x1f0] ss:$8 sps:$4 sm:$0xff]   ;;  %v8454_v5 = vld [vmem:[%s11268_s28 + $0x1e4] ss:$8 sps:$4 sm:$0xff]  }
 0x4e3   : > { %v1962_v10 = vpop.f32.mrf.mxu1  ;;  %v8497_v4 = vld [vmem:[%s11268_s28 + $0xf0] ss:$8 sps:$4 sm:$0xff]   ;;  %v8502_v6 = vld [vmem:[%s11268_s28 + $0xe4] ss:$8 sps:$4 sm:$0xff]  }
 0x4e4   : > { %v1988_v13 = vadd.f32 %v1986_v7, %v1976_v8  ;;  %v1990_v14 = vadd.f32 %v1986_v7, %v1978_v9  ;;  %v1998_v15 = vrot.slane %v1962_v10, %v9936_v62  ;;  %vm1991_vm4 = vcmp.ge.f32.partialorder %v1987_v11, 0.0  ;;  %v8452_v7 = vld [vmem:[%s11268_s28 + $0x1e0] ss:$8 sps:$4 sm:$0xff]   ;;  %v8457_v9 = vld [vmem:[%s11268_s28 + $0x1d4] ss:$8 sps:$4 sm:$0xff]  }
 0x4e5   : > { %v1964_v16 = vpop.f32.mrf.mxu1  ;;  %vm1993_vm5 = vcmp.ge.f32.partialorder %v1989_v12, 0.0  ;;  %v8500_v8 = vld [vmem:[%s11268_s28 + $0xe0] ss:$8 sps:$4 sm:$0xff]   ;;  %v8505_v10 = vld [vmem:[%s11268_s28 + $0xd4] ss:$8 sps:$4 sm:$0xff]  }
 0x4e6   : > { %v2002_v17 = vrot.slane %v1964_v16, %v9936_v62  ;;  %v2003_v18 = vmul.f32 %v1998_v15, %v1987_v11  ;;  %v2005_v59 = vmul.f32 %v1998_v15, %v1989_v12  ;;  %vm1992_vm6 = vcmp.ge.f32.partialorder %v1988_v13, 0.0  ;;  %v8458_v15 = vld [vmem:[%s11268_s28 + $0x1c0] ss:$8 sps:$4 sm:$0xff]  }
 0x4e7   : > { %vm1994_vm7 = vcmp.ge.f32.partialorder %v1990_v14, 0.0  ;;  %v8506_v16 = vld [vmem:[%s11268_s28 + $0xc0] ss:$8 sps:$4 sm:$0xff]  }
 0x4e8   : > { %v2004_v63 = vmul.f32 %v2002_v17, %v1988_v13  ;;  %v2006_v19 = vmul.f32 %v2002_v17, %v1990_v14  ;;  %v2007_v60 = vsel %vm1991_vm4, %v1987_v11, %v2003_v18  ;;  %v2009_v57 = vsel %vm1993_vm5, %v1989_v12, %v2005_v59  ;;  %v8455_v11 = vld [vmem:[%s11268_s28 + $0x1d0] ss:$8 sps:$4 sm:$0xff]   ;;  %v8463_v17 = vld [vmem:[%s11268_s28 + $0x1b4] ss:$8 sps:$4 sm:$0xff]  }
 0x4e9   : > { %v9956_v26 = vpack.c.bf16 %v2009_v57, %v2007_v60  ;;  %v8503_v12 = vld [vmem:[%s11268_s28 + $0xd0] ss:$8 sps:$4 sm:$0xff]   ;;  %v8511_v18 = vld [vmem:[%s11268_s28 + $0xb4] ss:$8 sps:$4 sm:$0xff]   ;;  %v8514_v60 = vld [vmem:[%s11268_s28 + $0xa4] ss:$8 sps:$4 sm:$0xff]  }
 0x4ea   : > { %v2008_v20 = vsel %vm1992_vm6, %v1988_v13, %v2004_v63  ;;  %v2010_v21 = vsel %vm1994_vm7, %v1990_v14, %v2006_v19  ;;  %v8460_v13 = vld [vmem:[%s11268_s28 + $0x1c4] ss:$8 sps:$4 sm:$0xff]   ;;  %v8461_v59 = vld [vmem:[%s11268_s28 + $0x1b0] ss:$8 sps:$4 sm:$0xff]   ;;  %v8464_v57 = vld [vmem:[%s11268_s28 + $0x1a0] ss:$8 sps:$4 sm:$0xff]  }
 0x4eb   : > { %v9948_v22 = vpack.c.bf16 %v2010_v21, %v2008_v20  ;;  %v8508_v14 = vld [vmem:[%s11268_s28 + $0xc4] ss:$8 sps:$4 sm:$0xff]   ;;  %v8509_v63 = vld [vmem:[%s11268_s28 + $0xb0] ss:$8 sps:$4 sm:$0xff]   ;;  %v8512_v20 = vld [vmem:[%s11268_s28 + $0xa0] ss:$8 sps:$4 sm:$0xff]  }
 0x4ec   : > { %v8466_v19 = vld [vmem:[%s11268_s28 + $0x1a4] ss:$8 sps:$4 sm:$0xff]   ;;  %v8469_v21 = vld [vmem:[%s11268_s28 + $0x194] ss:$8 sps:$4 sm:$0xff]  }
 0x4ed   : > { %2031 = vmatprep.subr.bf16.mxu1 %v9948_v22  ;;  %2111 = vmatprep.subr.bf16.mxu0 %v9948_v22 }
 0x4ee   : > { %2032 = vmatpush1.bf16.msra.mxu1 %v9956_v26  ;;  %2112 = vmatpush1.bf16.msra.mxu0 %v9956_v26 }
 0x4ef   : > { %2333 = vmatprep.subr.bf16.mxu1 %v8427_v23  ;;  %2534 = vmatprep.subr.bf16.mxu0 %v8475_v24  ;;  %v8517_v23 = vld [vmem:[%s11268_s28 + $0x94] ss:$8 sps:$4 sm:$0xff]   ;;  %v8467_v24 = vld [vmem:[%s11268_s28 + $0x190] ss:$8 sps:$4 sm:$0xff]  }
 0x4f1   : > { %7328 = vmatmul.mubr.msk.bf16.vlgmr.msra.gmra.mxu1 %vm1744_vm3, %v2013_v27  ;;  %7329 = vmatmul.mubr.msk.bf16.vlgmr.msra.gmra.mxu0 %vm1744_vm3, %v2093_v28  ;;  %v8515_v27 = vld [vmem:[%s11268_s28 + $0x90] ss:$8 sps:$4 sm:$0xff]   ;;  %v8472_v28 = vld [vmem:[%s11268_s28 + $0x184] ss:$8 sps:$4 sm:$0xff]  }
 0x4f2   : > { %2334 = vmatpush1.bf16.msra.mxu1 %v8425_v29  ;;  %2535 = vmatpush1.bf16.msra.mxu0 %v8473_v30  ;;  %v8470_v29 = vld [vmem:[%s11268_s28 + $0x180] ss:$8 sps:$4 sm:$0xff]   ;;  %v8520_v30 = vld [vmem:[%s11268_s28 + $0x84] ss:$8 sps:$4 sm:$0xff]  }
 0x4f3   : > { %2335 = vmatprep.subr.bf16.mxu1 %v8430_v31  ;;  %2536 = vmatprep.subr.bf16.mxu0 %v8478_v32  ;;  %v8518_v31 = vld [vmem:[%s11268_s28 + $0x80] ss:$8 sps:$4 sm:$0xff]   ;;  %v8523_v32 = vld [vmem:[%s11268_s28 + $0x274] ss:$8 sps:$4 sm:$0xff]  }
 0x4f6   : > { %2336 = vmatpush1.bf16.msra.mxu1 %v8428_v33  ;;  %2537 = vmatpush1.bf16.msra.mxu0 %v8476_v34 }
 0x4f7   : > { %2337 = vmatprep.subr.bf16.mxu1 %v8433_v35  ;;  %2538 = vmatprep.subr.bf16.mxu0 %v8481_v36 }
 0x4fa   : > { %2338 = vmatpush1.bf16.msra.mxu1 %v8431_v37  ;;  %2539 = vmatpush1.bf16.msra.mxu0 %v8479_v38 }
 0x4fb   : > { %2339 = vmatprep.subr.bf16.mxu1 %v8436_v39  ;;  %2540 = vmatprep.subr.bf16.mxu0 %v8484_v40 }
 0x4fe   : > { %2340 = vmatpush1.bf16.msra.mxu1 %v8434_v41  ;;  %2541 = vmatpush1.bf16.msra.mxu0 %v8482_v42 }
 0x4ff   : > { %2341 = vmatprep.subr.bf16.mxu1 %v8439_v43  ;;  %2542 = vmatprep.subr.bf16.mxu0 %v8487_v44  ;;  %v8521_v43 = vld [vmem:[%s11268_s28 + $0x270] ss:$8 sps:$4 sm:$0xff]   ;;  %v8526_v44 = vld [vmem:[%s11268_s28 + $0x264] ss:$8 sps:$4 sm:$0xff]  }
 0x502   : > { %2342 = vmatpush1.bf16.msra.mxu1 %v8437_v45  ;;  %2543 = vmatpush1.bf16.msra.mxu0 %v8485_v46 }
 0x503   : > { %2343 = vmatprep.subr.bf16.mxu1 %v8442_v47  ;;  %2544 = vmatprep.subr.bf16.mxu0 %v8490_v48  ;;  %v8524_v47 = vld [vmem:[%s11268_s28 + $0x260] ss:$8 sps:$4 sm:$0xff]   ;;  %v8529_v48 = vld [vmem:[%s11268_s28 + $0x254] ss:$8 sps:$4 sm:$0xff]  }
 0x506   : > { %2344 = vmatpush1.bf16.msra.mxu1 %v8440_v49  ;;  %2545 = vmatpush1.bf16.msra.mxu0 %v8488_v50  ;;  %v2576_v49 = vld [vmem:[#allocation6 + $0x8] sm:$0xf]  ;;  %v8527_v50 = vld [vmem:[%s11268_s28 + $0x250] ss:$8 sps:$4 sm:$0xff]  }
 0x507   : > { %2345 = vmatprep.subr.bf16.mxu1 %v8445_v51  ;;  %2546 = vmatprep.subr.bf16.mxu0 %v8493_v52  ;;  %v8535_v51 = vld [vmem:[%s11268_s28 + $0x244] ss:$8 sps:$4 sm:$0xff]   ;;  %v8533_v52 = vld [vmem:[%s11268_s28 + $0x240] ss:$8 sps:$4 sm:$0xff]  }
 0x50a   : > { %2346 = vmatpush1.bf16.msra.mxu1 %v8443_v53  ;;  %2547 = vmatpush1.bf16.msra.mxu0 %v8491_v58  ;;  %v8541_v53 = vld [vmem:[%s11268_s28 + $0x234] ss:$8 sps:$4 sm:$0xff]   ;;  %v2860_v58 = vld [vmem:[#allocation6 + $0xc] sm:$0xf] }
 0x50b   : > { %2347 = vmatprep.subr.bf16.mxu1 %v8448_v61  ;;  %2548 = vmatprep.subr.bf16.mxu0 %v8496_v54  ;;  %v8530_v61 = vld [vmem:[%s11268_s28 + $0x370] ss:$8 sps:$4 sm:$0xff]  }
 0x50c   : > { %v8539_v54 = vld [vmem:[%s11268_s28 + $0x230] ss:$8 sps:$4 sm:$0xff]  }
 0x50e   : > { %2348 = vmatpush1.bf16.msra.mxu1 %v8446_v55  ;;  %2549 = vmatpush1.bf16.msra.mxu0 %v8494_v56  ;;  %v8547_v55 = vld [vmem:[%s11268_s28 + $0x224] ss:$8 sps:$4 sm:$0xff]   ;;  %v8536_v56 = vld [vmem:[%s11268_s28 + $0x360] ss:$8 sps:$4 sm:$0xff]  }
 0x50f   : > { %2349 = vmatprep.subr.bf16.mxu1 %v8451_v1  ;;  %2550 = vmatprep.subr.bf16.mxu0 %v8499_v2  ;;  %v8544_v1 = vld [vmem:[%s11268_s28 + $0x354] ss:$8 sps:$4 sm:$0xff]   ;;  %v8545_v2 = vld [vmem:[%s11268_s28 + $0x220] ss:$8 sps:$4 sm:$0xff]  }
 0x512   : > { %2350 = vmatpush2.bf16.msra.mxu1 %v8449_v3  ;;  %2551 = vmatpush2.bf16.msra.mxu0 %v8497_v4  ;;  %v8553_v3 = vld [vmem:[%s11268_s28 + $0x214] ss:$8 sps:$4 sm:$0xff]   ;;  %v8542_v4 = vld [vmem:[%s11268_s28 + $0x350] ss:$8 sps:$4 sm:$0xff]  }
 0x513   : > { %2351 = vmatprep.subr.bf16.mxu1 %v8454_v5  ;;  %2552 = vmatprep.subr.bf16.mxu0 %v8502_v6  ;;  %v8550_v5 = vld [vmem:[%s11268_s28 + $0x344] ss:$8 sps:$4 sm:$0xff]   ;;  %v8551_v6 = vld [vmem:[%s11268_s28 + $0x210] ss:$8 sps:$4 sm:$0xff]  }
 0x516   : > { %2352 = vmatpush2.bf16.msra.mxu1 %v8452_v7  ;;  %2553 = vmatpush2.bf16.msra.mxu0 %v8500_v8  ;;  %v8559_v7 = vld [vmem:[%s11268_s28 + $0x204] ss:$8 sps:$4 sm:$0xff]   ;;  %v8548_v8 = vld [vmem:[%s11268_s28 + $0x340] ss:$8 sps:$4 sm:$0xff]  }
 0x517   : > { %2353 = vmatprep.subr.bf16.mxu1 %v8457_v9  ;;  %2554 = vmatprep.subr.bf16.mxu0 %v8505_v10  ;;  %v8556_v9 = vld [vmem:[%s11268_s28 + $0x334] ss:$8 sps:$4 sm:$0xff]   ;;  %v8557_v10 = vld [vmem:[%s11268_s28 + $0x200] ss:$8 sps:$4 sm:$0xff]  }
 0x51a   : > { %2354 = vmatpush2.bf16.msra.mxu1 %v8455_v11  ;;  %2555 = vmatpush2.bf16.msra.mxu0 %v8503_v12  ;;  %v8565_v11 = vld [vmem:[%s11268_s28 + $0x2f4] ss:$8 sps:$4 sm:$0xff]   ;;  %v8554_v12 = vld [vmem:[%s11268_s28 + $0x330] ss:$8 sps:$4 sm:$0xff]  }
 0x51b   : > { %2355 = vmatprep.subr.bf16.mxu1 %v8460_v13  ;;  %2556 = vmatprep.subr.bf16.mxu0 %v8508_v14  ;;  %v8562_v13 = vld [vmem:[%s11268_s28 + $0x324] ss:$8 sps:$4 sm:$0xff]   ;;  %v8563_v14 = vld [vmem:[%s11268_s28 + $0x2f0] ss:$8 sps:$4 sm:$0xff]  }
 0x51e   : > { %2356 = vmatpush2.bf16.msra.mxu1 %v8458_v15  ;;  %2557 = vmatpush2.bf16.msra.mxu0 %v8506_v16  ;;  %v8571_v15 = vld [vmem:[%s11268_s28 + $0x2e4] ss:$8 sps:$4 sm:$0xff]   ;;  %v8560_v16 = vld [vmem:[%s11268_s28 + $0x320] ss:$8 sps:$4 sm:$0xff]  }
 0x51f   : > { %2357 = vmatprep.subr.bf16.mxu1 %v8463_v17  ;;  %2558 = vmatprep.subr.bf16.mxu0 %v8511_v18  ;;  %v8568_v17 = vld [vmem:[%s11268_s28 + $0x314] ss:$8 sps:$4 sm:$0xff]   ;;  %v8569_v18 = vld [vmem:[%s11268_s28 + $0x2e0] ss:$8 sps:$4 sm:$0xff]  }
 0x522   : > { %2358 = vmatpush2.bf16.msra.mxu1 %v8461_v59  ;;  %2559 = vmatpush2.bf16.msra.mxu0 %v8509_v63  ;;  %v8577_v59 = vld [vmem:[%s11268_s28 + $0x2d4] ss:$8 sps:$4 sm:$0xff]   ;;  %v8566_v63 = vld [vmem:[%s11268_s28 + $0x310] ss:$8 sps:$4 sm:$0xff]  }
 0x523   : > { %2359 = vmatprep.subr.bf16.mxu1 %v8466_v19  ;;  %2560 = vmatprep.subr.bf16.mxu0 %v8514_v60  ;;  %v8574_v19 = vld [vmem:[%s11268_s28 + $0x304] ss:$8 sps:$4 sm:$0xff]   ;;  %v8575_v60 = vld [vmem:[%s11268_s28 + $0x2d0] ss:$8 sps:$4 sm:$0xff]  }
 0x526   : > { %2360 = vmatpush2.bf16.msra.mxu1 %v8464_v57  ;;  %2561 = vmatpush2.bf16.msra.mxu0 %v8512_v20  ;;  %v8583_v57 = vld [vmem:[%s11268_s28 + $0x2c4] ss:$8 sps:$4 sm:$0xff]   ;;  %v8572_v20 = vld [vmem:[%s11268_s28 + $0x300] ss:$8 sps:$4 sm:$0xff]  }
 0x527   : > { %2361 = vmatprep.subr.bf16.mxu1 %v8469_v21  ;;  %2562 = vmatprep.subr.bf16.mxu0 %v8517_v23  ;;  %v8580_v21 = vld [vmem:[%s11268_s28 + $0x3f4] ss:$8 sps:$4 sm:$0xff]   ;;  %v8581_v23 = vld [vmem:[%s11268_s28 + $0x2c0] ss:$8 sps:$4 sm:$0xff]  }
 0x52a   : > { %2362 = vmatpush2.bf16.msra.mxu1 %v8467_v24  ;;  %2563 = vmatpush2.bf16.msra.mxu0 %v8515_v27  ;;  %v8589_v24 = vld [vmem:[%s11268_s28 + $0x2b4] ss:$8 sps:$4 sm:$0xff]   ;;  %v8578_v27 = vld [vmem:[%s11268_s28 + $0x3f0] ss:$8 sps:$4 sm:$0xff]  }
 0x52b   : > { %2363 = vmatprep.subr.bf16.mxu1 %v8472_v28  ;;  %2564 = vmatprep.subr.bf16.mxu0 %v8520_v30  ;;  %v8586_v28 = vld [vmem:[%s11268_s28 + $0x3e4] ss:$8 sps:$4 sm:$0xff]   ;;  %v8584_v30 = vld [vmem:[%s11268_s28 + $0x3e0] ss:$8 sps:$4 sm:$0xff]  }
 0x52e   : > { %2364 = vmatpush2.bf16.msra.mxu1 %v8470_v29  ;;  %2565 = vmatpush2.bf16.msra.mxu0 %v8518_v31  ;;  %v8587_v29 = vld [vmem:[%s11268_s28 + $0x2b0] ss:$8 sps:$4 sm:$0xff]   ;;  %v8592_v31 = vld [vmem:[%s11268_s28 + $0x3d4] ss:$8 sps:$4 sm:$0xff]  }
 0x52f   : > { %2594 = vmatprep.subr.bf16.mxu1 %v9948_v22  ;;  %2816 = vmatprep.subr.bf16.mxu0 %v8523_v32  ;;  %v8590_v32 = vld [vmem:[%s11268_s28 + $0x3d0] ss:$8 sps:$4 sm:$0xff]  }
 0x5b1   : > { %v2051_v33 = vpop.f32.mrf.mxu1  ;;  %v2131_v34 = vpop.f32.mrf.mxu0 }
 0x5b2   : > { %v2058_v35 = vpack.c.bf16 %v2051_v33, %v2051_v33  ;;  %v2138_v40 = vpack.c.bf16 %v2131_v34, %v2131_v34  ;;  %v8595_v33 = vld [vmem:[%s11268_s28 + $0x2a4] ss:$8 sps:$4 sm:$0xff]  }
 0x5b3   : > { %v2053_v36 = vpop.f32.mrf.mxu1  ;;  %v2133_v37 = vpop.f32.mrf.mxu0  ;;  %v8598_v34 = vld [vmem:[%s11268_s28 + $0x3c4] ss:$8 sps:$4 sm:$0xff]  }
 0x5b4   : > { %v2059_v38 = vpack.c.bf16 %v2053_v36, %v2053_v36  ;;  %v2139_v39 = vpack.c.bf16 %v2133_v37, %v2133_v37  ;;  %v8596_v36 = vld [vmem:[%s11268_s28 + $0x3c0] ss:$8 sps:$4 sm:$0xff]   ;;  %v8601_v37 = vld [vmem:[%s11268_s28 + $0x294] ss:$8 sps:$4 sm:$0xff]  }
 0x5b5   : > { %v2135_v41 = vpop.f32.mrf.mxu0  ;;  %v2055_v42 = vpop.f32.mrf.mxu1 }
 0x5b6   : > { %2365 = vmatprep.mubr.bf16.mxu1 %v2139_v39  ;;  %2566 = vmatprep.mubr.bf16.mxu0 %v2059_v38  ;;  %v8604_v38 = vld [vmem:[%s11268_s28 + $0x3b4] ss:$8 sps:$4 sm:$0xff]   ;;  %v8599_v39 = vld [vmem:[%s11268_s28 + $0x290] ss:$8 sps:$4 sm:$0xff]   ;;  %v8607_v41 = vld [vmem:[%s11268_s28 + $0x284] ss:$8 sps:$4 sm:$0xff]  }
 0x5b7   : > { %v2136_v45 = vpop.f32.mrf.mxu0  ;;  %2366 = vmatmul.mubr.bf16.vlgmr.msra.gmra.mxu1 %v2138_v40  ;;  %2567 = vmatmul.mubr.bf16.vlgmr.msra.gmra.mxu0 %v2058_v35  ;;  %v2056_v46 = vpop.f32.mrf.mxu1  ;;  %v8593_v35 = vld [vmem:[%s11268_s28 + $0x2a0] ss:$8 sps:$4 sm:$0xff]   ;;  %v8602_v40 = vld [vmem:[%s11268_s28 + $0x3b0] ss:$8 sps:$4 sm:$0xff]   ;;  %v8610_v42 = vld [vmem:[%s11268_s28 + $0x3a4] ss:$8 sps:$4 sm:$0xff]  }
 0x5b8   : > { %2595 = vmatpush1.bf16.msra.mxu1 %v9956_v26  ;;  %2612 = vmatprep.mubr.bf16.mxu1 %v9353_v25  ;;  %v8613_v45 = vld [vmem:[%s11268_s28 + $0x394] ss:$8 sps:$4 sm:$0xff]   ;;  %v8611_v46 = vld [vmem:[%s11268_s28 + $0x390] ss:$8 sps:$4 sm:$0xff]  }
 0x5b9   : > { %2878 = vmatprep.subr.bf16.mxu1 %v9948_v22  ;;  %2817 = vmatpush1.bf16.msra.mxu0 %v8521_v43  ;;  %v8532_v22 = vld [vmem:[%s11268_s28 + $0x374] ss:$8 sps:$4 sm:$0xff]   ;;  %v8605_v43 = vld [vmem:[%s11268_s28 + $0x280] ss:$8 sps:$4 sm:$0xff]  }
 0x5ba   : > { %2818 = vmatprep.subr.bf16.mxu0 %v8526_v44  ;;  %v8608_v44 = vld [vmem:[%s11268_s28 + $0x3a0] ss:$8 sps:$4 sm:$0xff]  }
 0x5bd   : > { %2819 = vmatpush1.bf16.msra.mxu0 %v8524_v47  ;;  %v8616_v47 = vld [vmem:[%s11268_s28 + $0x384] ss:$8 sps:$4 sm:$0xff]  }
 0x5be   : > { %2820 = vmatprep.subr.bf16.mxu0 %v8529_v48  ;;  %v8614_v48 = vld [vmem:[%s11268_s28 + $0x380] ss:$8 sps:$4 sm:$0xff]  }
 0x5bf   : > { %7426 = vmatmul.mubr.msk.bf16.vlgmr.msra.gmra.mxu1 %vm1744_vm3, %v2576_v49  ;;  %v3174_v49 = vld [vmem:[%s11269_s11 + $0xf8] sm:$0xff] }
 0x5c0   : > { %2879 = vmatpush1.bf16.msra.mxu1 %v9956_v26  ;;  %2896 = vmatprep.mubr.bf16.mxu1 %v9353_v25  ;;  %v8538_v26 = vld [vmem:[%s11268_s28 + $0x364] ss:$8 sps:$4 sm:$0xff]  }
 0x5c1   : > { %3100 = vmatprep.subr.bf16.mxu1 %v8532_v22  ;;  %2821 = vmatpush1.bf16.msra.mxu0 %v8527_v50 }
 0x5c2   : > { %2822 = vmatprep.subr.bf16.mxu0 %v8535_v51 }
 0x5c5   : > { %2823 = vmatpush1.bf16.msra.mxu0 %v8533_v52 }
 0x5c6   : > { %2824 = vmatprep.subr.bf16.mxu0 %v8541_v53 }
 0x5c7   : > { %7491 = vmatmul.mubr.msk.bf16.vlgmr.msra.gmra.mxu1 %vm1744_vm3, %v2860_v58 }
 0x5c8   : > { %3101 = vmatpush1.bf16.msra.mxu1 %v8530_v61 }
 0x5c9   : > { %3102 = vmatprep.subr.bf16.mxu1 %v8538_v26  ;;  %2825 = vmatpush1.bf16.msra.mxu0 %v8539_v54 }
 0x5ca   : > { %2826 = vmatprep.subr.bf16.mxu0 %v8547_v55 }
 0x5cc   : > { %3103 = vmatpush1.bf16.msra.mxu1 %v8536_v56 }
 0x5cd   : > { %3104 = vmatprep.subr.bf16.mxu1 %v8544_v1  ;;  %2827 = vmatpush1.bf16.msra.mxu0 %v8545_v2 }
 0x5ce   : > { %2828 = vmatprep.subr.bf16.mxu0 %v8553_v3 }
 0x5d0   : > { %3105 = vmatpush1.bf16.msra.mxu1 %v8542_v4 }
 0x5d1   : > { %3106 = vmatprep.subr.bf16.mxu1 %v8550_v5  ;;  %2829 = vmatpush1.bf16.msra.mxu0 %v8551_v6  ;;  %v3158_v5 = vld [vmem:[%s11269_s11 + $0x78] sm:$0xff]  ;;  %v3173_v6 = vld [vmem:[%s11269_s11 + $0xf0] sm:$0xff] }
 0x5d2   : > { %2830 = vmatprep.subr.bf16.mxu0 %v8559_v7 }
 0x5d4   : > { %3107 = vmatpush1.bf16.msra.mxu1 %v8548_v8  ;;  %v3157_v8 = vld [vmem:[%s11269_s11 + $0x70] sm:$0xff] }
 0x5d5   : > { %3108 = vmatprep.subr.bf16.mxu1 %v8556_v9  ;;  %2831 = vmatpush1.bf16.msra.mxu0 %v8557_v10  ;;  %v3172_v9 = vld [vmem:[%s11269_s11 + $0xe8] sm:$0xff] }
 0x5d6   : > { %2832 = vmatprep.subr.bf16.mxu0 %v8565_v11  ;;  %v3156_v11 = vld [vmem:[%s11269_s11 + $0x68] sm:$0xff] }
 0x5d8   : > { %3109 = vmatpush1.bf16.msra.mxu1 %v8554_v12 }
 0x5d9   : > { %3110 = vmatprep.subr.bf16.mxu1 %v8562_v13  ;;  %2833 = vmatpush2.bf16.msra.mxu0 %v8563_v14 }
 0x5da   : > { %2834 = vmatprep.subr.bf16.mxu0 %v8571_v15 }
 0x5dc   : > { %3111 = vmatpush1.bf16.msra.mxu1 %v8560_v16 }
 0x5dd   : > { %3112 = vmatprep.subr.bf16.mxu1 %v8568_v17  ;;  %2835 = vmatpush2.bf16.msra.mxu0 %v8569_v18  ;;  %v3171_v17 = vld [vmem:[%s11269_s11 + $0xe0] sm:$0xff] }
 0x5de   : > { %2836 = vmatprep.subr.bf16.mxu0 %v8577_v59  ;;  %v3155_v18 = vld [vmem:[%s11269_s11 + $0x60] sm:$0xff]  ;;  %v3170_v59 = vld [vmem:[%s11269_s11 + $0xd8] sm:$0xff] }
 0x5e0   : > { %3113 = vmatpush1.bf16.msra.mxu1 %v8566_v63  ;;  %v3154_v63 = vld [vmem:[%s11269_s11 + $0x58] sm:$0xff] }
 0x5e1   : > { %3114 = vmatprep.subr.bf16.mxu1 %v8574_v19  ;;  %2837 = vmatpush2.bf16.msra.mxu0 %v8575_v60  ;;  %v3169_v19 = vld [vmem:[%s11269_s11 + $0xd0] sm:$0xff] }
 0x5e2   : > { %2838 = vmatprep.subr.bf16.mxu0 %v8583_v57  ;;  %v3153_v60 = vld [vmem:[%s11269_s11 + $0x50] sm:$0xff]  ;;  %v3168_v57 = vld [vmem:[%s11269_s11 + $0xc8] sm:$0xff] }
 0x5e4   : > { %3115 = vmatpush1.bf16.msra.mxu1 %v8572_v20  ;;  %v3152_v20 = vld [vmem:[%s11269_s11 + $0x48] sm:$0xff] }
 0x5e5   : > { %3116 = vmatprep.subr.bf16.mxu1 %v8580_v21  ;;  %2839 = vmatpush2.bf16.msra.mxu0 %v8581_v23  ;;  %v3167_v21 = vld [vmem:[%s11269_s11 + $0xc0] sm:$0xff] }
 0x5e6   : > { %2840 = vmatprep.subr.bf16.mxu0 %v8589_v24  ;;  %v3151_v23 = vld [vmem:[%s11269_s11 + $0x40] sm:$0xff]  ;;  %v3166_v24 = vld [vmem:[%s11269_s11 + $0xb8] sm:$0xff] }
 0x5e8   : > { %3117 = vmatpush2.bf16.msra.mxu1 %v8578_v27  ;;  %v3150_v27 = vld [vmem:[%s11269_s11 + $0x38] sm:$0xff] }
 0x5e9   : > { %3118 = vmatprep.subr.bf16.mxu1 %v8586_v28  ;;  %2841 = vmatpush2.bf16.msra.mxu0 %v8587_v29  ;;  %v3165_v28 = vld [vmem:[%s11269_s11 + $0xb0] sm:$0xff] }
 0x5ea   : > { %2842 = vmatprep.subr.bf16.mxu0 %v8595_v33  ;;  %v3149_v29 = vld [vmem:[%s11269_s11 + $0x30] sm:$0xff]  ;;  %v3147_v33 = vld [vmem:[%s11269_s11 + $0x20] sm:$0xff] }
 0x5ec   : > { %3119 = vmatpush2.bf16.msra.mxu1 %v8584_v30  ;;  %v3164_v30 = vld [vmem:[%s11269_s11 + $0xa8] sm:$0xff] }
 0x5ed   : > { %3120 = vmatprep.subr.bf16.mxu1 %v8592_v31  ;;  %2843 = vmatpush2.bf16.msra.mxu0 %v8593_v35  ;;  %v3148_v31 = vld [vmem:[%s11269_s11 + $0x28] sm:$0xff]  ;;  %v3146_v35 = vld [vmem:[%s11269_s11 + $0x18] sm:$0xff] }
 0x5ee   : > { %2844 = vmatprep.subr.bf16.mxu0 %v8601_v37  ;;  %v3145_v37 = vld [vmem:[%s11269_s11 + $0x10] sm:$0xff] }
 0x5f0   : > { %3121 = vmatpush2.bf16.msra.mxu1 %v8590_v32  ;;  %v3163_v32 = vld [vmem:[%s11269_s11 + $0xa0] sm:$0xff] }
 0x5f1   : > { %3122 = vmatprep.subr.bf16.mxu1 %v8598_v34  ;;  %2845 = vmatpush2.bf16.msra.mxu0 %v8599_v39  ;;  %v3162_v34 = vld [vmem:[%s11269_s11 + $0x98] sm:$0xff]  ;;  %v3144_v39 = vld [vmem:[%s11269_s11 + $0x8] sm:$0xff] }
 0x5f2   : > { %2846 = vmatprep.subr.bf16.mxu0 %v8607_v41  ;;  %v3143_v41 = vld [vmem:[%s11269_s11] sm:$0xff] }
 0x5f4   : > { %3123 = vmatpush2.bf16.msra.mxu1 %v8596_v36  ;;  %v3161_v36 = vld [vmem:[%s11269_s11 + $0x90] sm:$0xff] }
 0x5f5   : > { %3124 = vmatprep.subr.bf16.mxu1 %v8604_v38  ;;  %2847 = vmatpush2.bf16.msra.mxu0 %v8605_v43  ;;  %v3160_v38 = vld [vmem:[%s11269_s11 + $0x88] sm:$0xff] }
 0x5f6   : > { %7920 = vmatprep.subr.mxu0 %v3174_v49 }
 0x5f8   : > { %3125 = vmatpush2.bf16.msra.mxu1 %v8602_v40  ;;  %v3159_v40 = vld [vmem:[%s11269_s11 + $0x80] sm:$0xff] }
 0x5f9   : > { %3126 = vmatprep.subr.bf16.mxu1 %v8610_v42 }
 0x5fc   : > { %3127 = vmatpush2.bf16.msra.mxu1 %v8608_v44 }
 0x5fd   : > { %3128 = vmatprep.subr.bf16.mxu1 %v8613_v45 }
 0x600   : > { %3129 = vmatpush2.bf16.msra.mxu1 %v8611_v46 }
 0x601   : > { %3130 = vmatprep.subr.bf16.mxu1 %v8616_v47 }
 0x604   : > { %3131 = vmatpush2.bf16.msra.mxu1 %v8614_v48 }
 0x605   : > { %7955 = vmatprep.subr.mxu1 %v3174_v49 }
 0x677   : > { %v2367_v50 = vpop.f32.mrf.mxu1  ;;  %v2568_v22 = vpop.f32.mrf.mxu0 }
 0x678   : > { %v10353_v51 = vadd.f32 %v2568_v22, %v2367_v50 }
 0x679   : > { %v2369_v52 = vpop.f32.mrf.mxu1  ;;  %v2570_v53 = vpop.f32.mrf.mxu0 }
 0x67a   : > { %v10355_v58 = vadd.f32 %v2570_v53, %v2369_v52 }
 0x67b   : > { %v2371_v61 = vpop.f32.mrf.mxu1  ;;  %v2572_v26 = vpop.f32.mrf.mxu0 }
 0x67d   : > { %v2372_v54 = vpop.f32.mrf.mxu1  ;;  %v2573_v55 = vpop.f32.mrf.mxu0 }
 0x67f   : > { %v2614_v56 = vpop.f32.mrf.mxu1 }
 0x680   : > { %v2621_v3 = vpack.c.bf16 %v2614_v56, %v2614_v56 }
 0x681   : > { %v2616_v1 = vpop.f32.mrf.mxu1 }
 0x682   : > { %v2622_v2 = vpack.c.bf16 %v2616_v1, %v2616_v1 }
 0x683   : > { %v2618_v4 = vpop.f32.mrf.mxu1 }
 0x684   : > { %2848 = vmatprep.mubr.bf16.mxu0 %v2622_v2 }
 0x685   : > { %v2619_v7 = vpop.f32.mrf.mxu1  ;;  %2849 = vmatmul.mubr.bf16.vlgmr.msra.gmra.mxu0 %v2621_v3 }
 0x686   : > { %7921 = vmatpush3.msra.mxu0 %v3158_v5 }
 0x687   : > { %v2898_v10 = vpop.f32.mrf.mxu1  ;;  %7922 = vmatprep.subr.mxu0 %v3173_v6 }
 0x688   : > { %7923 = vmatpush3.msra.mxu0 %v3157_v8  ;;  %v2905_v14 = vpack.c.bf16 %v2898_v10, %v2898_v10 }
 0x689   : > { %v2900_v12 = vpop.f32.mrf.mxu1  ;;  %7924 = vmatprep.subr.mxu0 %v3172_v9 }
 0x68a   : > { %v2906_v13 = vpack.c.bf16 %v2900_v12, %v2900_v12  ;;  %7925 = vmatpush3.msra.mxu0 %v3156_v11 }
 0x68b   : > { %v2902_v15 = vpop.f32.mrf.mxu1  ;;  %7926 = vmatprep.subr.mxu0 %v3171_v17 }
 0x68c   : > { %3132 = vmatprep.mubr.bf16.mxu1 %v2906_v13  ;;  %7927 = vmatpush3.msra.mxu0 %v3155_v18 }
 0x68d   : > { %v2903_v16 = vpop.f32.mrf.mxu1  ;;  %3133 = vmatmul.mubr.bf16.vlgmr.msra.gmra.mxu1 %v2905_v14  ;;  %7928 = vmatprep.subr.mxu0 %v3170_v59 }
 0x68e   : > { %7956 = vmatpush3.msra.mxu1 %v3158_v5  ;;  %7929 = vmatpush3.msra.mxu0 %v3154_v63 }
 0x68f   : > { %7957 = vmatprep.subr.mxu1 %v3173_v6  ;;  %7930 = vmatprep.subr.mxu0 %v3169_v19 }
 0x690   : > { %7958 = vmatpush3.msra.mxu1 %v3157_v8  ;;  %7931 = vmatpush3.msra.mxu0 %v3153_v60 }
 0x691   : > { %7959 = vmatprep.subr.mxu1 %v3172_v9  ;;  %7932 = vmatprep.subr.mxu0 %v3168_v57 }
 0x692   : > { %7960 = vmatpush3.msra.mxu1 %v3156_v11  ;;  %7933 = vmatpush3.msra.mxu0 %v3152_v20 }
 0x693   : > { %7961 = vmatprep.subr.mxu1 %v3171_v17  ;;  %7934 = vmatprep.subr.mxu0 %v3167_v21 }
 0x694   : > { %7962 = vmatpush3.msra.mxu1 %v3155_v18  ;;  %7935 = vmatpush3.msra.mxu0 %v3151_v23 }
 0x695   : > { %7963 = vmatprep.subr.mxu1 %v3170_v59  ;;  %7936 = vmatprep.subr.mxu0 %v3166_v24 }
 0x696   : > { %7964 = vmatpush3.msra.mxu1 %v3154_v63  ;;  %7937 = vmatpush3.msra.mxu0 %v3150_v27  ;;  %v3182_v63 = vld [vmem:[#allocation7 + $0x38] sm:$0xff] }
 0x697   : > { %7965 = vmatprep.subr.mxu1 %v3169_v19  ;;  %7938 = vmatprep.subr.mxu0 %v3165_v28  ;;  %v3181_v19 = vld [vmem:[#allocation7 + $0x30] sm:$0xff] }
 0x698   : > { %7966 = vmatpush3.msra.mxu1 %v3153_v60  ;;  %7939 = vmatpush3.msra.mxu0 %v3149_v29  ;;  %v3180_v60 = vld [vmem:[#allocation7 + $0x28] sm:$0xff] }
 0x699   : > { %7967 = vmatprep.subr.mxu1 %v3168_v57  ;;  %7940 = vmatprep.subr.mxu0 %v3164_v30  ;;  %v3179_v57 = vld [vmem:[#allocation7 + $0x20] sm:$0xff] }
 0x69a   : > { %7968 = vmatpush3.msra.mxu1 %v3152_v20  ;;  %7941 = vmatpush3.msra.mxu0 %v3148_v31  ;;  %v3178_v20 = vld [vmem:[#allocation7 + $0x18] sm:$0xff] }
 0x69b   : > { %7969 = vmatprep.subr.mxu1 %v3167_v21  ;;  %7942 = vmatprep.subr.mxu0 %v3163_v32  ;;  %v3177_v21 = vld [vmem:[#allocation7 + $0x10] sm:$0xff] }
 0x69c   : > { %7970 = vmatpush3.msra.mxu1 %v3151_v23  ;;  %7943 = vmatpush3.msra.mxu0 %v3147_v33  ;;  %v3176_v23 = vld [vmem:[#allocation7 + $0x8] sm:$0xff] }
 0x69d   : > { %7971 = vmatprep.subr.mxu1 %v3166_v24  ;;  %7944 = vmatprep.subr.mxu0 %v3162_v34  ;;  %v3175_v24 = vld [vmem:[#allocation7] sm:$0xff] }
 0x69e   : > { %7972 = vmatpush3.msra.mxu1 %v3150_v27  ;;  %7945 = vmatpush3.msra.mxu0 %v3146_v35  ;;  %v3357_v27 = vld [vmem:[#allocation9 + $0x2] sm:$0x1] }
 0x69f   : > { %7973 = vmatprep.subr.mxu1 %v3165_v28  ;;  %7946 = vmatprep.subr.mxu0 %v3161_v36 }
 0x6a0   : > { %7974 = vmatpush3.msra.mxu1 %v3149_v29  ;;  %7947 = vmatpush3.msra.mxu0 %v3145_v37 }
 0x6a1   : > { %7975 = vmatprep.subr.mxu1 %v3164_v30  ;;  %7948 = vmatprep.subr.mxu0 %v3160_v38 }
 0x6a2   : > { %7976 = vmatpush3.msra.mxu1 %v3148_v31  ;;  %7949 = vmatpush3.msra.mxu0 %v3144_v39 }
 0x6a3   : > { %7977 = vmatprep.subr.mxu1 %v3163_v32  ;;  %7950 = vmatprep.subr.mxu0 %v3159_v40 }
 0x6a4   : > { %7978 = vmatpush3.msra.mxu1 %v3147_v33  ;;  %7951 = vmatpush3.msra.mxu0 %v3143_v41 }
 0x6a5   : > { %7979 = vmatprep.subr.mxu1 %v3162_v34  ;;  %3388 = vmatprep.subr.mxu0 %v3182_v63 }
 0x6a6   : > { %7980 = vmatpush3.msra.mxu1 %v3146_v35 }
 0x6a7   : > { %7981 = vmatprep.subr.mxu1 %v3161_v36 }
 0x6a8   : > { %7982 = vmatpush3.msra.mxu1 %v3145_v37 }
 0x6a9   : > { %7983 = vmatprep.subr.mxu1 %v3160_v38 }
 0x6aa   : > { %7984 = vmatpush3.msra.mxu1 %v3144_v39  ;;  %v3355_v39 = vld [vmem:[#allocation9] sm:$0x1] }
 0x6ab   : > { %7985 = vmatprep.subr.mxu1 %v3159_v40 }
 0x6ac   : > { %7986 = vmatpush3.msra.mxu1 %v3143_v41 }
 0x6ad   : > { %3536 = vmatprep.subr.mxu1 %v3182_v63 }
 0x745   : > { %v2850_v42 = vpop.f32.mrf.mxu0 }
 0x746   : > { %v2857_v46 = vadd.f32 %v2850_v42, %v10353_v51 }
 0x747   : > { %v2852_v43 = vpop.f32.mrf.mxu0 }
 0x748   : > { %v2858_v48 = vadd.f32 %v2852_v43, %v10355_v58  ;;  %v3356_v43 = vld [vmem:[#allocation9 + $0x1] sm:$0x1] }
 0x749   : > { %v2854_v44 = vpop.f32.mrf.mxu0 }
 0x74b   : > { %v2855_v45 = vpop.f32.mrf.mxu0 }
 0x74d   : > { %v3134_v47 = vpop.f32.mrf.mxu1 }
 0x74e   : > { %v10452_v49 = vadd.f32 %v3134_v47, %v2857_v46 }
 0x74f   : > { %v3136_v50 = vpop.f32.mrf.mxu1 }
 0x750   : > { %v3183_v22 = vrot.slane %v10452_v49, 4  ;;  %v3265_v52 = vmul.f32 %v10452_v49, %v10452_v49  ;;  %v10457_v53 = vadd.f32 %v3136_v50, %v2858_v48 }
 0x751   : > { %v3138_v61 = vpop.f32.mrf.mxu1 }
 0x752   : > { %v3184_v26 = vadd.f32 %v3183_v22, %v10452_v49  ;;  %v3267_v54 = vrot.slane %v3265_v52, 4  ;;  %v3189_v55 = vrot.slane %v10457_v53, 4  ;;  %v3266_v51 = vmul.f32 %v10457_v53, %v10457_v53 }
 0x753   : > { %v3139_v58 = vpop.f32.mrf.mxu1 }
 0x754   : > { %v3185_v56 = vrot.slane %v3184_v26, 2  ;;  %v3268_v1 = vadd.f32 %v3267_v54, %v3265_v52  ;;  %v3190_v2 = vadd.f32 %v3189_v55, %v10457_v53  ;;  %v3273_v3 = vrot.slane %v3266_v51, 4 }
 0x756   : > { %v3191_v4 = vrot.slane %v3190_v2, 2  ;;  %v3186_v5 = vadd.f32 %v3185_v56, %v3184_v26  ;;  %v3274_v6 = vadd.f32 %v3273_v3, %v3266_v51  ;;  %v3269_v7 = vrot.slane %v3268_v1, 2 }
 0x758   : > { %v3192_v8 = vadd.f32 %v3191_v4, %v3190_v2  ;;  %v3275_v9 = vrot.slane %v3274_v6, 2  ;;  %v3270_v10 = vadd.f32 %v3269_v7, %v3268_v1  ;;  %v3187_v11 = vrot.slane %v3186_v5, 1 }
 0x75a   : > { %v3193_v12 = vrot.slane %v3192_v8, 1  ;;  %v3276_v13 = vadd.f32 %v3275_v9, %v3274_v6  ;;  %v3271_v14 = vrot.slane %v3270_v10, 1  ;;  %v3188_v17 = vadd.f32 %v3187_v11, %v3186_v5  ;;  %v8667_v9 = vld [vmem:[#allocation12 + $0x74] ss:$8 sps:$4 sm:$0xff]   ;;  %v3707_v11 = vld [vmem:[#allocation10 + $0x2] sm:$0x3] }
 0x75c   : > { %v3194_v15 = vadd.f32 %v3193_v12, %v3192_v8  ;;  %v3277_v16 = vrot.slane %v3276_v13, 1  ;;  %v3272_v59 = vadd.f32 %v3271_v14, %v3270_v10  ;;  %v8619_v8 = vld [vmem:[#allocation12 + $0x174] ss:$8 sps:$4 sm:$0xff]   ;;  %v3619_v10 = vld [vmem:[#allocation10] sm:$0x3] }
 0x75d   : > { %v8617_v12 = vld [vmem:[#allocation12 + $0x170] ss:$8 sps:$4 sm:$0xff]   ;;  %v8622_v14 = vld [vmem:[#allocation12 + $0x164] ss:$8 sps:$4 sm:$0xff]  }
 0x75e   : > { %3259 = vmatprep.mubr.f32.mxu0 %v3194_v15  ;;  %v3278_v18 = vadd.f32 %v3277_v16, %v3276_v13  ;;  %v8665_v13 = vld [vmem:[#allocation12 + $0x70] ss:$8 sps:$4 sm:$0xff]   ;;  %v8670_v15 = vld [vmem:[#allocation12 + $0x64] ss:$8 sps:$4 sm:$0xff]   ;;  %v8620_v16 = vld [vmem:[#allocation12 + $0x160] ss:$8 sps:$4 sm:$0xff]  }
 0x75f   : > { %3260 = vmatmul.mubr.f32.vlgmr.msra.gmra.mxu0 %v3188_v17  ;;  %v8668_v17 = vld [vmem:[#allocation12 + $0x60] ss:$8 sps:$4 sm:$0xff]  }
 0x760   : > { %3343 = vmatprep.mubr.f32.mxu1 %v3278_v18  ;;  %3428 = vmatprep.mubr.f32.mxu0 %v9351_v0  ;;  %v8625_v18 = vld [vmem:[#allocation12 + $0x154] ss:$8 sps:$4 sm:$0xff]  }
 0x761   : > { %3344 = vmatmul.mubr.f32.vlgmr.msra.gmra.mxu1 %v3272_v59  ;;  %3389 = vmatpush1.msra.mxu0 %v3181_v19  ;;  %v8673_v59 = vld [vmem:[#allocation12 + $0x54] ss:$8 sps:$4 sm:$0xff]  }
 0x762   : > { %3576 = vmatprep.mubr.f32.mxu1 %v9351_v0  ;;  %3537 = vmatpush1.msra.mxu1 %v3181_v19 }
 0x763   : > { %3390 = vmatprep.subr.mxu0 %v3180_v60  ;;  %3538 = vmatprep.subr.mxu1 %v3180_v60 }
 0x764   : > { %3391 = vmatpush1.msra.mxu0 %v3179_v57  ;;  %3539 = vmatpush1.msra.mxu1 %v3179_v57 }
 0x765   : > { %3392 = vmatprep.subr.mxu0 %v3178_v20  ;;  %3540 = vmatprep.subr.mxu1 %v3178_v20 }
 0x766   : > { %3393 = vmatpush1.msra.mxu0 %v3177_v21  ;;  %3541 = vmatpush1.msra.mxu1 %v3177_v21 }
 0x767   : > { %3394 = vmatprep.subr.mxu0 %v3176_v23  ;;  %3542 = vmatprep.subr.mxu1 %v3176_v23 }
 0x768   : > { %3395 = vmatpush1.msra.mxu0 %v3175_v24  ;;  %3543 = vmatpush1.msra.mxu1 %v3175_v24 }
 0x769   : > { %3462 = vmatprep.subr.mxu0 %v3182_v63  ;;  %7558 = vmatmul.mubr.msk.f32.vlgmr.msra.gmra.mxu1 %vm931_vm1, %v3357_v27  ;;  %v8623_v63 = vld [vmem:[#allocation12 + $0x150] ss:$8 sps:$4 sm:$0xff]  }
 0x76a   : > { %3743 = vmatprep.mubr.bf16.mxu1 %v9353_v25  ;;  %v8629_v27 = vld [vmem:[#allocation12 + $0x130] ss:$8 sps:$4 sm:$0xff]  }
 0x81f   : > { %v7952_v28 = vpop.f32.mrf.mxu0 }
 0x821   : > { %v7953_v29 = vpop.f32.mrf.mxu0  ;;  %v7987_v30 = vpop.f32.mrf.mxu1 }
 0x822   : > { %v7954_v31 = vadd.f32 %v7953_v29, %v7952_v28  ;;  %v8677_v28 = vld [vmem:[#allocation12 + $0x30] ss:$8 sps:$4 sm:$0xff]   ;;  %v8634_v29 = vld [vmem:[#allocation12 + $0x124] ss:$8 sps:$4 sm:$0xff]  }
 0x823   : > { %v7988_v32 = vpop.f32.mrf.mxu1 }
 0x824   : > { %v3349_v33 = vmul.f32 0.015625, %v7954_v31  ;;  %v7989_v34 = vadd.f32 %v7988_v32, %v7987_v30  ;;  %v8682_v30 = vld [vmem:[#allocation12 + $0x24] ss:$8 sps:$4 sm:$0xff]   ;;  %v8632_v31 = vld [vmem:[#allocation12 + $0x120] ss:$8 sps:$4 sm:$0xff]  }
 0x825   : > { %v8680_v32 = vld [vmem:[#allocation12 + $0x20] ss:$8 sps:$4 sm:$0xff]  }
 0x826   : > { %v3351_v35 = vmul.f32 %v3349_v33, %v3349_v33  ;;  %v3350_v36 = vmul.f32 0.015625, %v7989_v34  ;;  %v8685_v34 = vld [vmem:[#allocation12 + $0x14] ss:$8 sps:$4 sm:$0xff]  }
 0x828   : > { %v3352_v37 = vsub.f32 %v3350_v36, %v3351_v35  ;;  %v8635_v35 = vld [vmem:[#allocation12 + $0x110] ss:$8 sps:$4 sm:$0xff]  }
 0x829   : > { %v3578_v48 = vpop.f32.mrf.mxu1  ;;  %v8683_v36 = vld [vmem:[#allocation12 + $0x10] ss:$8 sps:$4 sm:$0xff]  }
 0x82a   : > { %v3353_v38 = vadd.f32 1e-05, %v3352_v37  ;;  %v3608_v26 = vrot.slane %v3578_v48, %v9936_v62  ;;  %v8640_v37 = vld [vmem:[#allocation12 + $0x104] ss:$8 sps:$4 sm:$0xff]   ;;  %v8692_v48 = vld [vmem:[#allocation12 + $0xe0] ss:$8 sps:$4 sm:$0xff]  }
 0x82b   : > { %v3580_v55 = vpop.f32.mrf.mxu1 }
 0x82c   : > { %9003 = vrsqrt.f32 %v3353_v38  ;;  %v3612_v3 = vrot.slane %v3580_v55, %v9936_v62  ;;  %v8688_v38 = vld [vmem:[#allocation12 + $0x4] ss:$8 sps:$4 sm:$0xff]   ;;  %v8650_v55 = vld [vmem:[#allocation12 + $0x1c0] ss:$8 sps:$4 sm:$0xff]  }
 0x839   : > { %v9004_v40 = vpop.eup %9003 }
 0x83a   : > { %v3358_v41 = vmul.f32 %v9004_v40, %v3355_v39  ;;  %v8638_v39 = vld [vmem:[#allocation12 + $0x100] ss:$8 sps:$4 sm:$0xff]  }
 0x83b   : > { %v8686_v40 = vld [vmem:[#allocation12] ss:$8 sps:$4 sm:$0xff]  }
 0x83c   : > { %7556 = vmatmul.mubr.msk.f32.vlgmr.msra.gmra.mxu0 %vm931_vm1, %v3358_v41  ;;  %v3359_v42 = vmul.f32 %v3358_v41, %v3349_v33  ;;  %v8637_v33 = vld [vmem:[#allocation12 + $0x114] ss:$8 sps:$4 sm:$0xff]  }
 0x83d   : > { %3463 = vmatpush1.msra.mxu0 %v3181_v19  ;;  %3502 = vmatprep.mubr.f32.mxu0 %v9351_v0  ;;  %v8671_v19 = vld [vmem:[#allocation12 + $0x50] ss:$8 sps:$4 sm:$0xff]   ;;  %v8643_v41 = vld [vmem:[#allocation12 + $0x1f4] ss:$8 sps:$4 sm:$0xff]  }
 0x83e   : > { %3464 = vmatprep.subr.mxu0 %v3180_v60  ;;  %v3360_v44 = vsub.f32 %v3356_v43, %v3359_v42  ;;  %v8628_v60 = vld [vmem:[#allocation12 + $0x144] ss:$8 sps:$4 sm:$0xff]   ;;  %v8691_v42 = vld [vmem:[#allocation12 + $0xf4] ss:$8 sps:$4 sm:$0xff]   ;;  %v8641_v43 = vld [vmem:[#allocation12 + $0x1f0] ss:$8 sps:$4 sm:$0xff]  }
 0x83f   : > { %3465 = vmatpush1.msra.mxu0 %v3179_v57  ;;  %v8676_v57 = vld [vmem:[#allocation12 + $0x44] ss:$8 sps:$4 sm:$0xff]  }
 0x840   : > { %3466 = vmatprep.subr.mxu0 %v3178_v20  ;;  %v8626_v20 = vld [vmem:[#allocation12 + $0x140] ss:$8 sps:$4 sm:$0xff]  }
 0x841   : > { %3467 = vmatpush1.msra.mxu0 %v3177_v21  ;;  %v8674_v21 = vld [vmem:[#allocation12 + $0x40] ss:$8 sps:$4 sm:$0xff]  }
 0x842   : > { %3468 = vmatprep.subr.mxu0 %v3176_v23  ;;  %v8631_v23 = vld [vmem:[#allocation12 + $0x134] ss:$8 sps:$4 sm:$0xff]  }
 0x843   : > { %3469 = vmatpush1.msra.mxu0 %v3175_v24  ;;  %v8679_v24 = vld [vmem:[#allocation12 + $0x34] ss:$8 sps:$4 sm:$0xff]  }
 0x844   : > { %7557 = vmatmul.mubr.msk.f32.vlgmr.msra.gmra.mxu0 %vm931_vm1, %v3360_v44  ;;  %v8689_v44 = vld [vmem:[#allocation12 + $0xf0] ss:$8 sps:$4 sm:$0xff]  }
 0x845   : > { %3663 = vmatprep.mubr.bf16.mxu0 %v9353_v25 }
 0x8fc   : > { %v3430_v45 = vpop.f32.mrf.mxu0 }
 0x8fd   : > { %v3586_v47 = vrot.slane %v3430_v45, %v9936_v62  ;;  %v8646_v45 = vld [vmem:[#allocation12 + $0x1e4] ss:$8 sps:$4 sm:$0xff]  }
 0x8fe   : > { %v3432_v46 = vpop.f32.mrf.mxu0 }
 0x8ff   : > { %v3590_v50 = vrot.slane %v3432_v46, %v9936_v62  ;;  %v3591_v52 = vmul.f32 %v3586_v47, %v10452_v49  ;;  %v8694_v46 = vld [vmem:[#allocation12 + $0xe4] ss:$8 sps:$4 sm:$0xff]   ;;  %v8644_v47 = vld [vmem:[#allocation12 + $0x1e0] ss:$8 sps:$4 sm:$0xff]  }
 0x901   : > { %v3592_v51 = vmul.f32 %v3590_v50, %v10457_v53  ;;  %v8649_v50 = vld [vmem:[#allocation12 + $0x1d4] ss:$8 sps:$4 sm:$0xff]  }
 0x904   : > { %v3504_v22 = vpop.f32.mrf.mxu0 }
 0x905   : > { %v3596_v61 = vrot.slane %v3504_v22, %v9936_v62  ;;  %v8697_v22 = vld [vmem:[#allocation12 + $0xd4] ss:$8 sps:$4 sm:$0xff]  }
 0x906   : > { %v3506_v54 = vpop.f32.mrf.mxu0 }
 0x907   : > { %v3601_v58 = vadd.f32 %v3596_v61, %v3591_v52  ;;  %v3600_v56 = vrot.slane %v3506_v54, %v9936_v62  ;;  %v8647_v52 = vld [vmem:[#allocation12 + $0x1d0] ss:$8 sps:$4 sm:$0xff]   ;;  %v8700_v54 = vld [vmem:[#allocation12 + $0xc4] ss:$8 sps:$4 sm:$0xff]  }
 0x908   : > { %v8695_v61 = vld [vmem:[#allocation12 + $0xd0] ss:$8 sps:$4 sm:$0xff]  }
 0x909   : > { %vm3603_vm8 = vcmp.ge.f32.partialorder %v3601_v58, 0.0  ;;  %v3613_v1 = vmul.f32 %v3608_v26, %v3601_v58  ;;  %v3602_v2 = vadd.f32 %v3600_v56, %v3592_v51  ;;  %v8652_v26 = vld [vmem:[#allocation12 + $0x1c4] ss:$8 sps:$4 sm:$0xff]   ;;  %v8698_v51 = vld [vmem:[#allocation12 + $0xc0] ss:$8 sps:$4 sm:$0xff]  }
 0x90a   : > { %v8703_v56 = vld [vmem:[#allocation12 + $0xb4] ss:$8 sps:$4 sm:$0xff]  }
 0x90b   : > { %vm3604_vm9 = vcmp.ge.f32.partialorder %v3602_v2, 0.0  ;;  %v3614_v4 = vmul.f32 %v3612_v3, %v3602_v2  ;;  %v3615_v5 = vsel %vm3603_vm8, %v3601_v58, %v3613_v1  ;;  %v8655_v58 = vld [vmem:[#allocation12 + $0x1b4] ss:$8 sps:$4 sm:$0xff]   ;;  %v8653_v1 = vld [vmem:[#allocation12 + $0x1b0] ss:$8 sps:$4 sm:$0xff]  }
 0x90c   : > { %v3617_v49 = vpack.c.bf16 %v3615_v5, %v3615_v5  ;;  %v8658_v3 = vld [vmem:[#allocation12 + $0x1a4] ss:$8 sps:$4 sm:$0xff]   ;;  %v8656_v5 = vld [vmem:[#allocation12 + $0x1a0] ss:$8 sps:$4 sm:$0xff]  }
 0x90d   : > { %v3616_v6 = vsel %vm3604_vm9, %v3602_v2, %v3614_v4  ;;  %v8701_v2 = vld [vmem:[#allocation12 + $0xb0] ss:$8 sps:$4 sm:$0xff]   ;;  %v8706_v4 = vld [vmem:[#allocation12 + $0xa4] ss:$8 sps:$4 sm:$0xff]  }
 0x90e   : > { %v10480_v7 = vpack.c.bf16 %v3616_v6, %v3616_v6  ;;  %v10487_v53 = vsel %vm3624_vm10, %v3617_v49, 0  ;;  %v8704_v49 = vld [vmem:[#allocation12 + $0xa0] ss:$8 sps:$4 sm:$0xff]   ;;  %v8661_v6 = vld [vmem:[#allocation12 + $0x194] ss:$8 sps:$4 sm:$0xff]  }
 0x910   : > { %7559 = vmatprep.subr.msk.bf16.mxu0 %vm3624_vm10, %v10480_v7  ;;  %7561 = vmatprep.subr.msk.bf16.mxu1 %vm3624_vm10, %v10480_v7 }
 0x911   : > { %3646 = vmatpush1.bf16.msra.mxu0 %v10487_v53  ;;  %3726 = vmatpush1.bf16.msra.mxu1 %v10487_v53 }
 0x912   : > { %3947 = vmatprep.subr.bf16.mxu0 %v8619_v8  ;;  %4148 = vmatprep.subr.bf16.mxu1 %v8667_v9  ;;  %v8709_v8 = vld [vmem:[#allocation12 + $0x94] ss:$8 sps:$4 sm:$0xff]   ;;  %v8659_v9 = vld [vmem:[#allocation12 + $0x190] ss:$8 sps:$4 sm:$0xff]  }
 0x914   : > { %7560 = vmatmul.mubr.msk.bf16.vlgmr.msra.gmra.mxu0 %vm3620_vm11, %v3619_v10  ;;  %7562 = vmatmul.mubr.msk.bf16.vlgmr.msra.gmra.mxu1 %vm3620_vm11, %v3707_v11  ;;  %v8707_v10 = vld [vmem:[#allocation12 + $0x90] ss:$8 sps:$4 sm:$0xff]   ;;  %v8664_v11 = vld [vmem:[#allocation12 + $0x184] ss:$8 sps:$4 sm:$0xff]  }
 0x915   : > { %3948 = vmatpush1.bf16.msra.mxu0 %v8617_v12  ;;  %4149 = vmatpush1.bf16.msra.mxu1 %v8665_v13  ;;  %v8662_v12 = vld [vmem:[#allocation12 + $0x180] ss:$8 sps:$4 sm:$0xff]   ;;  %v8712_v13 = vld [vmem:[#allocation12 + $0x84] ss:$8 sps:$4 sm:$0xff]  }
 0x916   : > { %3949 = vmatprep.subr.bf16.mxu0 %v8622_v14  ;;  %4150 = vmatprep.subr.bf16.mxu1 %v8670_v15  ;;  %v8710_v14 = vld [vmem:[#allocation12 + $0x80] ss:$8 sps:$4 sm:$0xff]   ;;  %v8715_v15 = vld [vmem:[#allocation12 + $0x274] ss:$8 sps:$4 sm:$0xff]  }
 0x919   : > { %3950 = vmatpush1.bf16.msra.mxu0 %v8620_v16  ;;  %4151 = vmatpush1.bf16.msra.mxu1 %v8668_v17 }
 0x91a   : > { %3951 = vmatprep.subr.bf16.mxu0 %v8625_v18  ;;  %4152 = vmatprep.subr.bf16.mxu1 %v8673_v59 }
 0x91d   : > { %3952 = vmatpush1.bf16.msra.mxu0 %v8623_v63  ;;  %4153 = vmatpush1.bf16.msra.mxu1 %v8671_v19 }
 0x91e   : > { %3953 = vmatprep.subr.bf16.mxu0 %v8628_v60  ;;  %4154 = vmatprep.subr.bf16.mxu1 %v8676_v57 }
 0x921   : > { %3954 = vmatpush1.bf16.msra.mxu0 %v8626_v20  ;;  %4155 = vmatpush1.bf16.msra.mxu1 %v8674_v21 }
 0x922   : > { %3955 = vmatprep.subr.bf16.mxu0 %v8631_v23  ;;  %4156 = vmatprep.subr.bf16.mxu1 %v8679_v24  ;;  %v8713_v23 = vld [vmem:[#allocation12 + $0x270] ss:$8 sps:$4 sm:$0xff]   ;;  %v8718_v24 = vld [vmem:[#allocation12 + $0x264] ss:$8 sps:$4 sm:$0xff]  }
 0x925   : > { %3956 = vmatpush1.bf16.msra.mxu0 %v8629_v27  ;;  %4157 = vmatpush1.bf16.msra.mxu1 %v8677_v28 }
 0x926   : > { %3957 = vmatprep.subr.bf16.mxu0 %v8634_v29  ;;  %4158 = vmatprep.subr.bf16.mxu1 %v8682_v30  ;;  %v8716_v29 = vld [vmem:[#allocation12 + $0x260] ss:$8 sps:$4 sm:$0xff]   ;;  %v8721_v30 = vld [vmem:[#allocation12 + $0x254] ss:$8 sps:$4 sm:$0xff]  }
 0x929   : > { %3958 = vmatpush1.bf16.msra.mxu0 %v8632_v31  ;;  %4159 = vmatpush1.bf16.msra.mxu1 %v8680_v32  ;;  %v4190_v31 = vld [vmem:[#allocation10 + $0x4] sm:$0x3]  ;;  %v8719_v32 = vld [vmem:[#allocation12 + $0x250] ss:$8 sps:$4 sm:$0xff]  }
 0x92a   : > { %3959 = vmatprep.subr.bf16.mxu0 %v8637_v33  ;;  %4160 = vmatprep.subr.bf16.mxu1 %v8685_v34  ;;  %v8724_v33 = vld [vmem:[#allocation12 + $0x374] ss:$8 sps:$4 sm:$0xff]   ;;  %v8727_v34 = vld [vmem:[#allocation12 + $0x244] ss:$8 sps:$4 sm:$0xff]  }
 0x92d   : > { %3960 = vmatpush1.bf16.msra.mxu0 %v8635_v35  ;;  %4161 = vmatpush1.bf16.msra.mxu1 %v8683_v36  ;;  %v8725_v35 = vld [vmem:[#allocation12 + $0x240] ss:$8 sps:$4 sm:$0xff]   ;;  %v4474_v36 = vld [vmem:[#allocation10 + $0x6] sm:$0x3] }
 0x92e   : > { %3961 = vmatprep.subr.bf16.mxu0 %v8640_v37  ;;  %4162 = vmatprep.subr.bf16.mxu1 %v8688_v38  ;;  %v8722_v37 = vld [vmem:[#allocation12 + $0x370] ss:$8 sps:$4 sm:$0xff]   ;;  %v8730_v38 = vld [vmem:[#allocation12 + $0x364] ss:$8 sps:$4 sm:$0xff]  }
 0x931   : > { %3962 = vmatpush1.bf16.msra.mxu0 %v8638_v39  ;;  %4163 = vmatpush1.bf16.msra.mxu1 %v8686_v40  ;;  %v8731_v39 = vld [vmem:[#allocation12 + $0x230] ss:$8 sps:$4 sm:$0xff]   ;;  %v8739_v40 = vld [vmem:[#allocation12 + $0x224] ss:$8 sps:$4 sm:$0xff]  }
 0x932   : > { %3963 = vmatprep.subr.bf16.mxu0 %v8643_v41  ;;  %4164 = vmatprep.subr.bf16.mxu1 %v8691_v42  ;;  %v8728_v41 = vld [vmem:[#allocation12 + $0x360] ss:$8 sps:$4 sm:$0xff]  }
 0x933   : > { %v8737_v42 = vld [vmem:[#allocation12 + $0x220] ss:$8 sps:$4 sm:$0xff]  }
 0x935   : > { %3964 = vmatpush2.bf16.msra.mxu0 %v8641_v43  ;;  %4165 = vmatpush2.bf16.msra.mxu1 %v8689_v44  ;;  %v8745_v43 = vld [vmem:[#allocation12 + $0x214] ss:$8 sps:$4 sm:$0xff]   ;;  %v8734_v44 = vld [vmem:[#allocation12 + $0x350] ss:$8 sps:$4 sm:$0xff]  }
 0x936   : > { %3965 = vmatprep.subr.bf16.mxu0 %v8646_v45  ;;  %4166 = vmatprep.subr.bf16.mxu1 %v8694_v46  ;;  %v8742_v45 = vld [vmem:[#allocation12 + $0x344] ss:$8 sps:$4 sm:$0xff]   ;;  %v8743_v46 = vld [vmem:[#allocation12 + $0x210] ss:$8 sps:$4 sm:$0xff]  }
 0x939   : > { %3966 = vmatpush2.bf16.msra.mxu0 %v8644_v47  ;;  %4167 = vmatpush2.bf16.msra.mxu1 %v8692_v48  ;;  %v8751_v47 = vld [vmem:[#allocation12 + $0x204] ss:$8 sps:$4 sm:$0xff]   ;;  %v8740_v48 = vld [vmem:[#allocation12 + $0x340] ss:$8 sps:$4 sm:$0xff]  }
 0x93a   : > { %3967 = vmatprep.subr.bf16.mxu0 %v8649_v50  ;;  %4168 = vmatprep.subr.bf16.mxu1 %v8697_v22  ;;  %v8748_v50 = vld [vmem:[#allocation12 + $0x334] ss:$8 sps:$4 sm:$0xff]   ;;  %v8749_v22 = vld [vmem:[#allocation12 + $0x200] ss:$8 sps:$4 sm:$0xff]  }
 0x93d   : > { %3968 = vmatpush2.bf16.msra.mxu0 %v8647_v52  ;;  %4169 = vmatpush2.bf16.msra.mxu1 %v8695_v61  ;;  %v8757_v52 = vld [vmem:[#allocation12 + $0x2f4] ss:$8 sps:$4 sm:$0xff]   ;;  %v8746_v61 = vld [vmem:[#allocation12 + $0x330] ss:$8 sps:$4 sm:$0xff]  }
 0x93e   : > { %3969 = vmatprep.subr.bf16.mxu0 %v8652_v26  ;;  %4170 = vmatprep.subr.bf16.mxu1 %v8700_v54  ;;  %v8754_v26 = vld [vmem:[#allocation12 + $0x324] ss:$8 sps:$4 sm:$0xff]   ;;  %v8755_v54 = vld [vmem:[#allocation12 + $0x2f0] ss:$8 sps:$4 sm:$0xff]  }
 0x941   : > { %3970 = vmatpush2.bf16.msra.mxu0 %v8650_v55  ;;  %4171 = vmatpush2.bf16.msra.mxu1 %v8698_v51  ;;  %v8763_v55 = vld [vmem:[#allocation12 + $0x2e4] ss:$8 sps:$4 sm:$0xff]   ;;  %v8752_v51 = vld [vmem:[#allocation12 + $0x320] ss:$8 sps:$4 sm:$0xff]  }
 0x942   : > { %3971 = vmatprep.subr.bf16.mxu0 %v8655_v58  ;;  %4172 = vmatprep.subr.bf16.mxu1 %v8703_v56  ;;  %v8760_v58 = vld [vmem:[#allocation12 + $0x314] ss:$8 sps:$4 sm:$0xff]   ;;  %v8761_v56 = vld [vmem:[#allocation12 + $0x2e0] ss:$8 sps:$4 sm:$0xff]  }
 0x945   : > { %3972 = vmatpush2.bf16.msra.mxu0 %v8653_v1  ;;  %4173 = vmatpush2.bf16.msra.mxu1 %v8701_v2  ;;  %v8769_v1 = vld [vmem:[#allocation12 + $0x2d4] ss:$8 sps:$4 sm:$0xff]   ;;  %v8758_v2 = vld [vmem:[#allocation12 + $0x310] ss:$8 sps:$4 sm:$0xff]  }
 0x946   : > { %3973 = vmatprep.subr.bf16.mxu0 %v8658_v3  ;;  %4174 = vmatprep.subr.bf16.mxu1 %v8706_v4  ;;  %v8766_v3 = vld [vmem:[#allocation12 + $0x304] ss:$8 sps:$4 sm:$0xff]   ;;  %v8767_v4 = vld [vmem:[#allocation12 + $0x2d0] ss:$8 sps:$4 sm:$0xff]  }
 0x949   : > { %3974 = vmatpush2.bf16.msra.mxu0 %v8656_v5  ;;  %4175 = vmatpush2.bf16.msra.mxu1 %v8704_v49  ;;  %v8775_v5 = vld [vmem:[#allocation12 + $0x2c4] ss:$8 sps:$4 sm:$0xff]   ;;  %v8764_v49 = vld [vmem:[#allocation12 + $0x300] ss:$8 sps:$4 sm:$0xff]  }
 0x94a   : > { %3975 = vmatprep.subr.bf16.mxu0 %v8661_v6  ;;  %4176 = vmatprep.subr.bf16.mxu1 %v8709_v8  ;;  %v8772_v6 = vld [vmem:[#allocation12 + $0x3f4] ss:$8 sps:$4 sm:$0xff]   ;;  %v8773_v8 = vld [vmem:[#allocation12 + $0x2c0] ss:$8 sps:$4 sm:$0xff]  }
 0x94d   : > { %3976 = vmatpush2.bf16.msra.mxu0 %v8659_v9  ;;  %4177 = vmatpush2.bf16.msra.mxu1 %v8707_v10  ;;  %v8781_v9 = vld [vmem:[#allocation12 + $0x2b4] ss:$8 sps:$4 sm:$0xff]   ;;  %v8770_v10 = vld [vmem:[#allocation12 + $0x3f0] ss:$8 sps:$4 sm:$0xff]  }
 0x94e   : > { %3977 = vmatprep.subr.bf16.mxu0 %v8664_v11  ;;  %4178 = vmatprep.subr.bf16.mxu1 %v8712_v13  ;;  %v8778_v11 = vld [vmem:[#allocation12 + $0x3e4] ss:$8 sps:$4 sm:$0xff]   ;;  %v8776_v13 = vld [vmem:[#allocation12 + $0x3e0] ss:$8 sps:$4 sm:$0xff]  }
 0x951   : > { %3978 = vmatpush2.bf16.msra.mxu0 %v8662_v12  ;;  %4179 = vmatpush2.bf16.msra.mxu1 %v8710_v14  ;;  %v8779_v12 = vld [vmem:[#allocation12 + $0x2b0] ss:$8 sps:$4 sm:$0xff]   ;;  %v8784_v14 = vld [vmem:[#allocation12 + $0x3d4] ss:$8 sps:$4 sm:$0xff]  }
 0x952   : > { %7627 = vmatprep.subr.msk.bf16.mxu0 %vm3624_vm10, %v10480_v7  ;;  %4430 = vmatprep.subr.bf16.mxu1 %v8715_v15  ;;  %v8782_v15 = vld [vmem:[#allocation12 + $0x3d0] ss:$8 sps:$4 sm:$0xff]  }
 0x9d4   : > { %v3665_v16 = vpop.f32.mrf.mxu0  ;;  %v3745_v17 = vpop.f32.mrf.mxu1 }
 0x9d5   : > { %v3672_v18 = vpack.c.bf16 %v3665_v16, %v3665_v16  ;;  %v3752_v57 = vpack.c.bf16 %v3745_v17, %v3745_v17  ;;  %v8787_v16 = vld [vmem:[#allocation12 + $0x2a4] ss:$8 sps:$4 sm:$0xff]  }
 0x9d6   : > { %v3667_v59 = vpop.f32.mrf.mxu0  ;;  %v3747_v63 = vpop.f32.mrf.mxu1  ;;  %v8790_v17 = vld [vmem:[#allocation12 + $0x3c4] ss:$8 sps:$4 sm:$0xff]  }
 0x9d7   : > { %v3673_v19 = vpack.c.bf16 %v3667_v59, %v3667_v59  ;;  %v3753_v60 = vpack.c.bf16 %v3747_v63, %v3747_v63  ;;  %v8788_v59 = vld [vmem:[#allocation12 + $0x3c0] ss:$8 sps:$4 sm:$0xff]   ;;  %v8793_v63 = vld [vmem:[#allocation12 + $0x294] ss:$8 sps:$4 sm:$0xff]  }
 0x9d8   : > { %v3749_v20 = vpop.f32.mrf.mxu1  ;;  %v3669_v21 = vpop.f32.mrf.mxu0 }
 0x9d9   : > { %3979 = vmatprep.mubr.bf16.mxu0 %v3753_v60  ;;  %4180 = vmatprep.mubr.bf16.mxu1 %v3673_v19  ;;  %v8796_v19 = vld [vmem:[#allocation12 + $0x3b4] ss:$8 sps:$4 sm:$0xff]   ;;  %v8791_v60 = vld [vmem:[#allocation12 + $0x290] ss:$8 sps:$4 sm:$0xff]   ;;  %v8799_v20 = vld [vmem:[#allocation12 + $0x284] ss:$8 sps:$4 sm:$0xff]  }
 0x9da   : > { %v3750_v27 = vpop.f32.mrf.mxu1  ;;  %3980 = vmatmul.mubr.bf16.vlgmr.msra.gmra.mxu0 %v3752_v57  ;;  %4181 = vmatmul.mubr.bf16.vlgmr.msra.gmra.mxu1 %v3672_v18  ;;  %v3670_v28 = vpop.f32.mrf.mxu0  ;;  %v8785_v18 = vld [vmem:[#allocation12 + $0x2a0] ss:$8 sps:$4 sm:$0xff]   ;;  %v8794_v57 = vld [vmem:[#allocation12 + $0x3b0] ss:$8 sps:$4 sm:$0xff]   ;;  %v8802_v21 = vld [vmem:[#allocation12 + $0x3a4] ss:$8 sps:$4 sm:$0xff]  }
 0x9db   : > { %4209 = vmatpush1.bf16.msra.mxu0 %v10487_v53  ;;  %4226 = vmatprep.mubr.bf16.mxu0 %v9353_v25  ;;  %v8805_v27 = vld [vmem:[#allocation12 + $0x394] ss:$8 sps:$4 sm:$0xff]   ;;  %v8803_v28 = vld [vmem:[#allocation12 + $0x390] ss:$8 sps:$4 sm:$0xff]  }
 0x9dc   : > { %7661 = vmatprep.subr.msk.bf16.mxu0 %vm3624_vm10, %v10480_v7  ;;  %4431 = vmatpush1.bf16.msra.mxu1 %v8713_v23  ;;  %v8733_v7 = vld [vmem:[#allocation12 + $0x234] ss:$8 sps:$4 sm:$0xff]   ;;  %v8797_v23 = vld [vmem:[#allocation12 + $0x280] ss:$8 sps:$4 sm:$0xff]  }
 0x9dd   : > { %4432 = vmatprep.subr.bf16.mxu1 %v8718_v24  ;;  %v8800_v24 = vld [vmem:[#allocation12 + $0x3a0] ss:$8 sps:$4 sm:$0xff]  }
 0x9e0   : > { %4433 = vmatpush1.bf16.msra.mxu1 %v8716_v29  ;;  %v8808_v29 = vld [vmem:[#allocation12 + $0x384] ss:$8 sps:$4 sm:$0xff]  }
 0x9e1   : > { %4434 = vmatprep.subr.bf16.mxu1 %v8721_v30  ;;  %v8806_v30 = vld [vmem:[#allocation12 + $0x380] ss:$8 sps:$4 sm:$0xff]  }
 0x9e2   : > { %7628 = vmatmul.mubr.msk.bf16.vlgmr.msra.gmra.mxu0 %vm3620_vm11, %v4190_v31  ;;  %v4788_v31 = vld [vmem:[%s11205_s13 + $0xf8] sm:$0xff] }
 0x9e3   : > { %4493 = vmatpush1.bf16.msra.mxu0 %v10487_v53  ;;  %4510 = vmatprep.mubr.bf16.mxu0 %v9353_v25  ;;  %v8736_v53 = vld [vmem:[#allocation12 + $0x354] ss:$8 sps:$4 sm:$0xff]  }
 0x9e4   : > { %4714 = vmatprep.subr.bf16.mxu0 %v8724_v33  ;;  %4435 = vmatpush1.bf16.msra.mxu1 %v8719_v32 }
 0x9e5   : > { %4436 = vmatprep.subr.bf16.mxu1 %v8727_v34 }
 0x9e8   : > { %4437 = vmatpush1.bf16.msra.mxu1 %v8725_v35 }
 0x9e9   : > { %4438 = vmatprep.subr.bf16.mxu1 %v8733_v7 }
 0x9ea   : > { %7662 = vmatmul.mubr.msk.bf16.vlgmr.msra.gmra.mxu0 %vm3620_vm11, %v4474_v36 }
 0x9eb   : > { %4715 = vmatpush1.bf16.msra.mxu0 %v8722_v37 }
 0x9ec   : > { %4716 = vmatprep.subr.bf16.mxu0 %v8730_v38  ;;  %4439 = vmatpush1.bf16.msra.mxu1 %v8731_v39 }
 0x9ed   : > { %4440 = vmatprep.subr.bf16.mxu1 %v8739_v40 }
 0x9ef   : > { %4717 = vmatpush1.bf16.msra.mxu0 %v8728_v41 }
 0x9f0   : > { %4718 = vmatprep.subr.bf16.mxu0 %v8736_v53  ;;  %4441 = vmatpush1.bf16.msra.mxu1 %v8737_v42 }
 0x9f1   : > { %4442 = vmatprep.subr.bf16.mxu1 %v8745_v43 }
 0x9f3   : > { %4719 = vmatpush1.bf16.msra.mxu0 %v8734_v44 }
 0x9f4   : > { %4720 = vmatprep.subr.bf16.mxu0 %v8742_v45  ;;  %4443 = vmatpush1.bf16.msra.mxu1 %v8743_v46  ;;  %v4772_v45 = vld [vmem:[%s11205_s13 + $0x78] sm:$0xff]  ;;  %v4787_v46 = vld [vmem:[%s11205_s13 + $0xf0] sm:$0xff] }
 0x9f5   : > { %4444 = vmatprep.subr.bf16.mxu1 %v8751_v47 }
 0x9f7   : > { %4721 = vmatpush1.bf16.msra.mxu0 %v8740_v48  ;;  %v4771_v48 = vld [vmem:[%s11205_s13 + $0x70] sm:$0xff] }
 0x9f8   : > { %4722 = vmatprep.subr.bf16.mxu0 %v8748_v50  ;;  %4445 = vmatpush1.bf16.msra.mxu1 %v8749_v22  ;;  %v4786_v50 = vld [vmem:[%s11205_s13 + $0xe8] sm:$0xff] }
 0x9f9   : > { %4446 = vmatprep.subr.bf16.mxu1 %v8757_v52 }
 0x9fb   : > { %4723 = vmatpush1.bf16.msra.mxu0 %v8746_v61 }
 0x9fc   : > { %4724 = vmatprep.subr.bf16.mxu0 %v8754_v26  ;;  %4447 = vmatpush2.bf16.msra.mxu1 %v8755_v54 }
 0x9fd   : > { %4448 = vmatprep.subr.bf16.mxu1 %v8763_v55 }
 0x9ff   : > { %4725 = vmatpush1.bf16.msra.mxu0 %v8752_v51  ;;  %v4770_v51 = vld [vmem:[%s11205_s13 + $0x68] sm:$0xff] }
 0xa00   : > { %4726 = vmatprep.subr.bf16.mxu0 %v8760_v58  ;;  %4449 = vmatpush2.bf16.msra.mxu1 %v8761_v56  ;;  %v4785_v58 = vld [vmem:[%s11205_s13 + $0xe0] sm:$0xff] }
 0xa01   : > { %4450 = vmatprep.subr.bf16.mxu1 %v8769_v1  ;;  %v4769_v56 = vld [vmem:[%s11205_s13 + $0x60] sm:$0xff]  ;;  %v4784_v1 = vld [vmem:[%s11205_s13 + $0xd8] sm:$0xff] }
 0xa03   : > { %4727 = vmatpush1.bf16.msra.mxu0 %v8758_v2  ;;  %v4768_v2 = vld [vmem:[%s11205_s13 + $0x58] sm:$0xff] }
 0xa04   : > { %4728 = vmatprep.subr.bf16.mxu0 %v8766_v3  ;;  %4451 = vmatpush2.bf16.msra.mxu1 %v8767_v4  ;;  %v4783_v3 = vld [vmem:[%s11205_s13 + $0xd0] sm:$0xff] }
 0xa05   : > { %4452 = vmatprep.subr.bf16.mxu1 %v8775_v5  ;;  %v4767_v4 = vld [vmem:[%s11205_s13 + $0x50] sm:$0xff]  ;;  %v4782_v5 = vld [vmem:[%s11205_s13 + $0xc8] sm:$0xff] }
 0xa07   : > { %4729 = vmatpush1.bf16.msra.mxu0 %v8764_v49  ;;  %v4766_v49 = vld [vmem:[%s11205_s13 + $0x48] sm:$0xff] }
 0xa08   : > { %4730 = vmatprep.subr.bf16.mxu0 %v8772_v6  ;;  %4453 = vmatpush2.bf16.msra.mxu1 %v8773_v8  ;;  %v4781_v6 = vld [vmem:[%s11205_s13 + $0xc0] sm:$0xff] }
 0xa09   : > { %4454 = vmatprep.subr.bf16.mxu1 %v8781_v9  ;;  %v4765_v8 = vld [vmem:[%s11205_s13 + $0x40] sm:$0xff]  ;;  %v4780_v9 = vld [vmem:[%s11205_s13 + $0xb8] sm:$0xff] }
 0xa0b   : > { %4731 = vmatpush2.bf16.msra.mxu0 %v8770_v10  ;;  %v4764_v10 = vld [vmem:[%s11205_s13 + $0x38] sm:$0xff] }
 0xa0c   : > { %4732 = vmatprep.subr.bf16.mxu0 %v8778_v11  ;;  %4455 = vmatpush2.bf16.msra.mxu1 %v8779_v12  ;;  %v4779_v11 = vld [vmem:[%s11205_s13 + $0xb0] sm:$0xff] }
 0xa0d   : > { %4456 = vmatprep.subr.bf16.mxu1 %v8787_v16  ;;  %v4763_v12 = vld [vmem:[%s11205_s13 + $0x30] sm:$0xff]  ;;  %v4761_v16 = vld [vmem:[%s11205_s13 + $0x20] sm:$0xff] }
 0xa0f   : > { %4733 = vmatpush2.bf16.msra.mxu0 %v8776_v13  ;;  %v4778_v13 = vld [vmem:[%s11205_s13 + $0xa8] sm:$0xff] }
 0xa10   : > { %4734 = vmatprep.subr.bf16.mxu0 %v8784_v14  ;;  %4457 = vmatpush2.bf16.msra.mxu1 %v8785_v18  ;;  %v4762_v14 = vld [vmem:[%s11205_s13 + $0x28] sm:$0xff]  ;;  %v4760_v18 = vld [vmem:[%s11205_s13 + $0x18] sm:$0xff] }
 0xa11   : > { %4458 = vmatprep.subr.bf16.mxu1 %v8793_v63  ;;  %v4759_v63 = vld [vmem:[%s11205_s13 + $0x10] sm:$0xff] }
 0xa13   : > { %4735 = vmatpush2.bf16.msra.mxu0 %v8782_v15  ;;  %v4777_v15 = vld [vmem:[%s11205_s13 + $0xa0] sm:$0xff] }
 0xa14   : > { %4736 = vmatprep.subr.bf16.mxu0 %v8790_v17  ;;  %4459 = vmatpush2.bf16.msra.mxu1 %v8791_v60  ;;  %v4776_v17 = vld [vmem:[%s11205_s13 + $0x98] sm:$0xff]  ;;  %v4758_v60 = vld [vmem:[%s11205_s13 + $0x8] sm:$0xff] }
 0xa15   : > { %4460 = vmatprep.subr.bf16.mxu1 %v8799_v20  ;;  %v4757_v20 = vld [vmem:[%s11205_s13] sm:$0xff] }
 0xa17   : > { %4737 = vmatpush2.bf16.msra.mxu0 %v8788_v59  ;;  %v4775_v59 = vld [vmem:[%s11205_s13 + $0x90] sm:$0xff] }
 0xa18   : > { %4738 = vmatprep.subr.bf16.mxu0 %v8796_v19  ;;  %4461 = vmatpush2.bf16.msra.mxu1 %v8797_v23  ;;  %v4774_v19 = vld [vmem:[%s11205_s13 + $0x88] sm:$0xff] }
 0xa19   : > { %7990 = vmatprep.subr.mxu1 %v4788_v31 }
 0xa1b   : > { %4739 = vmatpush2.bf16.msra.mxu0 %v8794_v57  ;;  %v4773_v57 = vld [vmem:[%s11205_s13 + $0x80] sm:$0xff] }
 0xa1c   : > { %4740 = vmatprep.subr.bf16.mxu0 %v8802_v21 }
 0xa1f   : > { %4741 = vmatpush2.bf16.msra.mxu0 %v8800_v24 }
 0xa20   : > { %4742 = vmatprep.subr.bf16.mxu0 %v8805_v27 }
 0xa23   : > { %4743 = vmatpush2.bf16.msra.mxu0 %v8803_v28 }
 0xa24   : > { %4744 = vmatprep.subr.bf16.mxu0 %v8808_v29 }
 0xa27   : > { %4745 = vmatpush2.bf16.msra.mxu0 %v8806_v30 }
 0xa28   : > { %8025 = vmatprep.subr.mxu0 %v4788_v31 }
 0xa9a   : > { %v3981_v32 = vpop.f32.mrf.mxu0  ;;  %v4182_v33 = vpop.f32.mrf.mxu1 }
 0xa9b   : > { %v10506_v34 = vadd.f32 %v4182_v33, %v3981_v32 }
 0xa9c   : > { %v3983_v35 = vpop.f32.mrf.mxu0  ;;  %v4184_v7 = vpop.f32.mrf.mxu1 }
 0xa9d   : > { %v10508_v36 = vadd.f32 %v4184_v7, %v3983_v35 }
 0xa9e   : > { %v3985_v37 = vpop.f32.mrf.mxu0  ;;  %v4186_v38 = vpop.f32.mrf.mxu1 }
 0xaa0   : > { %v3986_v39 = vpop.f32.mrf.mxu0  ;;  %v4187_v40 = vpop.f32.mrf.mxu1 }
 0xaa2   : > { %v4228_v41 = vpop.f32.mrf.mxu0 }
 0xaa3   : > { %v4235_v43 = vpack.c.bf16 %v4228_v41, %v4228_v41 }
 0xaa4   : > { %v4230_v53 = vpop.f32.mrf.mxu0 }
 0xaa5   : > { %v4236_v42 = vpack.c.bf16 %v4230_v53, %v4230_v53 }
 0xaa6   : > { %v4232_v44 = vpop.f32.mrf.mxu0 }
 0xaa7   : > { %4462 = vmatprep.mubr.bf16.mxu1 %v4236_v42 }
 0xaa8   : > { %v4233_v47 = vpop.f32.mrf.mxu0  ;;  %4463 = vmatmul.mubr.bf16.vlgmr.msra.gmra.mxu1 %v4235_v43 }
 0xaa9   : > { %7991 = vmatpush3.msra.mxu1 %v4772_v45 }
 0xaaa   : > { %v4512_v22 = vpop.f32.mrf.mxu0  ;;  %7992 = vmatprep.subr.mxu1 %v4787_v46 }
 0xaab   : > { %7993 = vmatpush3.msra.mxu1 %v4771_v48  ;;  %v4519_v26 = vpack.c.bf16 %v4512_v22, %v4512_v22 }
 0xaac   : > { %v4514_v52 = vpop.f32.mrf.mxu0  ;;  %7994 = vmatprep.subr.mxu1 %v4786_v50 }
 0xaad   : > { %v4520_v61 = vpack.c.bf16 %v4514_v52, %v4514_v52  ;;  %7995 = vmatpush3.msra.mxu1 %v4770_v51 }
 0xaae   : > { %v4516_v54 = vpop.f32.mrf.mxu0  ;;  %7996 = vmatprep.subr.mxu1 %v4785_v58 }
 0xaaf   : > { %4746 = vmatprep.mubr.bf16.mxu0 %v4520_v61  ;;  %7997 = vmatpush3.msra.mxu1 %v4769_v56 }
 0xab0   : > { %v4517_v55 = vpop.f32.mrf.mxu0  ;;  %4747 = vmatmul.mubr.bf16.vlgmr.msra.gmra.mxu0 %v4519_v26  ;;  %7998 = vmatprep.subr.mxu1 %v4784_v1 }
 0xab1   : > { %8026 = vmatpush3.msra.mxu0 %v4772_v45  ;;  %7999 = vmatpush3.msra.mxu1 %v4768_v2 }
 0xab2   : > { %8027 = vmatprep.subr.mxu0 %v4787_v46  ;;  %8000 = vmatprep.subr.mxu1 %v4783_v3 }
 0xab3   : > { %8028 = vmatpush3.msra.mxu0 %v4771_v48  ;;  %8001 = vmatpush3.msra.mxu1 %v4767_v4 }
 0xab4   : > { %8029 = vmatprep.subr.mxu0 %v4786_v50  ;;  %8002 = vmatprep.subr.mxu1 %v4782_v5 }
 0xab5   : > { %8030 = vmatpush3.msra.mxu0 %v4770_v51  ;;  %8003 = vmatpush3.msra.mxu1 %v4766_v49 }
 0xab6   : > { %8031 = vmatprep.subr.mxu0 %v4785_v58  ;;  %8004 = vmatprep.subr.mxu1 %v4781_v6 }
 0xab7   : > { %8032 = vmatpush3.msra.mxu0 %v4769_v56  ;;  %8005 = vmatpush3.msra.mxu1 %v4765_v8 }
 0xab8   : > { %8033 = vmatprep.subr.mxu0 %v4784_v1  ;;  %8006 = vmatprep.subr.mxu1 %v4780_v9 }
 0xab9   : > { %8034 = vmatpush3.msra.mxu0 %v4768_v2  ;;  %8007 = vmatpush3.msra.mxu1 %v4764_v10 }
 0xaba   : > { %8035 = vmatprep.subr.mxu0 %v4783_v3  ;;  %8008 = vmatprep.subr.mxu1 %v4779_v11 }
 0xabb   : > { %8036 = vmatpush3.msra.mxu0 %v4767_v4  ;;  %8009 = vmatpush3.msra.mxu1 %v4763_v12 }
 0xabc   : > { %8037 = vmatprep.subr.mxu0 %v4782_v5  ;;  %8010 = vmatprep.subr.mxu1 %v4778_v13 }
 0xabd   : > { %8038 = vmatpush3.msra.mxu0 %v4766_v49  ;;  %8011 = vmatpush3.msra.mxu1 %v4762_v14  ;;  %v4804_v49 = vld [vmem:[#allocation13 + $0x78] sm:$0xff] }
 0xabe   : > { %8039 = vmatprep.subr.mxu0 %v4781_v6  ;;  %8012 = vmatprep.subr.mxu1 %v4777_v15  ;;  %v10621_v6 = vld [vmem:[#allocation13 + $0x70] sm:$0xff] }
 0xabf   : > { %8040 = vmatpush3.msra.mxu0 %v4765_v8  ;;  %8013 = vmatpush3.msra.mxu1 %v4761_v16  ;;  %v10623_v8 = vld [vmem:[#allocation13 + $0x68] sm:$0xff] }
 0xac0   : > { %8041 = vmatprep.subr.mxu0 %v4780_v9  ;;  %8014 = vmatprep.subr.mxu1 %v4776_v17  ;;  %v10625_v9 = vld [vmem:[#allocation13 + $0x60] sm:$0xff] }
 0xac1   : > { %8042 = vmatpush3.msra.mxu0 %v4764_v10  ;;  %8015 = vmatpush3.msra.mxu1 %v4760_v18  ;;  %v10628_v10 = vld [vmem:[#allocation13 + $0x58] sm:$0xff] }
 0xac2   : > { %8043 = vmatprep.subr.mxu0 %v4779_v11  ;;  %8016 = vmatprep.subr.mxu1 %v4775_v59  ;;  %v10632_v11 = vld [vmem:[#allocation13 + $0x50] sm:$0xff] }
 0xac3   : > { %8044 = vmatpush3.msra.mxu0 %v4763_v12  ;;  %8017 = vmatpush3.msra.mxu1 %v4759_v63  ;;  %v4798_v12 = vld [vmem:[#allocation13 + $0x48] sm:$0xff] }
 0xac4   : > { %8045 = vmatprep.subr.mxu0 %v4778_v13  ;;  %8018 = vmatprep.subr.mxu1 %v4774_v19  ;;  %v4797_v13 = vld [vmem:[#allocation13 + $0x40] sm:$0xff] }
 0xac5   : > { %8046 = vmatpush3.msra.mxu0 %v4762_v14  ;;  %8019 = vmatpush3.msra.mxu1 %v4758_v60  ;;  %v4796_v14 = vld [vmem:[#allocation13 + $0x38] sm:$0xff] }
 0xac6   : > { %8047 = vmatprep.subr.mxu0 %v4777_v15  ;;  %8020 = vmatprep.subr.mxu1 %v4773_v57  ;;  %v4795_v15 = vld [vmem:[#allocation13 + $0x30] sm:$0xff] }
 0xac7   : > { %8048 = vmatpush3.msra.mxu0 %v4761_v16  ;;  %8021 = vmatpush3.msra.mxu1 %v4757_v20  ;;  %v4794_v16 = vld [vmem:[#allocation13 + $0x28] sm:$0xff] }
 0xac8   : > { %8049 = vmatprep.subr.mxu0 %v4776_v17  ;;  %5006 = vmatprep.subr.mxu1 %v4804_v49  ;;  %v4793_v17 = vld [vmem:[#allocation13 + $0x20] sm:$0xff] }
 0xac9   : > { %8050 = vmatpush3.msra.mxu0 %v4760_v18  ;;  %v4792_v18 = vld [vmem:[#allocation13 + $0x18] sm:$0xff] }
 0xaca   : > { %8051 = vmatprep.subr.mxu0 %v4775_v59  ;;  %v4791_v59 = vld [vmem:[#allocation13 + $0x10] sm:$0xff] }
 0xacb   : > { %8052 = vmatpush3.msra.mxu0 %v4759_v63  ;;  %v4790_v63 = vld [vmem:[#allocation13 + $0x8] sm:$0xff] }
 0xacc   : > { %8053 = vmatprep.subr.mxu0 %v4774_v19  ;;  %v4789_v19 = vld [vmem:[#allocation13] sm:$0xff] }
 0xacd   : > { %8054 = vmatpush3.msra.mxu0 %v4758_v60 }
 0xace   : > { %8055 = vmatprep.subr.mxu0 %v4773_v57 }
 0xacf   : > { %8056 = vmatpush3.msra.mxu0 %v4757_v20 }
 0xad0   : > { %5080 = vmatprep.subr.mxu0 %v4804_v49 }
 0xb68   : > { %v4464_v21 = vpop.f32.mrf.mxu1 }
 0xb69   : > { %v4471_v28 = vadd.f32 %v4464_v21, %v10506_v34 }
 0xb6a   : > { %v4466_v23 = vpop.f32.mrf.mxu1 }
 0xb6b   : > { %v4472_v30 = vadd.f32 %v4466_v23, %v10508_v36 }
 0xb6c   : > { %v4468_v24 = vpop.f32.mrf.mxu1 }
 0xb6e   : > { %v4469_v27 = vpop.f32.mrf.mxu1 }
 0xb70   : > { %v4748_v29 = vpop.f32.mrf.mxu0 }
 0xb71   : > { %v10605_v31 = vadd.f32 %v4748_v29, %v4471_v28 }
 0xb72   : > { %v4750_v32 = vpop.f32.mrf.mxu0 }
 0xb73   : > { %v4805_v33 = vsel %vm3624_vm10, %v10605_v31, 0.0  ;;  %v4889_v35 = vmul.f32 %v10605_v31, %v10605_v31  ;;  %v10611_v7 = vadd.f32 %v4750_v32, %v4472_v30 }
 0xb74   : > { %v4806_v37 = vrot.slane %v4805_v33, 4  ;;  %v4752_v38 = vpop.f32.mrf.mxu0 }
 0xb75   : > { %v4891_v39 = vsel %vm3624_vm10, %v4889_v35, 0.0  ;;  %v4812_v34 = vsel %vm3624_vm10, %v10611_v7, 0.0  ;;  %v4890_v36 = vmul.f32 %v10611_v7, %v10611_v7  ;;  %v4982_v38 = vld [vmem:[#allocation15 + $0x1] sm:$0x1] }
 0xb76   : > { %v4807_v40 = vadd.f32 %v4806_v37, %v4805_v33  ;;  %v4892_v41 = vrot.slane %v4891_v39, 4  ;;  %v4813_v53 = vrot.slane %v4812_v34, 4  ;;  %v4753_v42 = vpop.f32.mrf.mxu0  ;;  %v4981_v33 = vld [vmem:[#allocation15] sm:$0x1] }
 0xb77   : > { %v4898_v43 = vsel %vm3624_vm10, %v4890_v36, 0.0  ;;  %v4983_v36 = vld [vmem:[#allocation15 + $0x2] sm:$0x1] }
 0xb78   : > { %v4808_v44 = vrot.slane %v4807_v40, 2  ;;  %v4893_v45 = vadd.f32 %v4892_v41, %v4891_v39  ;;  %v4814_v46 = vadd.f32 %v4813_v53, %v4812_v34  ;;  %v4899_v47 = vrot.slane %v4898_v43, 4 }
 0xb7a   : > { %v4809_v48 = vadd.f32 %v4808_v44, %v4807_v40  ;;  %v4894_v50 = vrot.slane %v4893_v45, 2  ;;  %v4815_v22 = vrot.slane %v4814_v46, 2  ;;  %v4900_v52 = vadd.f32 %v4899_v47, %v4898_v43 }
 0xb7c   : > { %v4816_v61 = vadd.f32 %v4815_v22, %v4814_v46  ;;  %v4901_v26 = vrot.slane %v4900_v52, 2  ;;  %v4895_v54 = vadd.f32 %v4894_v50, %v4893_v45  ;;  %v4810_v55 = vrot.slane %v4809_v48, 1 }
 0xb7e   : > { %v4817_v51 = vrot.slane %v4816_v61, 1  ;;  %v4902_v58 = vadd.f32 %v4901_v26, %v4900_v52  ;;  %v4896_v56 = vrot.slane %v4895_v54, 1  ;;  %v4811_v3 = vadd.f32 %v4810_v55, %v4809_v48 }
 0xb80   : > { %v4818_v1 = vadd.f32 %v4817_v51, %v4816_v61  ;;  %v4903_v2 = vrot.slane %v4902_v58, 1  ;;  %v4897_v5 = vadd.f32 %v4896_v56, %v4895_v54 }
 0xb82   : > { %4883 = vmatprep.mubr.f32.mxu1 %v4818_v1  ;;  %v4904_v4 = vadd.f32 %v4903_v2, %v4902_v58  ;;  %v8811_v2 = vld [vmem:[#allocation18 + $0x174] ss:$8 sps:$4 sm:$0xff]  }
 0xb83   : > { %4884 = vmatmul.mubr.f32.vlgmr.msra.gmra.mxu1 %v4811_v3 }
 0xb84   : > { %4969 = vmatprep.mubr.f32.mxu0 %v4904_v4  ;;  %5054 = vmatprep.mubr.f32.mxu1 %v9351_v0  ;;  %v5245_v4 = vld [vmem:[#allocation16] sm:$0x1] }
 0xb85   : > { %4970 = vmatmul.mubr.f32.vlgmr.msra.gmra.mxu0 %v4897_v5  ;;  %5007 = vmatpush1.msra.mxu1 %v10621_v6  ;;  %v5333_v5 = vld [vmem:[#allocation16 + $0x1] sm:$0x1] }
 0xb86   : > { %5128 = vmatprep.mubr.f32.mxu0 %v9351_v0  ;;  %5081 = vmatpush1.msra.mxu0 %v10621_v6 }
 0xb87   : > { %5008 = vmatprep.subr.mxu1 %v10623_v8  ;;  %5082 = vmatprep.subr.mxu0 %v10623_v8 }
 0xb88   : > { %5009 = vmatpush1.msra.mxu1 %v10625_v9  ;;  %5083 = vmatpush1.msra.mxu0 %v10625_v9 }
 0xb89   : > { %5010 = vmatprep.subr.mxu1 %v10628_v10  ;;  %5084 = vmatprep.subr.mxu0 %v10628_v10 }
 0xb8a   : > { %5011 = vmatpush1.msra.mxu1 %v10632_v11  ;;  %5085 = vmatpush1.msra.mxu0 %v10632_v11 }
 0xb8b   : > { %5012 = vmatprep.subr.mxu1 %v4798_v12  ;;  %5086 = vmatprep.subr.mxu0 %v4798_v12 }
 0xb8c   : > { %5013 = vmatpush1.msra.mxu1 %v4797_v13  ;;  %5087 = vmatpush1.msra.mxu0 %v4797_v13 }
 0xb8d   : > { %5014 = vmatprep.subr.mxu1 %v4796_v14  ;;  %5088 = vmatprep.subr.mxu0 %v4796_v14 }
 0xb8e   : > { %5015 = vmatpush1.msra.mxu1 %v4795_v15  ;;  %5089 = vmatpush1.msra.mxu0 %v4795_v15 }
 0xb8f   : > { %5016 = vmatprep.subr.mxu1 %v4794_v16  ;;  %5090 = vmatprep.subr.mxu0 %v4794_v16 }
 0xb90   : > { %5017 = vmatpush1.msra.mxu1 %v4793_v17  ;;  %5091 = vmatpush1.msra.mxu0 %v4793_v17 }
 0xb91   : > { %5018 = vmatprep.subr.mxu1 %v4792_v18  ;;  %5092 = vmatprep.subr.mxu0 %v4792_v18 }
 0xb92   : > { %5019 = vmatpush1.msra.mxu1 %v4791_v59  ;;  %5093 = vmatpush1.msra.mxu0 %v4791_v59 }
 0xb93   : > { %5020 = vmatprep.subr.mxu1 %v4790_v63  ;;  %5094 = vmatprep.subr.mxu0 %v4790_v63 }
 0xb94   : > { %5021 = vmatpush1.msra.mxu1 %v4789_v19  ;;  %5095 = vmatpush1.msra.mxu0 %v4789_v19 }
 0xb95   : > { %5154 = vmatprep.subr.mxu1 %v4804_v49  ;;  %v8809_v49 = vld [vmem:[#allocation18 + $0x170] ss:$8 sps:$4 sm:$0xff]  }
 0xc43   : > { %v8022_v60 = vpop.f32.mrf.mxu1 }
 0xc45   : > { %v8023_v57 = vpop.f32.mrf.mxu1  ;;  %v8057_v20 = vpop.f32.mrf.mxu0 }
 0xc46   : > { %v8024_v21 = vadd.f32 %v8023_v57, %v8022_v60  ;;  %v8821_v60 = vld [vmem:[#allocation18 + $0x130] ss:$8 sps:$4 sm:$0xff]  }
 0xc47   : > { %v8058_v23 = vpop.f32.mrf.mxu0  ;;  %v8869_v57 = vld [vmem:[#allocation18 + $0x30] ss:$8 sps:$4 sm:$0xff]  }
 0xc48   : > { %v4975_v24 = vmul.f32 0.0625, %v8024_v21  ;;  %v8059_v27 = vadd.f32 %v8058_v23, %v8057_v20  ;;  %v8826_v20 = vld [vmem:[#allocation18 + $0x124] ss:$8 sps:$4 sm:$0xff]   ;;  %v8824_v23 = vld [vmem:[#allocation18 + $0x120] ss:$8 sps:$4 sm:$0xff]  }
 0xc49   : > { %v8874_v21 = vld [vmem:[#allocation18 + $0x24] ss:$8 sps:$4 sm:$0xff]  }
 0xc4a   : > { %v4977_v28 = vmul.f32 %v4975_v24, %v4975_v24  ;;  %v4976_v29 = vmul.f32 0.0625, %v8059_v27  ;;  %v8829_v27 = vld [vmem:[#allocation18 + $0x114] ss:$8 sps:$4 sm:$0xff]  }
 0xc4c   : > { %v4978_v30 = vsub.f32 %v4976_v29, %v4977_v28  ;;  %v8877_v28 = vld [vmem:[#allocation18 + $0x14] ss:$8 sps:$4 sm:$0xff]   ;;  %v8827_v29 = vld [vmem:[#allocation18 + $0x110] ss:$8 sps:$4 sm:$0xff]  }
 0xc4e   : > { %v4979_v32 = vadd.f32 1e-05, %v4978_v30  ;;  %v8875_v30 = vld [vmem:[#allocation18 + $0x10] ss:$8 sps:$4 sm:$0xff]  }
 0xc50   : > { %9005 = vrsqrt.f32 %v4979_v32  ;;  %v8832_v32 = vld [vmem:[#allocation18 + $0x104] ss:$8 sps:$4 sm:$0xff]  }
 0xc5d   : > { %v9006_v35 = vpop.eup %9005 }
 0xc5e   : > { %v4984_v37 = vmul.f32 %v9006_v35, %v4981_v33  ;;  %v8880_v33 = vld [vmem:[#allocation18 + $0x4] ss:$8 sps:$4 sm:$0xff]   ;;  %v8830_v35 = vld [vmem:[#allocation18 + $0x100] ss:$8 sps:$4 sm:$0xff]  }
 0xc60   : > { %7695 = vmatmul.mubr.msk.f32.vlgmr.msra.gmra.mxu1 %vm1087_vm2, %v4984_v37  ;;  %v4985_v39 = vmul.f32 %v4984_v37, %v4975_v24  ;;  %v8872_v24 = vld [vmem:[#allocation18 + $0x20] ss:$8 sps:$4 sm:$0xff]  }
 0xc61   : > { %5155 = vmatpush1.msra.mxu1 %v10621_v6  ;;  %5202 = vmatprep.mubr.f32.mxu1 %v9351_v0  ;;  %v8857_v6 = vld [vmem:[#allocation18 + $0x70] ss:$8 sps:$4 sm:$0xff]   ;;  %v8878_v37 = vld [vmem:[#allocation18] ss:$8 sps:$4 sm:$0xff]  }
 0xc62   : > { %5156 = vmatprep.subr.mxu1 %v10623_v8  ;;  %v4986_v34 = vsub.f32 %v4982_v38, %v4985_v39  ;;  %v8814_v8 = vld [vmem:[#allocation18 + $0x164] ss:$8 sps:$4 sm:$0xff]   ;;  %v8835_v38 = vld [vmem:[#allocation18 + $0x1f4] ss:$8 sps:$4 sm:$0xff]  }
 0xc63   : > { %5157 = vmatpush1.msra.mxu1 %v10625_v9  ;;  %v8862_v9 = vld [vmem:[#allocation18 + $0x64] ss:$8 sps:$4 sm:$0xff]   ;;  %v8883_v39 = vld [vmem:[#allocation18 + $0xf4] ss:$8 sps:$4 sm:$0xff]  }
 0xc64   : > { %5158 = vmatprep.subr.mxu1 %v10628_v10  ;;  %7696 = vmatmul.mubr.msk.f32.vlgmr.msra.gmra.mxu0 %vm1087_vm2, %v4986_v34  ;;  %v8812_v10 = vld [vmem:[#allocation18 + $0x160] ss:$8 sps:$4 sm:$0xff]   ;;  %v8833_v34 = vld [vmem:[#allocation18 + $0x1f0] ss:$8 sps:$4 sm:$0xff]  }
 0xc65   : > { %5159 = vmatpush1.msra.mxu1 %v10632_v11  ;;  %5289 = vmatprep.mubr.bf16.mxu0 %v9353_v25  ;;  %v8860_v11 = vld [vmem:[#allocation18 + $0x60] ss:$8 sps:$4 sm:$0xff]  }
 0xc66   : > { %5160 = vmatprep.subr.mxu1 %v4798_v12  ;;  %v8817_v12 = vld [vmem:[#allocation18 + $0x154] ss:$8 sps:$4 sm:$0xff]  }
 0xc67   : > { %5161 = vmatpush1.msra.mxu1 %v4797_v13  ;;  %v8865_v13 = vld [vmem:[#allocation18 + $0x54] ss:$8 sps:$4 sm:$0xff]  }
 0xc68   : > { %5162 = vmatprep.subr.mxu1 %v4796_v14  ;;  %v8815_v14 = vld [vmem:[#allocation18 + $0x150] ss:$8 sps:$4 sm:$0xff]  }
 0xc69   : > { %5163 = vmatpush1.msra.mxu1 %v4795_v15  ;;  %v8863_v15 = vld [vmem:[#allocation18 + $0x50] ss:$8 sps:$4 sm:$0xff]  }
 0xc6a   : > { %5164 = vmatprep.subr.mxu1 %v4794_v16  ;;  %v8820_v16 = vld [vmem:[#allocation18 + $0x144] ss:$8 sps:$4 sm:$0xff]  }
 0xc6b   : > { %5165 = vmatpush1.msra.mxu1 %v4793_v17  ;;  %v8868_v17 = vld [vmem:[#allocation18 + $0x44] ss:$8 sps:$4 sm:$0xff]  }
 0xc6c   : > { %5166 = vmatprep.subr.mxu1 %v4792_v18  ;;  %v8818_v18 = vld [vmem:[#allocation18 + $0x140] ss:$8 sps:$4 sm:$0xff]  }
 0xc6d   : > { %5167 = vmatpush1.msra.mxu1 %v4791_v59  ;;  %v8866_v59 = vld [vmem:[#allocation18 + $0x40] ss:$8 sps:$4 sm:$0xff]  }
 0xc6e   : > { %5168 = vmatprep.subr.mxu1 %v4790_v63  ;;  %v8823_v63 = vld [vmem:[#allocation18 + $0x134] ss:$8 sps:$4 sm:$0xff]  }
 0xc6f   : > { %5169 = vmatpush1.msra.mxu1 %v4789_v19  ;;  %v8871_v19 = vld [vmem:[#allocation18 + $0x34] ss:$8 sps:$4 sm:$0xff]  }
 0xc70   : > { %7697 = vmatmul.mubr.msk.f32.vlgmr.msra.gmra.mxu1 %vm1087_vm2, %v4983_v36  ;;  %v8881_v36 = vld [vmem:[#allocation18 + $0xf0] ss:$8 sps:$4 sm:$0xff]  }
 0xc71   : > { %5369 = vmatprep.mubr.bf16.mxu1 %v9353_v25 }
 0xd20   : > { %v5056_v40 = vpop.f32.mrf.mxu1 }
 0xd21   : > { %v5212_v42 = vrot.slane %v5056_v40, %v9936_v62  ;;  %v8838_v40 = vld [vmem:[#allocation18 + $0x1e4] ss:$8 sps:$4 sm:$0xff]  }
 0xd22   : > { %v5058_v53 = vpop.f32.mrf.mxu1 }
 0xd23   : > { %v5216_v44 = vrot.slane %v5058_v53, %v9936_v62  ;;  %v5217_v46 = vmul.f32 %v5212_v42, %v10605_v31  ;;  %v8836_v53 = vld [vmem:[#allocation18 + $0x1e0] ss:$8 sps:$4 sm:$0xff]  }
 0xd24   : > { %v5130_v41 = vpop.f32.mrf.mxu0  ;;  %v8884_v42 = vld [vmem:[#allocation18 + $0xe0] ss:$8 sps:$4 sm:$0xff]  }
 0xd25   : > { %v5222_v45 = vrot.slane %v5130_v41, %v9936_v62  ;;  %v5218_v48 = vmul.f32 %v5216_v44, %v10611_v7  ;;  %v8859_v7 = vld [vmem:[#allocation18 + $0x74] ss:$8 sps:$4 sm:$0xff]   ;;  %v8886_v41 = vld [vmem:[#allocation18 + $0xe4] ss:$8 sps:$4 sm:$0xff]  }
 0xd26   : > { %v5132_v43 = vpop.f32.mrf.mxu0  ;;  %v8889_v44 = vld [vmem:[#allocation18 + $0xd4] ss:$8 sps:$4 sm:$0xff]  }
 0xd27   : > { %v5226_v47 = vrot.slane %v5132_v43, %v9936_v62  ;;  %v5227_v50 = vadd.f32 %v5222_v45, %v5217_v46  ;;  %v8841_v43 = vld [vmem:[#allocation18 + $0x1d4] ss:$8 sps:$4 sm:$0xff]   ;;  %v8839_v45 = vld [vmem:[#allocation18 + $0x1d0] ss:$8 sps:$4 sm:$0xff]  }
 0xd28   : > { %v8887_v46 = vld [vmem:[#allocation18 + $0xd0] ss:$8 sps:$4 sm:$0xff]  }
 0xd29   : > { %v5228_v61 = vadd.f32 %v5226_v47, %v5218_v48  ;;  %vm5229_vm12 = vcmp.ge.f32.partialorder %v5227_v50, 0.0  ;;  %v8844_v47 = vld [vmem:[#allocation18 + $0x1c4] ss:$8 sps:$4 sm:$0xff]  }
 0xd2a   : > { %v8892_v48 = vld [vmem:[#allocation18 + $0xc4] ss:$8 sps:$4 sm:$0xff]  }
 0xd2b   : > { %vm5230_vm13 = vcmp.ge.f32.partialorder %v5228_v61, 0.0 }
 0xd30   : > { %v5204_v22 = vpop.f32.mrf.mxu1 }
 0xd31   : > { %v5234_v52 = vrot.slane %v5204_v22, %v9936_v62  ;;  %v8890_v22 = vld [vmem:[#allocation18 + $0xc0] ss:$8 sps:$4 sm:$0xff]  }
 0xd32   : > { %v5206_v26 = vpop.f32.mrf.mxu1 }
 0xd33   : > { %v5239_v54 = vmul.f32 %v5234_v52, %v5227_v50  ;;  %v5238_v55 = vrot.slane %v5206_v26, %v9936_v62  ;;  %v8847_v52 = vld [vmem:[#allocation18 + $0x1b4] ss:$8 sps:$4 sm:$0xff]   ;;  %v8845_v26 = vld [vmem:[#allocation18 + $0x1b0] ss:$8 sps:$4 sm:$0xff]  }
 0xd35   : > { %v5240_v51 = vmul.f32 %v5238_v55, %v5228_v61  ;;  %v5241_v58 = vsel %vm5229_vm12, %v5227_v50, %v5239_v54  ;;  %v8842_v50 = vld [vmem:[#allocation18 + $0x1c0] ss:$8 sps:$4 sm:$0xff]   ;;  %v8893_v54 = vld [vmem:[#allocation18 + $0xb0] ss:$8 sps:$4 sm:$0xff]   ;;  %v8850_v55 = vld [vmem:[#allocation18 + $0x1a4] ss:$8 sps:$4 sm:$0xff]  }
 0xd36   : > { %v5243_v56 = vpack.c.bf16 %v5241_v58, %v5241_v58  ;;  %v8848_v58 = vld [vmem:[#allocation18 + $0x1a0] ss:$8 sps:$4 sm:$0xff]  }
 0xd37   : > { %v5242_v1 = vsel %vm5230_vm13, %v5228_v61, %v5240_v51  ;;  %v8895_v61 = vld [vmem:[#allocation18 + $0xb4] ss:$8 sps:$4 sm:$0xff]   ;;  %v8898_v51 = vld [vmem:[#allocation18 + $0xa4] ss:$8 sps:$4 sm:$0xff]  }
 0xd38   : > { %v10660_v31 = vpack.c.bf16 %v5242_v1, %v5242_v1  ;;  %v10667_v3 = vsel %vm5250_vm14, %v5243_v56, 0  ;;  %v8896_v56 = vld [vmem:[#allocation18 + $0xa0] ss:$8 sps:$4 sm:$0xff]   ;;  %v8853_v1 = vld [vmem:[#allocation18 + $0x194] ss:$8 sps:$4 sm:$0xff]  }
 0xd3a   : > { %7698 = vmatprep.subr.msk.bf16.mxu0 %vm5250_vm14, %v10660_v31  ;;  %7700 = vmatprep.subr.msk.bf16.mxu1 %vm5250_vm14, %v10660_v31 }
 0xd3b   : > { %5272 = vmatpush1.bf16.msra.mxu0 %v10667_v3  ;;  %5352 = vmatpush1.bf16.msra.mxu1 %v10667_v3 }
 0xd3c   : > { %5573 = vmatprep.subr.bf16.mxu0 %v8811_v2  ;;  %5774 = vmatprep.subr.bf16.mxu1 %v8859_v7  ;;  %v8901_v2 = vld [vmem:[#allocation18 + $0x94] ss:$8 sps:$4 sm:$0xff]   ;;  %v8851_v7 = vld [vmem:[#allocation18 + $0x190] ss:$8 sps:$4 sm:$0xff]  }
 0xd3e   : > { %7699 = vmatmul.mubr.msk.bf16.vlgmr.msra.gmra.mxu0 %vm5246_vm15, %v5245_v4  ;;  %7701 = vmatmul.mubr.msk.bf16.vlgmr.msra.gmra.mxu1 %vm5246_vm15, %v5333_v5  ;;  %v8899_v4 = vld [vmem:[#allocation18 + $0x90] ss:$8 sps:$4 sm:$0xff]   ;;  %v8856_v5 = vld [vmem:[#allocation18 + $0x184] ss:$8 sps:$4 sm:$0xff]  }
 0xd3f   : > { %5574 = vmatpush1.bf16.msra.mxu0 %v8809_v49  ;;  %5775 = vmatpush1.bf16.msra.mxu1 %v8857_v6  ;;  %v8854_v49 = vld [vmem:[#allocation18 + $0x180] ss:$8 sps:$4 sm:$0xff]   ;;  %v8904_v6 = vld [vmem:[#allocation18 + $0x84] ss:$8 sps:$4 sm:$0xff]  }
 0xd40   : > { %5575 = vmatprep.subr.bf16.mxu0 %v8814_v8  ;;  %5776 = vmatprep.subr.bf16.mxu1 %v8862_v9  ;;  %v8902_v8 = vld [vmem:[#allocation18 + $0x80] ss:$8 sps:$4 sm:$0xff]   ;;  %v8907_v9 = vld [vmem:[#allocation18 + $0x274] ss:$8 sps:$4 sm:$0xff]  }
 0xd43   : > { %5576 = vmatpush1.bf16.msra.mxu0 %v8812_v10  ;;  %5777 = vmatpush1.bf16.msra.mxu1 %v8860_v11 }
 0xd44   : > { %5577 = vmatprep.subr.bf16.mxu0 %v8817_v12  ;;  %5778 = vmatprep.subr.bf16.mxu1 %v8865_v13 }
 0xd47   : > { %5578 = vmatpush1.bf16.msra.mxu0 %v8815_v14  ;;  %5779 = vmatpush1.bf16.msra.mxu1 %v8863_v15 }
 0xd48   : > { %5579 = vmatprep.subr.bf16.mxu0 %v8820_v16  ;;  %5780 = vmatprep.subr.bf16.mxu1 %v8868_v17 }
 0xd4b   : > { %5580 = vmatpush1.bf16.msra.mxu0 %v8818_v18  ;;  %5781 = vmatpush1.bf16.msra.mxu1 %v8866_v59 }
 0xd4c   : > { %5581 = vmatprep.subr.bf16.mxu0 %v8823_v63  ;;  %5782 = vmatprep.subr.bf16.mxu1 %v8871_v19  ;;  %v8905_v63 = vld [vmem:[#allocation18 + $0x270] ss:$8 sps:$4 sm:$0xff]   ;;  %v8910_v19 = vld [vmem:[#allocation18 + $0x264] ss:$8 sps:$4 sm:$0xff]  }
 0xd4f   : > { %5582 = vmatpush1.bf16.msra.mxu0 %v8821_v60  ;;  %5783 = vmatpush1.bf16.msra.mxu1 %v8869_v57 }
 0xd50   : > { %5583 = vmatprep.subr.bf16.mxu0 %v8826_v20  ;;  %5784 = vmatprep.subr.bf16.mxu1 %v8874_v21  ;;  %v8908_v20 = vld [vmem:[#allocation18 + $0x260] ss:$8 sps:$4 sm:$0xff]   ;;  %v8913_v21 = vld [vmem:[#allocation18 + $0x254] ss:$8 sps:$4 sm:$0xff]  }
 0xd53   : > { %5584 = vmatpush1.bf16.msra.mxu0 %v8824_v23  ;;  %5785 = vmatpush1.bf16.msra.mxu1 %v8872_v24  ;;  %v5816_v23 = vld [vmem:[#allocation16 + $0x2] sm:$0x1]  ;;  %v8911_v24 = vld [vmem:[#allocation18 + $0x250] ss:$8 sps:$4 sm:$0xff]  }
 0xd54   : > { %5585 = vmatprep.subr.bf16.mxu0 %v8829_v27  ;;  %5786 = vmatprep.subr.bf16.mxu1 %v8877_v28  ;;  %v8916_v27 = vld [vmem:[#allocation18 + $0x374] ss:$8 sps:$4 sm:$0xff]   ;;  %v8919_v28 = vld [vmem:[#allocation18 + $0x244] ss:$8 sps:$4 sm:$0xff]  }
 0xd57   : > { %5586 = vmatpush1.bf16.msra.mxu0 %v8827_v29  ;;  %5787 = vmatpush1.bf16.msra.mxu1 %v8875_v30  ;;  %v8917_v29 = vld [vmem:[#allocation18 + $0x240] ss:$8 sps:$4 sm:$0xff]   ;;  %v6100_v30 = vld [vmem:[#allocation16 + $0x3] sm:$0x1] }
 0xd58   : > { %5587 = vmatprep.subr.bf16.mxu0 %v8832_v32  ;;  %5788 = vmatprep.subr.bf16.mxu1 %v8880_v33  ;;  %v8914_v32 = vld [vmem:[#allocation18 + $0x370] ss:$8 sps:$4 sm:$0xff]   ;;  %v8922_v33 = vld [vmem:[#allocation18 + $0x364] ss:$8 sps:$4 sm:$0xff]  }
 0xd5b   : > { %5588 = vmatpush1.bf16.msra.mxu0 %v8830_v35  ;;  %5789 = vmatpush1.bf16.msra.mxu1 %v8878_v37  ;;  %v8923_v35 = vld [vmem:[#allocation18 + $0x230] ss:$8 sps:$4 sm:$0xff]   ;;  %v8931_v37 = vld [vmem:[#allocation18 + $0x224] ss:$8 sps:$4 sm:$0xff]  }
 0xd5c   : > { %5589 = vmatprep.subr.bf16.mxu0 %v8835_v38  ;;  %5790 = vmatprep.subr.bf16.mxu1 %v8883_v39  ;;  %v8920_v38 = vld [vmem:[#allocation18 + $0x360] ss:$8 sps:$4 sm:$0xff]   ;;  %v8937_v39 = vld [vmem:[#allocation18 + $0x214] ss:$8 sps:$4 sm:$0xff]  }
 0xd5f   : > { %5590 = vmatpush2.bf16.msra.mxu0 %v8833_v34  ;;  %5791 = vmatpush2.bf16.msra.mxu1 %v8881_v36  ;;  %v8926_v34 = vld [vmem:[#allocation18 + $0x350] ss:$8 sps:$4 sm:$0xff]   ;;  %v8934_v36 = vld [vmem:[#allocation18 + $0x344] ss:$8 sps:$4 sm:$0xff]  }
 0xd60   : > { %5591 = vmatprep.subr.bf16.mxu0 %v8838_v40  ;;  %5792 = vmatprep.subr.bf16.mxu1 %v8886_v41  ;;  %v8935_v40 = vld [vmem:[#allocation18 + $0x210] ss:$8 sps:$4 sm:$0xff]   ;;  %v8943_v41 = vld [vmem:[#allocation18 + $0x204] ss:$8 sps:$4 sm:$0xff]  }
 0xd63   : > { %5592 = vmatpush2.bf16.msra.mxu0 %v8836_v53  ;;  %5793 = vmatpush2.bf16.msra.mxu1 %v8884_v42  ;;  %v8932_v53 = vld [vmem:[#allocation18 + $0x340] ss:$8 sps:$4 sm:$0xff]   ;;  %v8940_v42 = vld [vmem:[#allocation18 + $0x334] ss:$8 sps:$4 sm:$0xff]  }
 0xd64   : > { %5593 = vmatprep.subr.bf16.mxu0 %v8841_v43  ;;  %5794 = vmatprep.subr.bf16.mxu1 %v8889_v44  ;;  %v8941_v43 = vld [vmem:[#allocation18 + $0x200] ss:$8 sps:$4 sm:$0xff]   ;;  %v8949_v44 = vld [vmem:[#allocation18 + $0x2f4] ss:$8 sps:$4 sm:$0xff]  }
 0xd67   : > { %5594 = vmatpush2.bf16.msra.mxu0 %v8839_v45  ;;  %5795 = vmatpush2.bf16.msra.mxu1 %v8887_v46  ;;  %v8938_v45 = vld [vmem:[#allocation18 + $0x330] ss:$8 sps:$4 sm:$0xff]   ;;  %v8946_v46 = vld [vmem:[#allocation18 + $0x324] ss:$8 sps:$4 sm:$0xff]  }
 0xd68   : > { %5595 = vmatprep.subr.bf16.mxu0 %v8844_v47  ;;  %5796 = vmatprep.subr.bf16.mxu1 %v8892_v48  ;;  %v8947_v47 = vld [vmem:[#allocation18 + $0x2f0] ss:$8 sps:$4 sm:$0xff]   ;;  %v8955_v48 = vld [vmem:[#allocation18 + $0x2e4] ss:$8 sps:$4 sm:$0xff]  }
 0xd6b   : > { %5596 = vmatpush2.bf16.msra.mxu0 %v8842_v50  ;;  %5797 = vmatpush2.bf16.msra.mxu1 %v8890_v22  ;;  %v8944_v50 = vld [vmem:[#allocation18 + $0x320] ss:$8 sps:$4 sm:$0xff]   ;;  %v8952_v22 = vld [vmem:[#allocation18 + $0x314] ss:$8 sps:$4 sm:$0xff]  }
 0xd6c   : > { %5597 = vmatprep.subr.bf16.mxu0 %v8847_v52  ;;  %5798 = vmatprep.subr.bf16.mxu1 %v8895_v61  ;;  %v8953_v52 = vld [vmem:[#allocation18 + $0x2e0] ss:$8 sps:$4 sm:$0xff]   ;;  %v8961_v61 = vld [vmem:[#allocation18 + $0x2d4] ss:$8 sps:$4 sm:$0xff]  }
 0xd6f   : > { %5598 = vmatpush2.bf16.msra.mxu0 %v8845_v26  ;;  %5799 = vmatpush2.bf16.msra.mxu1 %v8893_v54  ;;  %v8950_v26 = vld [vmem:[#allocation18 + $0x310] ss:$8 sps:$4 sm:$0xff]   ;;  %v8958_v54 = vld [vmem:[#allocation18 + $0x304] ss:$8 sps:$4 sm:$0xff]  }
 0xd70   : > { %5599 = vmatprep.subr.bf16.mxu0 %v8850_v55  ;;  %5800 = vmatprep.subr.bf16.mxu1 %v8898_v51  ;;  %v8959_v55 = vld [vmem:[#allocation18 + $0x2d0] ss:$8 sps:$4 sm:$0xff]   ;;  %v8967_v51 = vld [vmem:[#allocation18 + $0x2c4] ss:$8 sps:$4 sm:$0xff]  }
 0xd73   : > { %5600 = vmatpush2.bf16.msra.mxu0 %v8848_v58  ;;  %5801 = vmatpush2.bf16.msra.mxu1 %v8896_v56  ;;  %v8956_v58 = vld [vmem:[#allocation18 + $0x300] ss:$8 sps:$4 sm:$0xff]   ;;  %v8964_v56 = vld [vmem:[#allocation18 + $0x3f4] ss:$8 sps:$4 sm:$0xff]  }
 0xd74   : > { %5601 = vmatprep.subr.bf16.mxu0 %v8853_v1  ;;  %5802 = vmatprep.subr.bf16.mxu1 %v8901_v2  ;;  %v8965_v1 = vld [vmem:[#allocation18 + $0x2c0] ss:$8 sps:$4 sm:$0xff]   ;;  %v8973_v2 = vld [vmem:[#allocation18 + $0x2b4] ss:$8 sps:$4 sm:$0xff]  }
 0xd77   : > { %5602 = vmatpush2.bf16.msra.mxu0 %v8851_v7  ;;  %5803 = vmatpush2.bf16.msra.mxu1 %v8899_v4  ;;  %v8962_v7 = vld [vmem:[#allocation18 + $0x3f0] ss:$8 sps:$4 sm:$0xff]   ;;  %v8970_v4 = vld [vmem:[#allocation18 + $0x3e4] ss:$8 sps:$4 sm:$0xff]  }
 0xd78   : > { %5603 = vmatprep.subr.bf16.mxu0 %v8856_v5  ;;  %5804 = vmatprep.subr.bf16.mxu1 %v8904_v6  ;;  %v8971_v5 = vld [vmem:[#allocation18 + $0x2b0] ss:$8 sps:$4 sm:$0xff]   ;;  %v8976_v6 = vld [vmem:[#allocation18 + $0x3d4] ss:$8 sps:$4 sm:$0xff]  }
 0xd7b   : > { %5604 = vmatpush2.bf16.msra.mxu0 %v8854_v49  ;;  %5805 = vmatpush2.bf16.msra.mxu1 %v8902_v8  ;;  %v8968_v49 = vld [vmem:[#allocation18 + $0x3e0] ss:$8 sps:$4 sm:$0xff]   ;;  %v8974_v8 = vld [vmem:[#allocation18 + $0x3d0] ss:$8 sps:$4 sm:$0xff]  }
 0xd7c   : > { %7766 = vmatprep.subr.msk.bf16.mxu0 %vm5250_vm14, %v10660_v31  ;;  %6056 = vmatprep.subr.bf16.mxu1 %v8907_v9  ;;  %v8979_v9 = vld [vmem:[#allocation18 + $0x2a4] ss:$8 sps:$4 sm:$0xff]  }
 0xdfe   : > { %v5291_v10 = vpop.f32.mrf.mxu0  ;;  %v5371_v11 = vpop.f32.mrf.mxu1 }
 0xdff   : > { %v5298_v12 = vpack.c.bf16 %v5291_v10, %v5291_v10  ;;  %v5378_v17 = vpack.c.bf16 %v5371_v11, %v5371_v11  ;;  %v8982_v10 = vld [vmem:[#allocation18 + $0x3c4] ss:$8 sps:$4 sm:$0xff]   ;;  %v8977_v11 = vld [vmem:[#allocation18 + $0x2a0] ss:$8 sps:$4 sm:$0xff]  }
 0xe00   : > { %v5293_v13 = vpop.f32.mrf.mxu0  ;;  %v5373_v14 = vpop.f32.mrf.mxu1 }
 0xe01   : > { %v5299_v15 = vpack.c.bf16 %v5293_v13, %v5293_v13  ;;  %v5379_v16 = vpack.c.bf16 %v5373_v14, %v5373_v14  ;;  %v8985_v13 = vld [vmem:[#allocation18 + $0x294] ss:$8 sps:$4 sm:$0xff]  }
 0xe02   : > { %v5375_v18 = vpop.f32.mrf.mxu1  ;;  %v5295_v59 = vpop.f32.mrf.mxu0  ;;  %v8988_v14 = vld [vmem:[#allocation18 + $0x3b4] ss:$8 sps:$4 sm:$0xff]  }
 0xe03   : > { %5605 = vmatprep.mubr.bf16.mxu0 %v5379_v16  ;;  %5806 = vmatprep.mubr.bf16.mxu1 %v5299_v15  ;;  %v8983_v15 = vld [vmem:[#allocation18 + $0x290] ss:$8 sps:$4 sm:$0xff]   ;;  %v8994_v18 = vld [vmem:[#allocation18 + $0x3a4] ss:$8 sps:$4 sm:$0xff]   ;;  %v8989_v59 = vld [vmem:[#allocation18 + $0x280] ss:$8 sps:$4 sm:$0xff]  }
 0xe04   : > { %v5376_v60 = vpop.f32.mrf.mxu1  ;;  %5606 = vmatmul.mubr.bf16.vlgmr.msra.gmra.mxu0 %v5378_v17  ;;  %5807 = vmatmul.mubr.bf16.vlgmr.msra.gmra.mxu1 %v5298_v12  ;;  %v5296_v57 = vpop.f32.mrf.mxu0  ;;  %v8980_v12 = vld [vmem:[#allocation18 + $0x3c0] ss:$8 sps:$4 sm:$0xff]   ;;  %v8986_v16 = vld [vmem:[#allocation18 + $0x3b0] ss:$8 sps:$4 sm:$0xff]   ;;  %v8991_v17 = vld [vmem:[#allocation18 + $0x284] ss:$8 sps:$4 sm:$0xff]  }
 0xe05   : > { %5835 = vmatpush1.bf16.msra.mxu0 %v10667_v3  ;;  %5852 = vmatprep.mubr.bf16.mxu0 %v9353_v25  ;;  %v8995_v60 = vld [vmem:[#allocation18 + $0x390] ss:$8 sps:$4 sm:$0xff]   ;;  %v9000_v57 = vld [vmem:[#allocation18 + $0x384] ss:$8 sps:$4 sm:$0xff]  }
 0xe06   : > { %7800 = vmatprep.subr.msk.bf16.mxu0 %vm5250_vm14, %v10660_v31  ;;  %6057 = vmatpush1.bf16.msra.mxu1 %v8905_v63  ;;  %v8925_v31 = vld [vmem:[#allocation18 + $0x234] ss:$8 sps:$4 sm:$0xff]   ;;  %v8992_v63 = vld [vmem:[#allocation18 + $0x3a0] ss:$8 sps:$4 sm:$0xff]  }
 0xe07   : > { %6058 = vmatprep.subr.bf16.mxu1 %v8910_v19  ;;  %v8997_v19 = vld [vmem:[#allocation18 + $0x394] ss:$8 sps:$4 sm:$0xff]  }
 0xe0a   : > { %6059 = vmatpush1.bf16.msra.mxu1 %v8908_v20  ;;  %v8998_v20 = vld [vmem:[#allocation18 + $0x380] ss:$8 sps:$4 sm:$0xff]  }
 0xe0b   : > { %6060 = vmatprep.subr.bf16.mxu1 %v8913_v21  ;;  %v6414_v21 = vld [vmem:[%s11210_s18 + $0xf8] sm:$0xff] }
 0xe0c   : > { %7767 = vmatmul.mubr.msk.bf16.vlgmr.msra.gmra.mxu0 %vm5246_vm15, %v5816_v23 }
 0xe0d   : > { %6119 = vmatpush1.bf16.msra.mxu0 %v10667_v3  ;;  %6136 = vmatprep.mubr.bf16.mxu0 %v9353_v25  ;;  %v8928_v3 = vld [vmem:[#allocation18 + $0x354] ss:$8 sps:$4 sm:$0xff]   ;;  %v8929_v25 = vld [vmem:[#allocation18 + $0x220] ss:$8 sps:$4 sm:$0xff]  }
 0xe0e   : > { %6340 = vmatprep.subr.bf16.mxu0 %v8916_v27  ;;  %6061 = vmatpush1.bf16.msra.mxu1 %v8911_v24 }
 0xe0f   : > { %6062 = vmatprep.subr.bf16.mxu1 %v8919_v28 }
 0xe12   : > { %6063 = vmatpush1.bf16.msra.mxu1 %v8917_v29 }
 0xe13   : > { %6064 = vmatprep.subr.bf16.mxu1 %v8925_v31 }
 0xe14   : > { %7801 = vmatmul.mubr.msk.bf16.vlgmr.msra.gmra.mxu0 %vm5246_vm15, %v6100_v30 }
 0xe15   : > { %6341 = vmatpush1.bf16.msra.mxu0 %v8914_v32 }
 0xe16   : > { %6342 = vmatprep.subr.bf16.mxu0 %v8922_v33  ;;  %6065 = vmatpush1.bf16.msra.mxu1 %v8923_v35 }
 0xe17   : > { %6066 = vmatprep.subr.bf16.mxu1 %v8931_v37 }
 0xe19   : > { %6343 = vmatpush1.bf16.msra.mxu0 %v8920_v38 }
 0xe1a   : > { %6344 = vmatprep.subr.bf16.mxu0 %v8928_v3  ;;  %6067 = vmatpush1.bf16.msra.mxu1 %v8929_v25 }
 0xe1b   : > { %6068 = vmatprep.subr.bf16.mxu1 %v8937_v39 }
 0xe1d   : > { %6345 = vmatpush1.bf16.msra.mxu0 %v8926_v34  ;;  %v6398_v34 = vld [vmem:[%s11210_s18 + $0x78] sm:$0xff] }
 0xe1e   : > { %6346 = vmatprep.subr.bf16.mxu0 %v8934_v36  ;;  %6069 = vmatpush1.bf16.msra.mxu1 %v8935_v40  ;;  %v6413_v36 = vld [vmem:[%s11210_s18 + $0xf0] sm:$0xff] }
 0xe1f   : > { %6070 = vmatprep.subr.bf16.mxu1 %v8943_v41  ;;  %v6397_v41 = vld [vmem:[%s11210_s18 + $0x70] sm:$0xff] }
 0xe21   : > { %6347 = vmatpush1.bf16.msra.mxu0 %v8932_v53  ;;  %v6412_v53 = vld [vmem:[%s11210_s18 + $0xe8] sm:$0xff] }
 0xe22   : > { %6348 = vmatprep.subr.bf16.mxu0 %v8940_v42  ;;  %6071 = vmatpush1.bf16.msra.mxu1 %v8941_v43 }
 0xe23   : > { %6072 = vmatprep.subr.bf16.mxu1 %v8949_v44 }
 0xe25   : > { %6349 = vmatpush1.bf16.msra.mxu0 %v8938_v45 }
 0xe26   : > { %6350 = vmatprep.subr.bf16.mxu0 %v8946_v46  ;;  %6073 = vmatpush2.bf16.msra.mxu1 %v8947_v47 }
 0xe27   : > { %6074 = vmatprep.subr.bf16.mxu1 %v8955_v48  ;;  %v6396_v48 = vld [vmem:[%s11210_s18 + $0x68] sm:$0xff] }
 0xe29   : > { %6351 = vmatpush1.bf16.msra.mxu0 %v8944_v50  ;;  %v6411_v50 = vld [vmem:[%s11210_s18 + $0xe0] sm:$0xff] }
 0xe2a   : > { %6352 = vmatprep.subr.bf16.mxu0 %v8952_v22  ;;  %6075 = vmatpush2.bf16.msra.mxu1 %v8953_v52  ;;  %v6395_v22 = vld [vmem:[%s11210_s18 + $0x60] sm:$0xff]  ;;  %v6410_v52 = vld [vmem:[%s11210_s18 + $0xd8] sm:$0xff] }
 0xe2b   : > { %6076 = vmatprep.subr.bf16.mxu1 %v8961_v61  ;;  %v6394_v61 = vld [vmem:[%s11210_s18 + $0x58] sm:$0xff] }
 0xe2d   : > { %6353 = vmatpush1.bf16.msra.mxu0 %v8950_v26  ;;  %v6409_v26 = vld [vmem:[%s11210_s18 + $0xd0] sm:$0xff] }
 0xe2e   : > { %6354 = vmatprep.subr.bf16.mxu0 %v8958_v54  ;;  %6077 = vmatpush2.bf16.msra.mxu1 %v8959_v55  ;;  %v6393_v54 = vld [vmem:[%s11210_s18 + $0x50] sm:$0xff]  ;;  %v6408_v55 = vld [vmem:[%s11210_s18 + $0xc8] sm:$0xff] }
 0xe2f   : > { %6078 = vmatprep.subr.bf16.mxu1 %v8967_v51  ;;  %v6392_v51 = vld [vmem:[%s11210_s18 + $0x48] sm:$0xff] }
 0xe31   : > { %6355 = vmatpush1.bf16.msra.mxu0 %v8956_v58  ;;  %v6407_v58 = vld [vmem:[%s11210_s18 + $0xc0] sm:$0xff] }
 0xe32   : > { %6356 = vmatprep.subr.bf16.mxu0 %v8964_v56  ;;  %6079 = vmatpush2.bf16.msra.mxu1 %v8965_v1  ;;  %v6391_v56 = vld [vmem:[%s11210_s18 + $0x40] sm:$0xff]  ;;  %v6406_v1 = vld [vmem:[%s11210_s18 + $0xb8] sm:$0xff] }
 0xe33   : > { %6080 = vmatprep.subr.bf16.mxu1 %v8973_v2  ;;  %v6390_v2 = vld [vmem:[%s11210_s18 + $0x38] sm:$0xff] }
 0xe35   : > { %6357 = vmatpush2.bf16.msra.mxu0 %v8962_v7  ;;  %v6405_v7 = vld [vmem:[%s11210_s18 + $0xb0] sm:$0xff] }
 0xe36   : > { %6358 = vmatprep.subr.bf16.mxu0 %v8970_v4  ;;  %6081 = vmatpush2.bf16.msra.mxu1 %v8971_v5  ;;  %v6389_v4 = vld [vmem:[%s11210_s18 + $0x30] sm:$0xff]  ;;  %v6404_v5 = vld [vmem:[%s11210_s18 + $0xa8] sm:$0xff] }
 0xe37   : > { %6082 = vmatprep.subr.bf16.mxu1 %v8979_v9  ;;  %v6402_v9 = vld [vmem:[%s11210_s18 + $0x98] sm:$0xff] }
 0xe39   : > { %6359 = vmatpush2.bf16.msra.mxu0 %v8968_v49  ;;  %v6388_v49 = vld [vmem:[%s11210_s18 + $0x28] sm:$0xff] }
 0xe3a   : > { %6360 = vmatprep.subr.bf16.mxu0 %v8976_v6  ;;  %6083 = vmatpush2.bf16.msra.mxu1 %v8977_v11  ;;  %v6403_v6 = vld [vmem:[%s11210_s18 + $0xa0] sm:$0xff]  ;;  %v6401_v11 = vld [vmem:[%s11210_s18 + $0x90] sm:$0xff] }
 0xe3b   : > { %6084 = vmatprep.subr.bf16.mxu1 %v8985_v13  ;;  %v6400_v13 = vld [vmem:[%s11210_s18 + $0x88] sm:$0xff] }
 0xe3d   : > { %6361 = vmatpush2.bf16.msra.mxu0 %v8974_v8  ;;  %v6387_v8 = vld [vmem:[%s11210_s18 + $0x20] sm:$0xff] }
 0xe3e   : > { %6362 = vmatprep.subr.bf16.mxu0 %v8982_v10  ;;  %6085 = vmatpush2.bf16.msra.mxu1 %v8983_v15  ;;  %v6386_v10 = vld [vmem:[%s11210_s18 + $0x18] sm:$0xff]  ;;  %v6399_v15 = vld [vmem:[%s11210_s18 + $0x80] sm:$0xff] }
 0xe3f   : > { %6086 = vmatprep.subr.bf16.mxu1 %v8991_v17  ;;  %v10786_v17 = vld [vmem:[%s11211_s19 + $0xf8] sm:$0xff] }
 0xe41   : > { %6363 = vmatpush2.bf16.msra.mxu0 %v8980_v12  ;;  %v6385_v12 = vld [vmem:[%s11210_s18 + $0x10] sm:$0xff] }
 0xe42   : > { %6364 = vmatprep.subr.bf16.mxu0 %v8988_v14  ;;  %6087 = vmatpush2.bf16.msra.mxu1 %v8989_v59  ;;  %v6384_v14 = vld [vmem:[%s11210_s18 + $0x8] sm:$0xff] }
 0xe43   : > { %8060 = vmatprep.subr.mxu1 %v6414_v21 }
 0xe45   : > { %6365 = vmatpush2.bf16.msra.mxu0 %v8986_v16  ;;  %v6383_v16 = vld [vmem:[%s11210_s18] sm:$0xff] }
 0xe46   : > { %6366 = vmatprep.subr.bf16.mxu0 %v8994_v18 }
 0xe49   : > { %6367 = vmatpush2.bf16.msra.mxu0 %v8992_v63 }
 0xe4a   : > { %6368 = vmatprep.subr.bf16.mxu0 %v8997_v19 }
 0xe4d   : > { %6369 = vmatpush2.bf16.msra.mxu0 %v8995_v60 }
 0xe4e   : > { %6370 = vmatprep.subr.bf16.mxu0 %v9000_v57 }
 0xe51   : > { %6371 = vmatpush2.bf16.msra.mxu0 %v8998_v20 }
 0xe52   : > { %8095 = vmatprep.subr.mxu0 %v6414_v21 }
 0xec4   : > { %v5607_v23 = vpop.f32.mrf.mxu0  ;;  %v5808_v24 = vpop.f32.mrf.mxu1 }
 0xec5   : > { %v10686_v27 = vadd.f32 %v5808_v24, %v5607_v23 }
 0xec6   : > { %v5609_v28 = vpop.f32.mrf.mxu0  ;;  %v5810_v29 = vpop.f32.mrf.mxu1 }
 0xec7   : > { %v10688_v31 = vadd.f32 %v5810_v29, %v5609_v28 }
 0xec8   : > { %v5611_v30 = vpop.f32.mrf.mxu0  ;;  %v5812_v32 = vpop.f32.mrf.mxu1 }
 0xeca   : > { %v5612_v33 = vpop.f32.mrf.mxu0  ;;  %v5813_v35 = vpop.f32.mrf.mxu1 }
 0xecc   : > { %v5854_v37 = vpop.f32.mrf.mxu0 }
 0xecd   : > { %v5861_v25 = vpack.c.bf16 %v5854_v37, %v5854_v37 }
 0xece   : > { %v5856_v38 = vpop.f32.mrf.mxu0 }
 0xecf   : > { %v5862_v3 = vpack.c.bf16 %v5856_v38, %v5856_v38 }
 0xed0   : > { %v5858_v39 = vpop.f32.mrf.mxu0 }
 0xed1   : > { %6088 = vmatprep.mubr.bf16.mxu1 %v5862_v3 }
 0xed2   : > { %v5859_v40 = vpop.f32.mrf.mxu0  ;;  %6089 = vmatmul.mubr.bf16.vlgmr.msra.gmra.mxu1 %v5861_v25 }
 0xed3   : > { %8061 = vmatpush3.msra.mxu1 %v6398_v34 }
 0xed4   : > { %v6138_v42 = vpop.f32.mrf.mxu0  ;;  %8062 = vmatprep.subr.mxu1 %v6413_v36 }
 0xed5   : > { %8063 = vmatpush3.msra.mxu1 %v6397_v41  ;;  %v6145_v45 = vpack.c.bf16 %v6138_v42, %v6138_v42 }
 0xed6   : > { %v6140_v43 = vpop.f32.mrf.mxu0  ;;  %8064 = vmatprep.subr.mxu1 %v6412_v53 }
 0xed7   : > { %v6146_v44 = vpack.c.bf16 %v6140_v43, %v6140_v43  ;;  %8065 = vmatpush3.msra.mxu1 %v6396_v48 }
 0xed8   : > { %v6142_v46 = vpop.f32.mrf.mxu0  ;;  %8066 = vmatprep.subr.mxu1 %v6411_v50 }
 0xed9   : > { %6372 = vmatprep.mubr.bf16.mxu0 %v6146_v44  ;;  %8067 = vmatpush3.msra.mxu1 %v6395_v22 }
 0xeda   : > { %v6143_v47 = vpop.f32.mrf.mxu0  ;;  %6373 = vmatmul.mubr.bf16.vlgmr.msra.gmra.mxu0 %v6145_v45  ;;  %8068 = vmatprep.subr.mxu1 %v6410_v52 }
 0xedb   : > { %8096 = vmatpush3.msra.mxu0 %v6398_v34  ;;  %8069 = vmatpush3.msra.mxu1 %v6394_v61 }
 0xedc   : > { %8097 = vmatprep.subr.mxu0 %v6413_v36  ;;  %8070 = vmatprep.subr.mxu1 %v6409_v26 }
 0xedd   : > { %8098 = vmatpush3.msra.mxu0 %v6397_v41  ;;  %8071 = vmatpush3.msra.mxu1 %v6393_v54 }
 0xede   : > { %8099 = vmatprep.subr.mxu0 %v6412_v53  ;;  %8072 = vmatprep.subr.mxu1 %v6408_v55 }
 0xedf   : > { %8100 = vmatpush3.msra.mxu0 %v6396_v48  ;;  %8073 = vmatpush3.msra.mxu1 %v6392_v51 }
 0xee0   : > { %8101 = vmatprep.subr.mxu0 %v6411_v50  ;;  %8074 = vmatprep.subr.mxu1 %v6407_v58 }
 0xee1   : > { %8102 = vmatpush3.msra.mxu0 %v6395_v22  ;;  %8075 = vmatpush3.msra.mxu1 %v6391_v56 }
 0xee2   : > { %8103 = vmatprep.subr.mxu0 %v6410_v52  ;;  %8076 = vmatprep.subr.mxu1 %v6406_v1 }
 0xee3   : > { %8104 = vmatpush3.msra.mxu0 %v6394_v61  ;;  %8077 = vmatpush3.msra.mxu1 %v6390_v2 }
 0xee4   : > { %8105 = vmatprep.subr.mxu0 %v6409_v26  ;;  %8078 = vmatprep.subr.mxu1 %v6405_v7 }
 0xee5   : > { %8106 = vmatpush3.msra.mxu0 %v6393_v54  ;;  %8079 = vmatpush3.msra.mxu1 %v6389_v4  ;;  %v10809_v54 = vld [vmem:[%s11211_s19 + $0xf0] sm:$0xff] }
 0xee6   : > { %8107 = vmatprep.subr.mxu0 %v6408_v55  ;;  %8080 = vmatprep.subr.mxu1 %v6404_v5 }
 0xee7   : > { %8108 = vmatpush3.msra.mxu0 %v6392_v51  ;;  %8081 = vmatpush3.msra.mxu1 %v6388_v49  ;;  %v10814_v51 = vld [vmem:[%s11211_s19 + $0xe8] sm:$0xff] }
 0xee8   : > { %8109 = vmatprep.subr.mxu0 %v6407_v58  ;;  %8082 = vmatprep.subr.mxu1 %v6403_v6 }
 0xee9   : > { %8110 = vmatpush3.msra.mxu0 %v6391_v56  ;;  %8083 = vmatpush3.msra.mxu1 %v6387_v8  ;;  %v10819_v56 = vld [vmem:[%s11211_s19 + $0xe0] sm:$0xff] }
 0xeea   : > { %8111 = vmatprep.subr.mxu0 %v6406_v1  ;;  %8084 = vmatprep.subr.mxu1 %v6402_v9  ;;  %v10832_v1 = vld [vmem:[%s11211_s19 + $0xd8] sm:$0xff] }
 0xeeb   : > { %8112 = vmatpush3.msra.mxu0 %v6390_v2  ;;  %8085 = vmatpush3.msra.mxu1 %v6386_v10  ;;  %v10837_v2 = vld [vmem:[%s11211_s19 + $0xd0] sm:$0xff] }
 0xeec   : > { %8113 = vmatprep.subr.mxu0 %v6405_v7  ;;  %8086 = vmatprep.subr.mxu1 %v6401_v11  ;;  %v10845_v7 = vld [vmem:[%s11211_s19 + $0xc8] sm:$0xff] }
 0xeed   : > { %8114 = vmatpush3.msra.mxu0 %v6389_v4  ;;  %8087 = vmatpush3.msra.mxu1 %v6385_v12  ;;  %v10852_v4 = vld [vmem:[%s11211_s19 + $0xc0] sm:$0xff] }
 0xeee   : > { %8115 = vmatprep.subr.mxu0 %v6404_v5  ;;  %8088 = vmatprep.subr.mxu1 %v6400_v13  ;;  %v10859_v5 = vld [vmem:[%s11211_s19 + $0xb8] sm:$0xff] }
 0xeef   : > { %8116 = vmatpush3.msra.mxu0 %v6388_v49  ;;  %8089 = vmatpush3.msra.mxu1 %v6384_v14  ;;  %v10866_v49 = vld [vmem:[%s11211_s19 + $0xb0] sm:$0xff] }
 0xef0   : > { %8117 = vmatprep.subr.mxu0 %v6403_v6  ;;  %8090 = vmatprep.subr.mxu1 %v6399_v15  ;;  %v10873_v6 = vld [vmem:[%s11211_s19 + $0xa8] sm:$0xff] }
 0xef1   : > { %8118 = vmatpush3.msra.mxu0 %v6387_v8  ;;  %8091 = vmatpush3.msra.mxu1 %v6383_v16  ;;  %v10880_v8 = vld [vmem:[%s11211_s19 + $0xa0] sm:$0xff] }
 0xef2   : > { %8119 = vmatprep.subr.mxu0 %v6402_v9  ;;  %6629 = vmatprep.subr.mxu1 %v10786_v17  ;;  %v10887_v9 = vld [vmem:[%s11211_s19 + $0x98] sm:$0xff] }
 0xef3   : > { %8120 = vmatpush3.msra.mxu0 %v6386_v10  ;;  %v10894_v10 = vld [vmem:[%s11211_s19 + $0x90] sm:$0xff] }
 0xef4   : > { %8121 = vmatprep.subr.mxu0 %v6401_v11  ;;  %v10901_v11 = vld [vmem:[%s11211_s19 + $0x88] sm:$0xff] }
 0xef5   : > { %8122 = vmatpush3.msra.mxu0 %v6385_v12  ;;  %v10908_v12 = vld [vmem:[%s11211_s19 + $0x80] sm:$0xff] }
 0xef6   : > { %8123 = vmatprep.subr.mxu0 %v6400_v13  ;;  %v10915_v13 = vld [vmem:[%s11211_s19 + $0x78] sm:$0xff] }
 0xef7   : > { %8124 = vmatpush3.msra.mxu0 %v6384_v14  ;;  %v10922_v14 = vld [vmem:[%s11211_s19 + $0x70] sm:$0xff] }
 0xef8   : > { %8125 = vmatprep.subr.mxu0 %v6399_v15  ;;  %v10927_v15 = vld [vmem:[%s11211_s19 + $0x68] sm:$0xff] }
 0xef9   : > { %8126 = vmatpush3.msra.mxu0 %v6383_v16  ;;  %v10932_v16 = vld [vmem:[%s11211_s19 + $0x60] sm:$0xff] }
 0xefa   : > { %6700 = vmatprep.subr.mxu0 %v10786_v17 }
 0xf92   : > { %v6090_v18 = vpop.f32.mrf.mxu1 }
 0xf93   : > { %v6097_v60 = vadd.f32 %v6090_v18, %v10686_v27  ;;  %v10939_v18 = vld [vmem:[%s11211_s19 + $0x58] sm:$0xff] }
 0xf94   : > { %v6092_v59 = vpop.f32.mrf.mxu1 }
 0xf95   : > { %v6098_v20 = vadd.f32 %v6092_v59, %v10688_v31  ;;  %v10946_v59 = vld [vmem:[%s11211_s19 + $0x50] sm:$0xff] }
 0xf96   : > { %v6094_v63 = vpop.f32.mrf.mxu1 }
 0xf97   : > { %v10953_v63 = vld [vmem:[%s11211_s19 + $0x48] sm:$0xff] }
 0xf98   : > { %v6095_v19 = vpop.f32.mrf.mxu1 }
 0xf99   : > { %v10960_v19 = vld [vmem:[%s11211_s19 + $0x40] sm:$0xff] }
 0xf9a   : > { %v6374_v57 = vpop.f32.mrf.mxu0 }
 0xf9b   : > { %v10792_v21 = vadd.f32 %v6374_v57, %v6097_v60  ;;  %v10967_v60 = vld [vmem:[%s11211_s19 + $0x38] sm:$0xff]  ;;  %v10974_v57 = vld [vmem:[%s11211_s19 + $0x30] sm:$0xff] }
 0xf9c   : > { %v6376_v23 = vpop.f32.mrf.mxu0 }
 0xf9d   : > { %v6447_v24 = vsel %vm5250_vm14, %v10792_v21, 0.0  ;;  %v6531_v28 = vmul.f32 %v10792_v21, %v10792_v21  ;;  %v10798_v29 = vadd.f32 %v6376_v23, %v6098_v20  ;;  %v10981_v20 = vld [vmem:[%s11211_s19 + $0x28] sm:$0xff]  ;;  %v10988_v23 = vld [vmem:[%s11211_s19 + $0x20] sm:$0xff] }
 0xf9e   : > { %v6448_v30 = vrot.slane %v6447_v24, 4  ;;  %v6378_v32 = vpop.f32.mrf.mxu0 }
 0xf9f   : > { %v6533_v33 = vsel %vm5250_vm14, %v6531_v28, 0.0  ;;  %v6454_v27 = vsel %vm5250_vm14, %v10798_v29, 0.0  ;;  %v6532_v31 = vmul.f32 %v10798_v29, %v10798_v29  ;;  %v11002_v28 = vld [vmem:[%s11211_s19 + $0x10] sm:$0xff]  ;;  %v6415_v32 = vld [vmem:[%s11211_s19] sm:$0xff] }
 0xfa0   : > { %v6449_v35 = vadd.f32 %v6448_v30, %v6447_v24  ;;  %v6534_v37 = vrot.slane %v6533_v33, 4  ;;  %v6455_v38 = vrot.slane %v6454_v27, 4  ;;  %v6379_v3 = vpop.f32.mrf.mxu0  ;;  %v10995_v24 = vld [vmem:[%s11211_s19 + $0x18] sm:$0xff]  ;;  %v11009_v30 = vld [vmem:[%s11211_s19 + $0x8] sm:$0xff] }
 0xfa1   : > { %v6540_v25 = vsel %vm5250_vm14, %v6532_v31, 0.0 }
 0xfa2   : > { %v6450_v39 = vrot.slane %v6449_v35, 2  ;;  %v6535_v34 = vadd.f32 %v6534_v37, %v6533_v33  ;;  %v6456_v36 = vadd.f32 %v6455_v38, %v6454_v27  ;;  %v6541_v40 = vrot.slane %v6540_v25, 4 }
 0xfa4   : > { %v6451_v41 = vadd.f32 %v6450_v39, %v6449_v35  ;;  %v6536_v53 = vrot.slane %v6535_v34, 2  ;;  %v6457_v42 = vrot.slane %v6456_v36, 2  ;;  %v6542_v43 = vadd.f32 %v6541_v40, %v6540_v25  ;;  %v6623_v40 = vld [vmem:[%s11212_s20] sm:$0x1] }
 0xfa6   : > { %v6458_v44 = vadd.f32 %v6457_v42, %v6456_v36  ;;  %v6543_v45 = vrot.slane %v6542_v43, 2  ;;  %v6537_v46 = vadd.f32 %v6536_v53, %v6535_v34  ;;  %v6452_v47 = vrot.slane %v6451_v41, 1  ;;  %v6624_v53 = vld [vmem:[%s11212_s20 + $0x1] sm:$0x1] }
 0xfa8   : > { %v6459_v48 = vrot.slane %v6458_v44, 1  ;;  %v6544_v50 = vadd.f32 %v6543_v45, %v6542_v43  ;;  %v6538_v22 = vrot.slane %v6537_v46, 1  ;;  %v6453_v26 = vadd.f32 %v6452_v47, %v6451_v41  ;;  %v6906_v45 = vld [vmem:[%s11213_s21 + $0x78] sm:$0xff]  ;;  %v6904_v47 = vld [vmem:[%s11213_s21 + $0x68] sm:$0xff] }
 0xfaa   : > { %v6460_v52 = vadd.f32 %v6459_v48, %v6458_v44  ;;  %v6545_v61 = vrot.slane %v6544_v50, 1  ;;  %v6539_v58 = vadd.f32 %v6538_v22, %v6537_v46  ;;  %v6625_v44 = vld [vmem:[%s11212_s20 + $0x2] sm:$0x1]  ;;  %v6905_v46 = vld [vmem:[%s11213_s21 + $0x70] sm:$0xff] }
 0xfab   : > { %v6903_v48 = vld [vmem:[%s11213_s21 + $0x60] sm:$0xff]  ;;  %v6901_v22 = vld [vmem:[%s11213_s21 + $0x50] sm:$0xff] }
 0xfac   : > { %6525 = vmatprep.mubr.f32.mxu1 %v6460_v52  ;;  %v6546_v55 = vadd.f32 %v6545_v61, %v6544_v50  ;;  %v6902_v50 = vld [vmem:[%s11213_s21 + $0x58] sm:$0xff]  ;;  %v6900_v52 = vld [vmem:[%s11213_s21 + $0x48] sm:$0xff]  ;;  %v6899_v61 = vld [vmem:[%s11213_s21 + $0x40] sm:$0xff] }
 0xfad   : > { %6526 = vmatmul.mubr.f32.vlgmr.msra.gmra.mxu1 %v6453_v26  ;;  %v6898_v26 = vld [vmem:[%s11213_s21 + $0x38] sm:$0xff] }
 0xfae   : > { %6611 = vmatprep.mubr.f32.mxu0 %v6546_v55  ;;  %6630 = vmatpush1.msra.mxu1 %v10809_v54  ;;  %v6896_v55 = vld [vmem:[%s11213_s21 + $0x28] sm:$0xff] }
 0xfaf   : > { %6612 = vmatmul.mubr.f32.vlgmr.msra.gmra.mxu0 %v6539_v58  ;;  %6631 = vmatprep.subr.mxu1 %v10814_v51  ;;  %v6894_v58 = vld [vmem:[%s11213_s21 + $0x18] sm:$0xff] }
 0xfb0   : > { %6632 = vmatpush1.msra.mxu1 %v10819_v56  ;;  %6701 = vmatpush1.msra.mxu0 %v10809_v54 }
 0xfb1   : > { %6702 = vmatprep.subr.mxu0 %v10814_v51  ;;  %6693 = vmatprep.mubr.f32.mxu1 %v9351_v0 }
 0xfb2   : > { %6703 = vmatpush1.msra.mxu0 %v10819_v56  ;;  %6764 = vmatprep.mubr.f32.mxu0 %v9351_v0 }
 0xfb3   : > { %6633 = vmatprep.subr.mxu1 %v10832_v1  ;;  %6704 = vmatprep.subr.mxu0 %v10832_v1 }
 0xfb4   : > { %6634 = vmatpush1.msra.mxu1 %v10837_v2  ;;  %6705 = vmatpush1.msra.mxu0 %v10837_v2 }
 0xfb5   : > { %6635 = vmatprep.subr.mxu1 %v10845_v7  ;;  %6706 = vmatprep.subr.mxu0 %v10845_v7 }
 0xfb6   : > { %6636 = vmatpush1.msra.mxu1 %v10852_v4  ;;  %6707 = vmatpush1.msra.mxu0 %v10852_v4 }
 0xfb7   : > { %6637 = vmatprep.subr.mxu1 %v10859_v5  ;;  %6708 = vmatprep.subr.mxu0 %v10859_v5 }
 0xfb8   : > { %6638 = vmatpush1.msra.mxu1 %v10866_v49  ;;  %6709 = vmatpush1.msra.mxu0 %v10866_v49 }
 0xfb9   : > { %6639 = vmatprep.subr.mxu1 %v10873_v6  ;;  %6710 = vmatprep.subr.mxu0 %v10873_v6 }
 0xfba   : > { %6640 = vmatpush1.msra.mxu1 %v10880_v8  ;;  %6711 = vmatpush1.msra.mxu0 %v10880_v8 }
 0xfbb   : > { %6641 = vmatprep.subr.mxu1 %v10887_v9  ;;  %6712 = vmatprep.subr.mxu0 %v10887_v9 }
 0xfbc   : > { %6642 = vmatpush1.msra.mxu1 %v10894_v10  ;;  %6713 = vmatpush1.msra.mxu0 %v10894_v10 }
 0xfbd   : > { %6643 = vmatprep.subr.mxu1 %v10901_v11  ;;  %6714 = vmatprep.subr.mxu0 %v10901_v11 }
 0xfbe   : > { %6644 = vmatpush1.msra.mxu1 %v10908_v12  ;;  %6715 = vmatpush1.msra.mxu0 %v10908_v12 }
 0xfbf   : > { %6645 = vmatprep.subr.mxu1 %v10915_v13  ;;  %6716 = vmatprep.subr.mxu0 %v10915_v13 }
 0xfc0   : > { %6646 = vmatpush1.msra.mxu1 %v10922_v14  ;;  %6717 = vmatpush1.msra.mxu0 %v10922_v14 }
 0xfc1   : > { %6647 = vmatprep.subr.mxu1 %v10927_v15  ;;  %6718 = vmatprep.subr.mxu0 %v10927_v15 }
 0xfc2   : > { %6648 = vmatpush1.msra.mxu1 %v10932_v16  ;;  %6719 = vmatpush1.msra.mxu0 %v10932_v16 }
 0xfc3   : > { %6649 = vmatprep.subr.mxu1 %v10939_v18  ;;  %6720 = vmatprep.subr.mxu0 %v10939_v18 }
 0xfc4   : > { %6650 = vmatpush1.msra.mxu1 %v10946_v59  ;;  %6721 = vmatpush1.msra.mxu0 %v10946_v59 }
 0xfc5   : > { %6651 = vmatprep.subr.mxu1 %v10953_v63  ;;  %6722 = vmatprep.subr.mxu0 %v10953_v63 }
 0xfc6   : > { %6652 = vmatpush1.msra.mxu1 %v10960_v19  ;;  %6723 = vmatpush1.msra.mxu0 %v10960_v19 }
 0xfc7   : > { %6653 = vmatprep.subr.mxu1 %v10967_v60  ;;  %6724 = vmatprep.subr.mxu0 %v10967_v60 }
 0xfc8   : > { %6654 = vmatpush1.msra.mxu1 %v10974_v57  ;;  %6725 = vmatpush1.msra.mxu0 %v10974_v57 }
 0xfc9   : > { %6655 = vmatprep.subr.mxu1 %v10981_v20  ;;  %6726 = vmatprep.subr.mxu0 %v10981_v20 }
 0xfca   : > { %6656 = vmatpush1.msra.mxu1 %v10988_v23  ;;  %6727 = vmatpush1.msra.mxu0 %v10988_v23 }
 0xfcb   : > { %6657 = vmatprep.subr.mxu1 %v10995_v24  ;;  %6728 = vmatprep.subr.mxu0 %v10995_v24 }
 0xfcc   : > { %6658 = vmatpush1.msra.mxu1 %v11002_v28  ;;  %6729 = vmatpush1.msra.mxu0 %v11002_v28 }
 0xfcd   : > { %6659 = vmatprep.subr.mxu1 %v11009_v30  ;;  %6730 = vmatprep.subr.mxu0 %v11009_v30 }
 0xfce   : > { %6660 = vmatpush1.msra.mxu1 %v6415_v32  ;;  %6731 = vmatpush1.msra.mxu0 %v6415_v32 }
 0xfcf   : > { %6771 = vmatprep.subr.mxu1 %v10786_v17  ;;  %8188 = vmatprep.subr.mxu0 %v9351_v0 }
0x106d   : > { %v8092_v33 = vpop.f32.mrf.mxu1 }
0x106f   : > { %v8093_v27 = vpop.f32.mrf.mxu1  ;;  %v8127_v31 = vpop.f32.mrf.mxu0 }
0x1070   : > { %v8094_v35 = vadd.f32 %v8093_v27, %v8092_v33 }
0x1071   : > { %v8128_v37 = vpop.f32.mrf.mxu0 }
0x1072   : > { %v6617_v38 = vmul.f32 0.25, %v8094_v35  ;;  %v8129_v3 = vadd.f32 %v8128_v37, %v8127_v31 }
0x1074   : > { %v6619_v25 = vmul.f32 %v6617_v38, %v6617_v38  ;;  %v6618_v39 = vmul.f32 0.25, %v8129_v3 }
0x1076   : > { %v6620_v34 = vsub.f32 %v6618_v39, %v6619_v25 }
0x1078   : > { %v6621_v36 = vadd.f32 1e-05, %v6620_v34 }
0x107a   : > { %9007 = vrsqrt.f32 %v6621_v36 }
0x1087   : > { %v9008_v41 = vpop.eup %9007 }
0x1088   : > { %v6626_v17 = vmul.f32 %v9008_v41, %v6623_v40  ;;  %v6984_v40 = vld [vmem:[%s11215_s23 + $0x10] sm:$0xff]  ;;  %v6983_v41 = vld [vmem:[%s11215_s23 + $0x8] sm:$0xff] }
0x108a   : > { %6694 = vmatmul.mubr.f32.vlgmr.msra.gmra.mxu1 %v6626_v17  ;;  %v6627_v42 = vmul.f32 %v6626_v17, %v6617_v38  ;;  %v6982_v17 = vld [vmem:[%s11215_s23] sm:$0xff] }
0x108b   : > { %6772 = vmatpush1.msra.mxu1 %v10809_v54  ;;  %6835 = vmatprep.mubr.f32.mxu1 %v9351_v0  ;;  %v6897_v54 = vld [vmem:[%s11213_s21 + $0x30] sm:$0xff] }
0x108c   : > { %6773 = vmatprep.subr.mxu1 %v10814_v51  ;;  %v6628_v43 = vsub.f32 %v6624_v53, %v6627_v42  ;;  %v6895_v51 = vld [vmem:[%s11213_s21 + $0x20] sm:$0xff] }
0x108d   : > { %6774 = vmatpush1.msra.mxu1 %v10819_v56  ;;  %v6893_v56 = vld [vmem:[%s11213_s21 + $0x10] sm:$0xff]  ;;  %v6907_v53 = vld [vmem:[%s11214_s22] sm:$0x1] }
0x108e   : > { %6775 = vmatprep.subr.mxu1 %v10832_v1  ;;  %6765 = vmatmul.mubr.f32.vlgmr.msra.gmra.mxu0 %v6628_v43  ;;  %v6892_v1 = vld [vmem:[%s11213_s21 + $0x8] sm:$0xff]  ;;  %v6978_v43 = vld [vmem:[%s11214_s22 + $0x1] sm:$0x1] }
0x108f   : > { %6776 = vmatpush1.msra.mxu1 %v10837_v2  ;;  %8220 = vmatprep.mubr.msk.f32.mxu0 %vm9352_vm0, %v9351_v0  ;;  %v6891_v2 = vld [vmem:[%s11213_s21] sm:$0xff] }
0x1090   : > { %6777 = vmatprep.subr.mxu1 %v10845_v7  ;;  %8189 = vmatpush3.msra.mxu0 %v6906_v45  ;;  %v6989_v7 = vld [vmem:[%s11215_s23 + $0x38] sm:$0xff] }
0x1091   : > { %6778 = vmatpush1.msra.mxu1 %v10852_v4  ;;  %8190 = vmatprep.subr.mxu0 %v9351_v0  ;;  %v6988_v4 = vld [vmem:[%s11215_s23 + $0x30] sm:$0xff] }
0x1092   : > { %6779 = vmatprep.subr.mxu1 %v10859_v5  ;;  %8191 = vmatpush3.msra.mxu0 %v6905_v46  ;;  %v6987_v5 = vld [vmem:[%s11215_s23 + $0x28] sm:$0xff] }
0x1093   : > { %6780 = vmatpush1.msra.mxu1 %v10866_v49  ;;  %8192 = vmatprep.subr.mxu0 %v9351_v0  ;;  %v6986_v49 = vld [vmem:[%s11215_s23 + $0x20] sm:$0xff] }
0x1094   : > { %6781 = vmatprep.subr.mxu1 %v10873_v6  ;;  %8193 = vmatpush3.msra.mxu0 %v6904_v47  ;;  %v6985_v6 = vld [vmem:[%s11215_s23 + $0x18] sm:$0xff]  ;;  %v6990_v47 = vld [vmem:[%s11216_s24] sm:$0x1] }
0x1095   : > { %6782 = vmatpush1.msra.mxu1 %v10880_v8  ;;  %8194 = vmatprep.subr.mxu0 %v9351_v0 }
0x1096   : > { %6783 = vmatprep.subr.mxu1 %v10887_v9  ;;  %8195 = vmatpush3.msra.mxu0 %v6903_v48 }
0x1097   : > { %6784 = vmatpush1.msra.mxu1 %v10894_v10  ;;  %8196 = vmatprep.subr.mxu0 %v9351_v0 }
0x1098   : > { %6785 = vmatprep.subr.mxu1 %v10901_v11  ;;  %8197 = vmatpush3.msra.mxu0 %v6902_v50  ;;  %v7064_v50 = vld [vmem:[%s11216_s24 + $0x1] sm:$0x1] }
0x1099   : > { %6786 = vmatpush1.msra.mxu1 %v10908_v12  ;;  %8198 = vmatprep.subr.mxu0 %v9351_v0 }
0x109a   : > { %6787 = vmatprep.subr.mxu1 %v10915_v13  ;;  %8199 = vmatpush3.msra.mxu0 %v6901_v22 }
0x109b   : > { %6788 = vmatpush1.msra.mxu1 %v10922_v14  ;;  %8200 = vmatprep.subr.mxu0 %v9351_v0 }
0x109c   : > { %6789 = vmatprep.subr.mxu1 %v10927_v15  ;;  %8201 = vmatpush3.msra.mxu0 %v6900_v52 }
0x109d   : > { %6790 = vmatpush1.msra.mxu1 %v10932_v16  ;;  %8202 = vmatprep.subr.mxu0 %v9351_v0 }
0x109e   : > { %6791 = vmatprep.subr.mxu1 %v10939_v18  ;;  %8203 = vmatpush3.msra.mxu0 %v6899_v61 }
0x109f   : > { %6792 = vmatpush1.msra.mxu1 %v10946_v59  ;;  %8204 = vmatprep.subr.mxu0 %v9351_v0 }
0x10a0   : > { %6793 = vmatprep.subr.mxu1 %v10953_v63  ;;  %8205 = vmatpush3.msra.mxu0 %v6898_v26 }
0x10a1   : > { %6794 = vmatpush1.msra.mxu1 %v10960_v19  ;;  %8206 = vmatprep.subr.mxu0 %v9351_v0 }
0x10a2   : > { %6795 = vmatprep.subr.mxu1 %v10967_v60  ;;  %8207 = vmatpush3.msra.mxu0 %v6897_v54 }
0x10a3   : > { %6796 = vmatpush1.msra.mxu1 %v10974_v57  ;;  %8208 = vmatprep.subr.mxu0 %v9351_v0 }
0x10a4   : > { %6797 = vmatprep.subr.mxu1 %v10981_v20  ;;  %8209 = vmatpush3.msra.mxu0 %v6896_v55 }
0x10a5   : > { %6798 = vmatpush1.msra.mxu1 %v10988_v23  ;;  %8210 = vmatprep.subr.mxu0 %v9351_v0 }
0x10a6   : > { %6799 = vmatprep.subr.mxu1 %v10995_v24  ;;  %8211 = vmatpush3.msra.mxu0 %v6895_v51 }
0x10a7   : > { %6800 = vmatpush1.msra.mxu1 %v11002_v28  ;;  %8212 = vmatprep.subr.mxu0 %v9351_v0 }
0x10a8   : > { %6801 = vmatprep.subr.mxu1 %v11009_v30  ;;  %8213 = vmatpush3.msra.mxu0 %v6894_v58 }
0x10a9   : > { %6802 = vmatpush1.msra.mxu1 %v6415_v32  ;;  %8214 = vmatprep.subr.mxu0 %v9351_v0 }
0x10aa   : > { %6836 = vmatmul.mubr.f32.vlgmr.msra.gmra.mxu1 %v6625_v44  ;;  %8223 = vmatprep.subr.mxu1 %v9351_v0 }
0x10ab   : > { %8239 = vmatprep.mubr.msk.f32.mxu1 %vm9352_vm0, %v9351_v0  ;;  %8215 = vmatpush3.msra.mxu0 %v6893_v56 }
0x10ac   : > { %8216 = vmatprep.subr.mxu0 %v9351_v0  ;;  %8224 = vmatpush3.msra.mxu1 %v6989_v7 }
0x10ad   : > { %8217 = vmatpush3.msra.mxu0 %v6892_v1  ;;  %8225 = vmatprep.subr.mxu1 %v9351_v0 }
0x10ae   : > { %8218 = vmatprep.subr.mxu0 %v9351_v0  ;;  %8226 = vmatpush3.msra.mxu1 %v6988_v4 }
0x10af   : > { %8219 = vmatpush3.msra.mxu0 %v6891_v2  ;;  %8227 = vmatprep.subr.mxu1 %v9351_v0 }
0x10b0   : > { %8228 = vmatpush3.msra.mxu1 %v6987_v5 }
0x10b1   : > { %8229 = vmatprep.subr.mxu1 %v9351_v0 }
0x10b2   : > { %8230 = vmatpush3.msra.mxu1 %v6986_v49 }
0x10b3   : > { %8231 = vmatprep.subr.mxu1 %v9351_v0 }
0x10b4   : > { %8232 = vmatpush3.msra.mxu1 %v6985_v6 }
0x10b5   : > { %8233 = vmatprep.subr.mxu1 %v9351_v0 }
0x10b6   : > { %8234 = vmatpush3.msra.mxu1 %v6984_v40 }
0x10b7   : > { %8235 = vmatprep.subr.mxu1 %v9351_v0 }
0x10b8   : > { %8236 = vmatpush3.msra.mxu1 %v6983_v41 }
0x10b9   : > { %8237 = vmatprep.subr.mxu1 %v9351_v0 }
0x10ba   : > { %8238 = vmatpush3.msra.mxu1 %v6982_v17 }
0x114a   : > { %v6695_v8 = vpop.f32.mrf.mxu1 }
0x114b   : > { %v6845_v11 = vrot.slane %v6695_v8, %v9936_v62 }
0x114c   : > { %v6697_v10 = vpop.f32.mrf.mxu1 }
0x114d   : > { %v6849_v13 = vrot.slane %v6697_v10, %v9936_v62  ;;  %v6850_v15 = vmul.f32 %v6845_v11, %v10792_v21 }
0x114e   : > { %v6766_v9 = vpop.f32.mrf.mxu0 }
0x114f   : > { %v6855_v14 = vrot.slane %v6766_v9, %v9936_v62  ;;  %v6851_v18 = vmul.f32 %v6849_v13, %v10798_v29 }
0x1150   : > { %v6768_v12 = vpop.f32.mrf.mxu0 }
0x1151   : > { %v6859_v16 = vrot.slane %v6768_v12, %v9936_v62  ;;  %v6860_v59 = vadd.f32 %v6855_v14, %v6850_v15 }
0x1153   : > { %v6861_v60 = vadd.f32 %v6859_v16, %v6851_v18  ;;  %vm6862_vm0 = vcmp.ge.f32.partialorder %v6860_v59, 0.0 }
0x1155   : > { %vm6863_vm1 = vcmp.ge.f32.partialorder %v6861_v60, 0.0 }
0x116a   : > { %v6837_v63 = vpop.f32.mrf.mxu1 }
0x116b   : > { %v6867_v19 = vrot.slane %v6837_v63, %v9936_v62 }
0x116c   : > { %v6839_v57 = vpop.f32.mrf.mxu1 }
0x116d   : > { %v6872_v20 = vmul.f32 %v6867_v19, %v6860_v59  ;;  %v6871_v23 = vrot.slane %v6839_v57, %v9936_v62 }
0x116f   : > { %v6874_v24 = vsel %vm6862_vm0, %v6860_v59, %v6872_v20  ;;  %v6873_v28 = vmul.f32 %v6871_v23, %v6861_v60 }
0x1170   : > { %v6876_v30 = vsel %vm5250_vm14, %v6874_v24, -inf }
0x1171   : > { %v6877_v21 = vrot.slane %v6876_v30, 4  ;;  %v6875_v32 = vsel %vm6863_vm1, %v6861_v60, %v6873_v28 }
0x1172   : > { %v6883_v33 = vsel %vm5250_vm14, %v6875_v32, -inf }
0x1173   : > { %v6878_v29 = vmax.f32 %v6876_v30, %v6877_v21  ;;  %v6884_v27 = vrot.slane %v6883_v33, 4 }
0x1175   : > { %v6879_v31 = vrot.slane %v6878_v29, 2  ;;  %v6885_v35 = vmax.f32 %v6883_v33, %v6884_v27 }
0x1177   : > { %v6880_v37 = vmax.f32 %v6878_v29, %v6879_v31  ;;  %v6886_v38 = vrot.slane %v6885_v35, 2 }
0x1179   : > { %v6887_v3 = vmax.f32 %v6885_v35, %v6886_v38  ;;  %v6881_v25 = vrot.slane %v6880_v37, 1 }
0x117b   : > { %v6888_v39 = vrot.slane %v6887_v3, 1  ;;  %v6882_v62 = vmax.f32 %v6880_v37, %v6881_v25 }
0x117d   : > { %v6889_v34 = vmax.f32 %v6887_v3, %v6888_v39 }
0x117f   : > { %v6890_v36 = vmax.f32 %v6882_v62, %v6889_v34 }
0x1181   : > { %8221 = vmatmul.mubr.f32.vlgmr.msra.gmra.mxu0 %v6890_v36 }
0x1241   : > { %v6974_v42 = vpop.f32.mrf.mxu0 }
0x1242   : > { %v6975_v44 = vadd.f32 %v6974_v42, %v6907_v53 }
0x1243   : > { %v8222_v45 = vpop.f32.mrf.mxu0 }
0x1244   : > { %vm6979_vm3 = vcmp.ge.f32.partialorder %v6975_v44, 0.0  ;;  %v6980_v46 = vmul.f32 %v6978_v43, %v6975_v44 }
0x1246   : > { %v6981_v0 = vsel %vm6979_vm3, %v6975_v44, %v6980_v46 }
0x1247   : > { %8240 = vmatmul.mubr.msk.f32.vlgmr.msra.gmra.mxu1 %vm1087_vm2, %v6981_v0  ;;  %vm7072_vm2 = vcmask 0  }
0x1307   : > { %v7060_v48 = vpop.f32.mrf.mxu1 }
0x1308   : > { %v7061_v22 = vadd.f32 %v7060_v48, %v6990_v47 }
0x1309   : > { %v8241_v52 = vpop.f32.mrf.mxu1 }
0x130a   : > { %v7065_v61 = vmul.f32 %v7064_v50, %v7061_v22 }
0x130c   : > { %v7066_v26 = vsub.f32 0.0, %v7065_v61 }
0x130e   : > { %v7067_v54 = vmul.f32 1.442695, %v7066_v26 }
0x1310   : > { %9009 = vpow2.f32 %v7067_v54 }
0x131d   : > { %v9010_v55 = vpop.eup %9009 }
0x131e   : > { %v7069_v51 = vadd.f32 1.0, %v9010_v55 }
0x1320   : > { %9011 = vrcp.f32 %v7069_v51 }
0x132d   : > { %v9012_v58 = vpop.eup %9011 }
0x132e   : > { %7073 = vst.msk [vmem:[%s916_s8] sm:$0x1] %vm7072_vm2, %v9012_v58 }
0x132f PF: > { %s41_s29 = sadd.s32 1, %s9329_s29  }
0x1330   : > { %p38_p8 = scmp.ge.s32.totalorder %s41_s29, 4  }
0x1332   :  { %40 = sbr.rel (!%p38_p8) target bundleno = 19 (0x13), region = 219 }
0x1337   :  { %7091 = vsyncpa [#allocation3], 1 }
0x1338   :  { %7093 = vsyncpa [#allocation3 + $0x1], 1 }
0x1339   :  { %7094 = vsyncpa [#allocation5], 1 }
0x133a   :  { %7095 = vsyncpa [#allocation8], 1 }
0x133b   :  { %7096 = vsyncpa [#allocation11], 1 }
0x133c   :  { %7097 = vsyncpa [#allocation14], 1 }
0x133d   :  { %7098 = vsyncpa [#allocation17], 1 }

</bundles_post_ra>
